<compile_context>
chip_gen: v7x
topology: tpu7x:2x2x1
jax: 0.10.0
libtpu: 0.0.40
codegen_flags: <defaults>
</compile_context>

<pallas_src>
import jax
import jax.numpy as jnp
from jax import lax
from jax.experimental import pallas as pl
from jax.experimental.pallas import tpu as pltpu


# ----------------------------- Pallas kernel --------------------------------

def _make_inception_kernel(H, W, c1, c5, c3, c_pad):
    """Builds the fused per-batch Inception kernel (closure over static config)."""
    M = H * W
    c_cat = c1 + c5 + c3

    def pad_hw(t, p):
        # zero-pad the spatial dims of an (H, W, C) VMEM value by p on each side
        h, w, c = t.shape
        zc = jnp.zeros((h, p, c), t.dtype)
        t = jnp.concatenate([zc, t, zc], axis=1)
        zr = jnp.zeros((p, w + 2 * p, c), t.dtype)
        return jnp.concatenate([zr, t, zr], axis=0)

    def patches(t_padded, kh, kw, c):
        # in-VMEM im2col: (H+2p, W+2p, C) -> (M, kh*kw*C), (dy,dx) outer, C inner
        cols = [t_padded[dy:dy + H, dx:dx + W, :].reshape(M, c)
                for dy in range(kh) for dx in range(kw)]
        return jnp.concatenate(cols, axis=-1)

    def kernel(x_ref, w1_ref, w5_ref, w3_ref, ss1_ref, ss5_ref, ss3_ref, o_ref):
        x = x_ref[0]                                         # (M, C_in) bf16

        # ---- stage 1: three 1x1 convs fused into one matmul + BN + ReLU ----
        ss1 = ss1_ref[...]                                   # (2, c_cat) f32
        y = jnp.dot(x, w1_ref[...], preferred_element_type=jnp.float32)
        y = jnp.maximum(y * ss1[0:1, :] + ss1[1:2, :], 0.0)  # (M, c_cat) f32

        b1 = y[:, :c1]                                       # branch1x1 output
        y5 = y[:, c1:c1 + c5].astype(x.dtype)                # branch5x5_1 output
        y3 = y[:, c1 + c5:c_cat].astype(x.dtype)             # branch3x3dbl_1 out

        # ---- stage 2a: 5x5 conv (pad=2) on the 5x5 branch, from VMEM ----
        p5 = patches(pad_hw(y5.reshape(H, W, c5), 2), 5, 5, c5)   # (M, 25*c5)
        ss5 = ss5_ref[...]
        z5 = jnp.dot(p5, w5_ref[...], preferred_element_type=jnp.float32)
        z5 = jnp.maximum(z5 * ss5[0:1, :] + ss5[1:2, :], 0.0)     # (M, c5)

        # ---- stage 2b: 3x3 conv (pad=1) on the 3x3dbl branch, from VMEM ----
        p3 = patches(pad_hw(y3.reshape(H, W, c3), 1), 3, 3, c3)   # (M, 9*c3)
        ss3 = ss3_ref[...]
        z3 = jnp.dot(p3, w3_ref[...], preferred_element_type=jnp.float32)
        z3 = jnp.maximum(z3 * ss3[0:1, :] + ss3[1:2, :], 0.0)     # (M, c3)

        # ---- channel concat (+ pad to lane-dense 128-multiple width) ----
        pieces = [b1, z5, z3]
        if c_pad > c_cat:
            pieces.append(jnp.zeros((M, c_pad - c_cat), jnp.float32))
        o_ref[0] = jnp.concatenate(pieces, axis=-1)

    return kernel


# ------------------------------ JAX glue -------------------------------------

def fold_bn(gamma, beta, running_mean, running_var, eps=1e-3):
    scale = gamma / jnp.sqrt(running_var + eps)
    shift = beta - running_mean * scale
    return scale, shift


def _flat_conv_weight(w):
    """(C_out, C_in, kh, kw) -> (kh*kw*C_in, C_out), matching in-kernel patches."""
    c_out, c_in, kh, kw = w.shape
    return jnp.transpose(w, (2, 3, 1, 0)).reshape(kh * kw * c_in, c_out)


def _ss(p):
    """Folded BN scale/shift packed as a single (2, C_out) f32 operand."""
    scale, shift = fold_bn(p["gamma"], p["beta"], p["mean"], p["var"])
    return jnp.stack([scale, shift], axis=0).astype(jnp.float32)


def inception_forward(x_nchw, params, *, compute_dtype=jnp.bfloat16):
    """Full Inception forward. Input/output NCHW (matches PyTorch)."""
    N, C_in, H, W = x_nchw.shape
    p1 = params["branch1x1"]
    p5a, p5b = params["branch5x5_1"], params["branch5x5_2"]
    p3a, p3b = params["branch3x3dbl_1"], params["branch3x3dbl_2"]

    c1, c5, c3 = p1["w"].shape[0], p5b["w"].shape[0], p3b["w"].shape[0]
    c_cat = c1 + c5 + c3
    c_pad = ((c_cat + 127) // 128) * 128       # lane-dense output width
    M = H * W

    # NCHW -> (N, H*W, C_in), bf16 operands (f32 accumulation inside kernel)
    x2d = jnp.transpose(x_nchw, (0, 2, 3, 1)).reshape(N, M, C_in)
    x2d = x2d.astype(compute_dtype)

    # Fused stage-1 weight: the three 1x1 convs share the same input x.
    w1 = jnp.concatenate([_flat_conv_weight(p1["w"]),
                          _flat_conv_weight(p5a["w"]),
                          _flat_conv_weight(p3a["w"])], axis=1).astype(compute_dtype)
    ss1 = jnp.concatenate([_ss(p1), _ss(p5a), _ss(p3a)], axis=1)   # (2, c_cat)

    w5 = _flat_conv_weight(p5b["w"]).astype(compute_dtype)          # (25*c5, c5)
    ss5 = _ss(p5b)
    w3 = _flat_conv_weight(p3b["w"]).astype(compute_dtype)          # (9*c3, c3)
    ss3 = _ss(p3b)

    kernel = _make_inception_kernel(H, W, c1, c5, c3, c_pad)

    out = pl.pallas_call(
        kernel,
        out_shape=jax.ShapeDtypeStruct((N, M, c_pad), jnp.float32),
        grid_spec=pltpu.PrefetchScalarGridSpec(
            num_scalar_prefetch=0,
            grid=(N,),                       # >= 2 "parallel" steps for v7x megacore
            in_specs=[
                pl.BlockSpec((1, M, C_in), lambda b: (b, 0, 0)),
                pl.BlockSpec(w1.shape, lambda b: (0, 0)),
                pl.BlockSpec(w5.shape, lambda b: (0, 0)),
                pl.BlockSpec(w3.shape, lambda b: (0, 0)),
                pl.BlockSpec(ss1.shape, lambda b: (0, 0)),
                pl.BlockSpec(ss5.shape, lambda b: (0, 0)),
                pl.BlockSpec(ss3.shape, lambda b: (0, 0)),
            ],
            out_specs=pl.BlockSpec((1, M, c_pad), lambda b: (b, 0, 0)),
        ),
        compiler_params=pltpu.CompilerParams(
            dimension_semantics=("parallel",)),
    )(x2d, w1, w5, w3, ss1, ss5, ss3)

    out = out[:, :, :c_cat].reshape(N, H, W, c_cat)   # drop lane padding
    return jnp.transpose(out, (0, 3, 1, 2))           # NHWC -> NCHW


# --------------------------- deterministic params ----------------------------

def make_basic_conv_params(key, c_in, c_out, k):
    k0, k1, k2, k3, k4 = jax.random.split(key, 5)
    return {
        "w": 0.1 * jax.random.normal(k0, (c_out, c_in, k, k), jnp.float32),
        "gamma": 0.5 + jax.random.uniform(k1, (c_out,), jnp.float32),
        "beta": 0.1 * jax.random.normal(k2, (c_out,), jnp.float32),
        "mean": 0.1 * jax.random.normal(k3, (c_out,), jnp.float32),
        "var": 0.5 + jax.random.uniform(k4, (c_out,), jnp.float32),
    }


def make_inception_params(key, in_channels, in_planes):
    keys = jax.random.split(key, 5)
    return {
        "branch1x1":      make_basic_conv_params(keys[0], in_channels, in_planes, 1),
        "branch5x5_1":    make_basic_conv_params(keys[1], in_channels, 2 * in_planes, 1),
        "branch5x5_2":    make_basic_conv_params(keys[2], 2 * in_planes, 2 * in_planes, 5),
        "branch3x3dbl_1": make_basic_conv_params(keys[3], in_channels, in_planes, 1),
        "branch3x3dbl_2": make_basic_conv_params(keys[4], in_planes, in_planes, 3),
    }


# ------------------------------ reference check ------------------------------

def basic_conv2d_ref(x_nchw, p, pad, cast_dtype=None):
    w, xx = p["w"], x_nchw
    if cast_dtype is not None:          # mirror the kernel's bf16 MXU operands
        w, xx = w.astype(cast_dtype), xx.astype(cast_dtype)
    y = lax.conv_general_dilated(
        xx, w, window_strides=(1, 1), padding=[(pad, pad), (pad, pad)],
        dimension_numbers=("NCHW", "OIHW", "NCHW"),
        preferred_element_type=jnp.float32)
    scale, shift = fold_bn(p["gamma"], p["beta"], p["mean"], p["var"])
    return jnp.maximum(y * scale[None, :, None, None]
                       + shift[None, :, None, None], 0.0)


def inception_ref(x_nchw, params, cast_dtype=None):
    b1 = basic_conv2d_ref(x_nchw, params["branch1x1"], 0, cast_dtype)
    b5 = basic_conv2d_ref(x_nchw, params["branch5x5_1"], 0, cast_dtype)
    b5 = basic_conv2d_ref(b5, params["branch5x5_2"], 2, cast_dtype)
    b3 = basic_conv2d_ref(x_nchw, params["branch3x3dbl_1"], 0, cast_dtype)
    b3 = basic_conv2d_ref(b3, params["branch3x3dbl_2"], 1, cast_dtype)
    return jnp.concatenate([b1, b5, b3], axis=1)


# ----------------------------------- main ------------------------------------

if __name__ == "__main__":
    key = jax.random.PRNGKey(0)
    k_x, k_p = jax.random.split(key)

    N, C_in, H, W = 2, 4, 16, 16
    in_planes = 16
    x = jax.random.normal(k_x, (N, C_in, H, W), jnp.float32)
    params = make_inception_params(k_p, C_in, in_planes)

    out = jax.block_until_ready(inception_forward(x, params))
    assert out.shape == (N, 4 * in_planes, H, W), out.shape

    # Reference with the same bf16 operand rounding + f32 accumulation.
    ref_bf16 = jax.block_until_ready(inception_ref(x, params, cast_dtype=jnp.bfloat16))
    assert jnp.allclose(out, ref_bf16, atol=5e-3, rtol=5e-3), (
        float(jnp.max(jnp.abs(out - ref_bf16))))

    # Sanity check against the full-f32 reference (looser: bf16 MXU operands).
    ref_f32 = jax.block_until_ready(inception_ref(x, params))
    assert jnp.allclose(out, ref_f32, atol=5e-2, rtol=5e-2), (
        float(jnp.max(jnp.abs(out - ref_f32))))

    print("KERNEL_OK")
</pallas_src>

<mosaic_0001>
module attributes {stable_mosaic.version = 11 : i64} {
  func.func @kernel(%arg0: i32, %arg1: memref<1x256x4xbf16, #tpu.memory_space<vmem>>, %arg2: memref<4x64xbf16, #tpu.memory_space<vmem>>, %arg3: memref<800x32xbf16, #tpu.memory_space<vmem>>, %arg4: memref<144x16xbf16, #tpu.memory_space<vmem>>, %arg5: memref<2x64xf32, #tpu.memory_space<vmem>>, %arg6: memref<2x32xf32, #tpu.memory_space<vmem>>, %arg7: memref<2x16xf32, #tpu.memory_space<vmem>>, %arg8: memref<1x256x128xf32, #tpu.memory_space<vmem>>) attributes {dimension_semantics = [#tpu.dimension_semantics<parallel>], iteration_bounds = array<i64: 2>, scalar_prefetch = 0 : i64, scratch_operands = 0 : i64, tpu.core_type = #tpu.core_type<tc>, window_params = [{transform_indices = @transform_0, window_bounds = array<i64: 1, 256, 4>}, {pipeline_mode = #tpu.pipeline_mode<synchronous>, transform_indices = @transform_1, window_bounds = array<i64: 4, 64>}, {pipeline_mode = #tpu.pipeline_mode<synchronous>, transform_indices = @transform_2, window_bounds = array<i64: 800, 32>}, {pipeline_mode = #tpu.pipeline_mode<synchronous>, transform_indices = @transform_3, window_bounds = array<i64: 144, 16>}, {pipeline_mode = #tpu.pipeline_mode<synchronous>, transform_indices = @transform_4, window_bounds = array<i64: 2, 64>}, {pipeline_mode = #tpu.pipeline_mode<synchronous>, transform_indices = @transform_5, window_bounds = array<i64: 2, 32>}, {pipeline_mode = #tpu.pipeline_mode<synchronous>, transform_indices = @transform_6, window_bounds = array<i64: 2, 16>}, {transform_indices = @transform_7, window_bounds = array<i64: 1, 256, 128>}]} {
    %c0 = arith.constant 0 : index
    %c0_0 = arith.constant 0 : index
    %c0_1 = arith.constant 0 : index
    %0 = vector.load %arg1[%c0, %c0_0, %c0_1] : memref<1x256x4xbf16, #tpu.memory_space<vmem>>, vector<1x256x4xbf16>
    %1 = vector.shape_cast %0 : vector<1x256x4xbf16> to vector<256x4xbf16>
    %c0_2 = arith.constant 0 : index
    %c0_3 = arith.constant 0 : index
    %2 = vector.load %arg5[%c0_2, %c0_3] : memref<2x64xf32, #tpu.memory_space<vmem>>, vector<2x64xf32>
    %c0_4 = arith.constant 0 : index
    %c0_5 = arith.constant 0 : index
    %3 = vector.load %arg2[%c0_4, %c0_5] : memref<4x64xbf16, #tpu.memory_space<vmem>>, vector<4x64xbf16>
    %cst = arith.constant dense<0.000000e+00> : vector<256x64xf32>
    %4 = tpu.matmul %1, %3, %cst {dimension_numbers = #tpu.dot_dimension_numbers<[1], [0], [0], [1], [0, 0, 1, 1], [], []>} : vector<256x4xbf16>, vector<4x64xbf16>, vector<256x64xf32> -> vector<256x64xf32>
    %5 = vector.extract_strided_slice %2 {offsets = [0, 0], sizes = [1, 64], strides = [1, 1]} : vector<2x64xf32> to vector<1x64xf32>
    %6 = vector.broadcast %5 : vector<1x64xf32> to vector<256x64xf32>
    %7 = arith.mulf %4, %6 : vector<256x64xf32>
    %8 = vector.extract_strided_slice %2 {offsets = [1, 0], sizes = [1, 64], strides = [1, 1]} : vector<2x64xf32> to vector<1x64xf32>
    %9 = vector.broadcast %8 : vector<1x64xf32> to vector<256x64xf32>
    %10 = arith.addf %7, %9 : vector<256x64xf32>
    %cst_6 = arith.constant 0.000000e+00 : f32
    %11 = vector.broadcast %cst_6 : f32 to vector<256x64xf32>
    %12 = arith.maximumf %10, %11 : vector<256x64xf32>
    %13 = vector.extract_strided_slice %12 {offsets = [0, 0], sizes = [256, 16], strides = [1, 1]} : vector<256x64xf32> to vector<256x16xf32>
    %14 = vector.extract_strided_slice %12 {offsets = [0, 16], sizes = [256, 32], strides = [1, 1]} : vector<256x64xf32> to vector<256x32xf32>
    %15 = arith.truncf %14 : vector<256x32xf32> to vector<256x32xbf16>
    %16 = vector.extract_strided_slice %12 {offsets = [0, 48], sizes = [256, 16], strides = [1, 1]} : vector<256x64xf32> to vector<256x16xf32>
    %17 = arith.truncf %16 : vector<256x16xf32> to vector<256x16xbf16>
    %18 = vector.shape_cast %15 : vector<256x32xbf16> to vector<16x16x32xbf16>
    %cst_7 = arith.constant 0.000000e+00 : bf16
    %19 = vector.broadcast %cst_7 : bf16 to vector<16x2x32xbf16>
    %20 = tpu.concatenate %19, %18, %19 in 1 : vector<16x2x32xbf16>, vector<16x16x32xbf16>, vector<16x2x32xbf16> -> vector<16x20x32xbf16>
    %cst_8 = arith.constant 0.000000e+00 : bf16
    %21 = vector.broadcast %cst_8 : bf16 to vector<2x20x32xbf16>
    %22 = tpu.concatenate %21, %20, %21 in 0 : vector<2x20x32xbf16>, vector<16x20x32xbf16>, vector<2x20x32xbf16> -> vector<20x20x32xbf16>
    %23 = vector.extract_strided_slice %22 {offsets = [0, 0, 0], sizes = [16, 16, 32], strides = [1, 1, 1]} : vector<20x20x32xbf16> to vector<16x16x32xbf16>
    %24 = vector.shape_cast %23 : vector<16x16x32xbf16> to vector<256x32xbf16>
    %25 = vector.extract_strided_slice %22 {offsets = [0, 1, 0], sizes = [16, 16, 32], strides = [1, 1, 1]} : vector<20x20x32xbf16> to vector<16x16x32xbf16>
    %26 = vector.shape_cast %25 : vector<16x16x32xbf16> to vector<256x32xbf16>
    %27 = vector.extract_strided_slice %22 {offsets = [0, 2, 0], sizes = [16, 16, 32], strides = [1, 1, 1]} : vector<20x20x32xbf16> to vector<16x16x32xbf16>
    %28 = vector.shape_cast %27 : vector<16x16x32xbf16> to vector<256x32xbf16>
    %29 = vector.extract_strided_slice %22 {offsets = [0, 3, 0], sizes = [16, 16, 32], strides = [1, 1, 1]} : vector<20x20x32xbf16> to vector<16x16x32xbf16>
    %30 = vector.shape_cast %29 : vector<16x16x32xbf16> to vector<256x32xbf16>
    %31 = vector.extract_strided_slice %22 {offsets = [0, 4, 0], sizes = [16, 16, 32], strides = [1, 1, 1]} : vector<20x20x32xbf16> to vector<16x16x32xbf16>
    %32 = vector.shape_cast %31 : vector<16x16x32xbf16> to vector<256x32xbf16>
    %33 = vector.extract_strided_slice %22 {offsets = [1, 0, 0], sizes = [16, 16, 32], strides = [1, 1, 1]} : vector<20x20x32xbf16> to vector<16x16x32xbf16>
    %34 = vector.shape_cast %33 : vector<16x16x32xbf16> to vector<256x32xbf16>
    %35 = vector.extract_strided_slice %22 {offsets = [1, 1, 0], sizes = [16, 16, 32], strides = [1, 1, 1]} : vector<20x20x32xbf16> to vector<16x16x32xbf16>
    %36 = vector.shape_cast %35 : vector<16x16x32xbf16> to vector<256x32xbf16>
    %37 = vector.extract_strided_slice %22 {offsets = [1, 2, 0], sizes = [16, 16, 32], strides = [1, 1, 1]} : vector<20x20x32xbf16> to vector<16x16x32xbf16>
    %38 = vector.shape_cast %37 : vector<16x16x32xbf16> to vector<256x32xbf16>
    %39 = vector.extract_strided_slice %22 {offsets = [1, 3, 0], sizes = [16, 16, 32], strides = [1, 1, 1]} : vector<20x20x32xbf16> to vector<16x16x32xbf16>
    %40 = vector.shape_cast %39 : vector<16x16x32xbf16> to vector<256x32xbf16>
    %41 = vector.extract_strided_slice %22 {offsets = [1, 4, 0], sizes = [16, 16, 32], strides = [1, 1, 1]} : vector<20x20x32xbf16> to vector<16x16x32xbf16>
    %42 = vector.shape_cast %41 : vector<16x16x32xbf16> to vector<256x32xbf16>
    %43 = vector.extract_strided_slice %22 {offsets = [2, 0, 0], sizes = [16, 16, 32], strides = [1, 1, 1]} : vector<20x20x32xbf16> to vector<16x16x32xbf16>
    %44 = vector.shape_cast %43 : vector<16x16x32xbf16> to vector<256x32xbf16>
    %45 = vector.extract_strided_slice %22 {offsets = [2, 1, 0], sizes = [16, 16, 32], strides = [1, 1, 1]} : vector<20x20x32xbf16> to vector<16x16x32xbf16>
    %46 = vector.shape_cast %45 : vector<16x16x32xbf16> to vector<256x32xbf16>
    %47 = vector.extract_strided_slice %22 {offsets = [2, 2, 0], sizes = [16, 16, 32], strides = [1, 1, 1]} : vector<20x20x32xbf16> to vector<16x16x32xbf16>
    %48 = vector.shape_cast %47 : vector<16x16x32xbf16> to vector<256x32xbf16>
    %49 = vector.extract_strided_slice %22 {offsets = [2, 3, 0], sizes = [16, 16, 32], strides = [1, 1, 1]} : vector<20x20x32xbf16> to vector<16x16x32xbf16>
    %50 = vector.shape_cast %49 : vector<16x16x32xbf16> to vector<256x32xbf16>
    %51 = vector.extract_strided_slice %22 {offsets = [2, 4, 0], sizes = [16, 16, 32], strides = [1, 1, 1]} : vector<20x20x32xbf16> to vector<16x16x32xbf16>
    %52 = vector.shape_cast %51 : vector<16x16x32xbf16> to vector<256x32xbf16>
    %53 = vector.extract_strided_slice %22 {offsets = [3, 0, 0], sizes = [16, 16, 32], strides = [1, 1, 1]} : vector<20x20x32xbf16> to vector<16x16x32xbf16>
    %54 = vector.shape_cast %53 : vector<16x16x32xbf16> to vector<256x32xbf16>
    %55 = vector.extract_strided_slice %22 {offsets = [3, 1, 0], sizes = [16, 16, 32], strides = [1, 1, 1]} : vector<20x20x32xbf16> to vector<16x16x32xbf16>
    %56 = vector.shape_cast %55 : vector<16x16x32xbf16> to vector<256x32xbf16>
    %57 = vector.extract_strided_slice %22 {offsets = [3, 2, 0], sizes = [16, 16, 32], strides = [1, 1, 1]} : vector<20x20x32xbf16> to vector<16x16x32xbf16>
    %58 = vector.shape_cast %57 : vector<16x16x32xbf16> to vector<256x32xbf16>
    %59 = vector.extract_strided_slice %22 {offsets = [3, 3, 0], sizes = [16, 16, 32], strides = [1, 1, 1]} : vector<20x20x32xbf16> to vector<16x16x32xbf16>
    %60 = vector.shape_cast %59 : vector<16x16x32xbf16> to vector<256x32xbf16>
    %61 = vector.extract_strided_slice %22 {offsets = [3, 4, 0], sizes = [16, 16, 32], strides = [1, 1, 1]} : vector<20x20x32xbf16> to vector<16x16x32xbf16>
    %62 = vector.shape_cast %61 : vector<16x16x32xbf16> to vector<256x32xbf16>
    %63 = vector.extract_strided_slice %22 {offsets = [4, 0, 0], sizes = [16, 16, 32], strides = [1, 1, 1]} : vector<20x20x32xbf16> to vector<16x16x32xbf16>
    %64 = vector.shape_cast %63 : vector<16x16x32xbf16> to vector<256x32xbf16>
    %65 = vector.extract_strided_slice %22 {offsets = [4, 1, 0], sizes = [16, 16, 32], strides = [1, 1, 1]} : vector<20x20x32xbf16> to vector<16x16x32xbf16>
    %66 = vector.shape_cast %65 : vector<16x16x32xbf16> to vector<256x32xbf16>
    %67 = vector.extract_strided_slice %22 {offsets = [4, 2, 0], sizes = [16, 16, 32], strides = [1, 1, 1]} : vector<20x20x32xbf16> to vector<16x16x32xbf16>
    %68 = vector.shape_cast %67 : vector<16x16x32xbf16> to vector<256x32xbf16>
    %69 = vector.extract_strided_slice %22 {offsets = [4, 3, 0], sizes = [16, 16, 32], strides = [1, 1, 1]} : vector<20x20x32xbf16> to vector<16x16x32xbf16>
    %70 = vector.shape_cast %69 : vector<16x16x32xbf16> to vector<256x32xbf16>
    %71 = vector.extract_strided_slice %22 {offsets = [4, 4, 0], sizes = [16, 16, 32], strides = [1, 1, 1]} : vector<20x20x32xbf16> to vector<16x16x32xbf16>
    %72 = vector.shape_cast %71 : vector<16x16x32xbf16> to vector<256x32xbf16>
    %73 = tpu.concatenate %24, %26, %28, %30, %32, %34, %36, %38, %40, %42, %44, %46, %48, %50, %52, %54 in 1 : vector<256x32xbf16>, vector<256x32xbf16>, vector<256x32xbf16>, vector<256x32xbf16>, vector<256x32xbf16>, vector<256x32xbf16>, vector<256x32xbf16>, vector<256x32xbf16>, vector<256x32xbf16>, vector<256x32xbf16>, vector<256x32xbf16>, vector<256x32xbf16>, vector<256x32xbf16>, vector<256x32xbf16>, vector<256x32xbf16>, vector<256x32xbf16> -> vector<256x512xbf16>
    %74 = tpu.concatenate %56, %58, %60, %62, %64, %66, %68, %70, %72 in 1 : vector<256x32xbf16>, vector<256x32xbf16>, vector<256x32xbf16>, vector<256x32xbf16>, vector<256x32xbf16>, vector<256x32xbf16>, vector<256x32xbf16>, vector<256x32xbf16>, vector<256x32xbf16> -> vector<256x288xbf16>
    %75 = tpu.concatenate %73, %74 in 1 : vector<256x512xbf16>, vector<256x288xbf16> -> vector<256x800xbf16>
    %c0_9 = arith.constant 0 : index
    %c0_10 = arith.constant 0 : index
    %76 = vector.load %arg6[%c0_9, %c0_10] : memref<2x32xf32, #tpu.memory_space<vmem>>, vector<2x32xf32>
    %c0_11 = arith.constant 0 : index
    %c0_12 = arith.constant 0 : index
    %77 = vector.load %arg3[%c0_11, %c0_12] : memref<800x32xbf16, #tpu.memory_space<vmem>>, vector<800x32xbf16>
    %cst_13 = arith.constant dense<0.000000e+00> : vector<256x32xf32>
    %78 = tpu.matmul %75, %77, %cst_13 {dimension_numbers = #tpu.dot_dimension_numbers<[1], [0], [0], [1], [0, 0, 1, 1], [], []>} : vector<256x800xbf16>, vector<800x32xbf16>, vector<256x32xf32> -> vector<256x32xf32>
    %79 = vector.extract_strided_slice %76 {offsets = [0, 0], sizes = [1, 32], strides = [1, 1]} : vector<2x32xf32> to vector<1x32xf32>
    %80 = vector.broadcast %79 : vector<1x32xf32> to vector<256x32xf32>
    %81 = arith.mulf %78, %80 : vector<256x32xf32>
    %82 = vector.extract_strided_slice %76 {offsets = [1, 0], sizes = [1, 32], strides = [1, 1]} : vector<2x32xf32> to vector<1x32xf32>
    %83 = vector.broadcast %82 : vector<1x32xf32> to vector<256x32xf32>
    %84 = arith.addf %81, %83 : vector<256x32xf32>
    %cst_14 = arith.constant 0.000000e+00 : f32
    %85 = vector.broadcast %cst_14 : f32 to vector<256x32xf32>
    %86 = arith.maximumf %84, %85 : vector<256x32xf32>
    %87 = vector.shape_cast %17 : vector<256x16xbf16> to vector<16x16x16xbf16>
    %cst_15 = arith.constant 0.000000e+00 : bf16
    %88 = vector.broadcast %cst_15 : bf16 to vector<16x1x16xbf16>
    %89 = tpu.concatenate %88, %87, %88 in 1 : vector<16x1x16xbf16>, vector<16x16x16xbf16>, vector<16x1x16xbf16> -> vector<16x18x16xbf16>
    %cst_16 = arith.constant 0.000000e+00 : bf16
    %90 = vector.broadcast %cst_16 : bf16 to vector<1x18x16xbf16>
    %91 = tpu.concatenate %90, %89, %90 in 0 : vector<1x18x16xbf16>, vector<16x18x16xbf16>, vector<1x18x16xbf16> -> vector<18x18x16xbf16>
    %92 = vector.extract_strided_slice %91 {offsets = [0, 0, 0], sizes = [16, 16, 16], strides = [1, 1, 1]} : vector<18x18x16xbf16> to vector<16x16x16xbf16>
    %93 = vector.shape_cast %92 : vector<16x16x16xbf16> to vector<256x16xbf16>
    %94 = vector.extract_strided_slice %91 {offsets = [0, 1, 0], sizes = [16, 16, 16], strides = [1, 1, 1]} : vector<18x18x16xbf16> to vector<16x16x16xbf16>
    %95 = vector.shape_cast %94 : vector<16x16x16xbf16> to vector<256x16xbf16>
    %96 = vector.extract_strided_slice %91 {offsets = [0, 2, 0], sizes = [16, 16, 16], strides = [1, 1, 1]} : vector<18x18x16xbf16> to vector<16x16x16xbf16>
    %97 = vector.shape_cast %96 : vector<16x16x16xbf16> to vector<256x16xbf16>
    %98 = vector.extract_strided_slice %91 {offsets = [1, 0, 0], sizes = [16, 16, 16], strides = [1, 1, 1]} : vector<18x18x16xbf16> to vector<16x16x16xbf16>
    %99 = vector.shape_cast %98 : vector<16x16x16xbf16> to vector<256x16xbf16>
    %100 = vector.extract_strided_slice %91 {offsets = [1, 1, 0], sizes = [16, 16, 16], strides = [1, 1, 1]} : vector<18x18x16xbf16> to vector<16x16x16xbf16>
    %101 = vector.shape_cast %100 : vector<16x16x16xbf16> to vector<256x16xbf16>
    %102 = vector.extract_strided_slice %91 {offsets = [1, 2, 0], sizes = [16, 16, 16], strides = [1, 1, 1]} : vector<18x18x16xbf16> to vector<16x16x16xbf16>
    %103 = vector.shape_cast %102 : vector<16x16x16xbf16> to vector<256x16xbf16>
    %104 = vector.extract_strided_slice %91 {offsets = [2, 0, 0], sizes = [16, 16, 16], strides = [1, 1, 1]} : vector<18x18x16xbf16> to vector<16x16x16xbf16>
    %105 = vector.shape_cast %104 : vector<16x16x16xbf16> to vector<256x16xbf16>
    %106 = vector.extract_strided_slice %91 {offsets = [2, 1, 0], sizes = [16, 16, 16], strides = [1, 1, 1]} : vector<18x18x16xbf16> to vector<16x16x16xbf16>
    %107 = vector.shape_cast %106 : vector<16x16x16xbf16> to vector<256x16xbf16>
    %108 = vector.extract_strided_slice %91 {offsets = [2, 2, 0], sizes = [16, 16, 16], strides = [1, 1, 1]} : vector<18x18x16xbf16> to vector<16x16x16xbf16>
    %109 = vector.shape_cast %108 : vector<16x16x16xbf16> to vector<256x16xbf16>
    %110 = tpu.concatenate %93, %95, %97, %99, %101, %103, %105, %107, %109 in 1 : vector<256x16xbf16>, vector<256x16xbf16>, vector<256x16xbf16>, vector<256x16xbf16>, vector<256x16xbf16>, vector<256x16xbf16>, vector<256x16xbf16>, vector<256x16xbf16>, vector<256x16xbf16> -> vector<256x144xbf16>
    %c0_17 = arith.constant 0 : index
    %c0_18 = arith.constant 0 : index
    %111 = vector.load %arg7[%c0_17, %c0_18] : memref<2x16xf32, #tpu.memory_space<vmem>>, vector<2x16xf32>
    %c0_19 = arith.constant 0 : index
    %c0_20 = arith.constant 0 : index
    %112 = vector.load %arg4[%c0_19, %c0_20] : memref<144x16xbf16, #tpu.memory_space<vmem>>, vector<144x16xbf16>
    %cst_21 = arith.constant dense<0.000000e+00> : vector<256x16xf32>
    %113 = tpu.matmul %110, %112, %cst_21 {dimension_numbers = #tpu.dot_dimension_numbers<[1], [0], [0], [1], [0, 0, 1, 1], [], []>} : vector<256x144xbf16>, vector<144x16xbf16>, vector<256x16xf32> -> vector<256x16xf32>
    %114 = vector.extract_strided_slice %111 {offsets = [0, 0], sizes = [1, 16], strides = [1, 1]} : vector<2x16xf32> to vector<1x16xf32>
    %115 = vector.broadcast %114 : vector<1x16xf32> to vector<256x16xf32>
    %116 = arith.mulf %113, %115 : vector<256x16xf32>
    %117 = vector.extract_strided_slice %111 {offsets = [1, 0], sizes = [1, 16], strides = [1, 1]} : vector<2x16xf32> to vector<1x16xf32>
    %118 = vector.broadcast %117 : vector<1x16xf32> to vector<256x16xf32>
    %119 = arith.addf %116, %118 : vector<256x16xf32>
    %cst_22 = arith.constant 0.000000e+00 : f32
    %120 = vector.broadcast %cst_22 : f32 to vector<256x16xf32>
    %121 = arith.maximumf %119, %120 : vector<256x16xf32>
    %cst_23 = arith.constant 0.000000e+00 : f32
    %122 = vector.broadcast %cst_23 : f32 to vector<256x64xf32>
    %123 = tpu.concatenate %13, %86, %121, %122 in 1 : vector<256x16xf32>, vector<256x32xf32>, vector<256x16xf32>, vector<256x64xf32> -> vector<256x128xf32>
    %c0_24 = arith.constant 0 : index
    %c0_25 = arith.constant 0 : index
    %c0_26 = arith.constant 0 : index
    %124 = vector.load %arg8[%c0_24, %c0_25, %c0_26] : memref<1x256x128xf32, #tpu.memory_space<vmem>>, vector<1x256x128xf32>
    %125 = vector.shape_cast %124 : vector<1x256x128xf32> to vector<256x128xf32>
    %126 = vector.shape_cast %123 : vector<256x128xf32> to vector<1x256x128xf32>
    tpu.vector_store %arg8[%c0_24, %c0_25, %c0_26], %126 {strides = array<i32>} : memref<1x256x128xf32, #tpu.memory_space<vmem>>, vector<1x256x128xf32>,
    return
  }
  func.func @transform_0(%arg0: i32) -> (i32, i32, i32) {
    %c0_i32 = arith.constant 0 : i32
    %c0_i32_0 = arith.constant 0 : i32
    %c0_i32_1 = arith.constant 0 : i32
    return %arg0, %c0_i32, %c0_i32_0 : i32, i32, i32
  }
  func.func @transform_1(%arg0: i32) -> (i32, i32) {
    %c0_i32 = arith.constant 0 : i32
    %c0_i32_0 = arith.constant 0 : i32
    %c0_i32_1 = arith.constant 0 : i32
    return %c0_i32, %c0_i32_0 : i32, i32
  }
  func.func @transform_2(%arg0: i32) -> (i32, i32) {
    %c0_i32 = arith.constant 0 : i32
    %c0_i32_0 = arith.constant 0 : i32
    %c0_i32_1 = arith.constant 0 : i32
    return %c0_i32, %c0_i32_0 : i32, i32
  }
  func.func @transform_3(%arg0: i32) -> (i32, i32) {
    %c0_i32 = arith.constant 0 : i32
    %c0_i32_0 = arith.constant 0 : i32
    %c0_i32_1 = arith.constant 0 : i32
    return %c0_i32, %c0_i32_0 : i32, i32
  }
  func.func @transform_4(%arg0: i32) -> (i32, i32) {
    %c0_i32 = arith.constant 0 : i32
    %c0_i32_0 = arith.constant 0 : i32
    %c0_i32_1 = arith.constant 0 : i32
    return %c0_i32, %c0_i32_0 : i32, i32
  }
  func.func @transform_5(%arg0: i32) -> (i32, i32) {
    %c0_i32 = arith.constant 0 : i32
    %c0_i32_0 = arith.constant 0 : i32
    %c0_i32_1 = arith.constant 0 : i32
    return %c0_i32, %c0_i32_0 : i32, i32
  }
  func.func @transform_6(%arg0: i32) -> (i32, i32) {
    %c0_i32 = arith.constant 0 : i32
    %c0_i32_0 = arith.constant 0 : i32
    %c0_i32_1 = arith.constant 0 : i32
    return %c0_i32, %c0_i32_0 : i32, i32
  }
  func.func @transform_7(%arg0: i32) -> (i32, i32, i32) {
    %c0_i32 = arith.constant 0 : i32
    %c0_i32_0 = arith.constant 0 : i32
    %c0_i32_1 = arith.constant 0 : i32
    return %arg0, %c0_i32, %c0_i32_0 : i32, i32, i32
  }
}

</mosaic_0001>

<bundles_post_ra>
// kernel: tpu_custom_call.1
= control target key start
LH: loop header
LB: loop body
LE: loop exit
PB: predicated region body
PF: predicated region fallthrough
CT: control target
= control target key end

     0   :  { %12 = vsyncpa [#allocation3], 0  ;;  %s10286_s0 = inlined_call_operand.vmem [shape: bf16[2,256,4], index: 0, kind: input, shape index: {}]   ;;  %s10287_s1 = inlined_call_operand.vmem [shape: bf16[4,64], index: 1, kind: input, shape index: {}]   ;;  %s10288_s2 = inlined_call_operand.vmem [shape: bf16[800,32], index: 2, kind: input, shape index: {}]   ;;  %s10289_s3 = inlined_call_operand.vmem [shape: bf16[144,16], index: 3, kind: input, shape index: {}]   ;;  %s10290_s4 = inlined_call_operand.vmem [shape: f32[2,64], index: 4, kind: input, shape index: {}]   ;;  %s10291_s5 = inlined_call_operand.vmem [shape: f32[2,32], index: 5, kind: input, shape index: {}]   ;;  %s10292_s6 = inlined_call_operand.vmem [shape: f32[2,16], index: 6, kind: input, shape index: {}]   ;;  %s10293_s7 = inlined_call_operand.hbm [shape: f32[2,256,128], index: 7, kind: output, shape index: {}]  }
   0x1   :  { %14 = vsyncpa [#allocation3 + $0x1], 0  ;;  %s6269_s24 = smov 0   ;;  %s6271_s25 = smov 0  }
   0x2   :  { %s6273_s26 = smov 0   ;;  %s6275_s27 = smov 0  }
   0x3 LB: > { %s6290_s28 = sadd.s32 4294967295, %s6216_s27   ;;  %s5415_s29 = sadd.s32 4294967294, %s6216_s27   ;;  %s6216_s27 = sphi %s6275_s27, %s10960_s27   ;;  %s6212_s26 = sphi %s6273_s26, %s10959_s26   ;;  %s6208_s25 = sphi %s6271_s25, %s10958_s25   ;;  %s6204_s24 = sphi %s6269_s24, %s10957_s24  }
   0x4   : > { %s6294_s30 = sadd.s32 1, %s6216_s27   ;;  %s179_s8 = sadd.s32 1, %s6212_s26 }
   0x5   : > { %s176_s9 = ssub.s32 %s6216_s27, %s6294_s30  ;;  %p189_p0 = scmp.ne.s32.totalorder %s6212_s26, %s6208_s25 }
   0x6   : > { %p177_p1 = scmp.eq.s32.totalorder %s176_s9, 0  ;;  %p190_p2 = scmp.eq.s32.totalorder %s6290_s28, 1 }
   0x7   : > { %p195_p3 = scmp.ne.s32.totalorder %s6208_s25, %s6204_s24  ;;  %p196_p4 = scmp.eq.s32.totalorder %s5415_s29, 1 }
   0x8   : > { %s6305_s10 = scalar_select %p177_p1, %s6212_s26, %s179_s8  }
   0x9   : > { %p6307_p5 = por %p190_p2, %p189_p0  ;;  %p6311_p6 = por %p196_p4, %p195_p3 }
   0xa   : > { %p5418_p7 = scmp.ge.s32.totalorder %s6216_s27, 1  ;;  %p240_p8 = scmp.lt.s32.totalorder %s6216_s27, 3 }
   0xc   : > { %p241_p9 = pnand %p5418_p7, %p240_p8 }
   0xe   : > { %244 = sbr.rel (%p241_p9) target bundleno = 1606 (0x646), region = 48 }
  0x15   : > { %v311_v0 = vld [vmem:[%s10287_s1] sm:$0x3]  ;;  %vm441_vm0 = vcmask 1041408   ;;  %p272_p10 = scmp.lt.s32.totalorder %s6290_s28, 1  ;;  %v10326_v2 = vmov 0   ;;  %vm392_vm1 = vcmask 31744   ;;  %v606_v42 = vlaneseq }
  0x16   : > { %6009 = vmatprep.subr.msk.bf16.mxu0 %vm441_vm0, %v311_v0  ;;  %v443_v1 = vsel %vm441_vm0, %v311_v0, 0  ;;  %v6322_v3 = vrot.slane %v10326_v2, 1  ;;  %s6219_s20 = smov 64   ;;  %s6220_s21 = smov 32   ;;  %v6369_v22 = vrot.slane %v10326_v2, 2  ;;  %v6095_v25 = vld [vmem:[%s10288_s2 + $0x40] sm:$0xff]  }
  0x17   : > { %5924 = vmatpush3.bf16.msra.mxu0 %v443_v1  ;;  %s273_s15 = scalar_select %p272_p10, %s6290_s28, 1  ;;  %v6096_v26 = vld [vmem:[%s10288_s2] sm:$0xff]   ;;  %5569 = vmatprep.subr.bf16.mxu1 %v6095_v25  ;;  %v6097_v27 = vld [vmem:[%s10288_s2 + $0x48] sm:$0xff]   ;;  %v6099_v29 = vld [vmem:[%s10288_s2 + $0x50] sm:$0xff]   ;;  %vm1670_vm2 = vcmask 261120   ;;  %vm1701_vm3 = vcmask 523264  }
  0x18   : > { %10524 = vst [vmem:[#allocation5_spill] sm:$0xff] %v6322_v3  ;;  %v6064_v4 = vpack.i.bf16 %v6322_v3, %v6322_v3  ;;  %v6059_v21 = vpack.i.bf16 %v10326_v2, %v6322_v3  ;;  %10525 = vst [vmem:[#allocation6_spill] sm:$0xff] %v6369_v22  ;;  %s6221_s22 = smov 96   ;;  %v6374_v23 = vor.u32 %v6369_v22, %v6322_v3  ;;  %5570 = vmatpush3.bf16.msra.mxu1 %v6096_v26  ;;  %v6098_v28 = vld [vmem:[%s10288_s2 + $0x8] sm:$0xff]   ;;  %v6100_v30 = vld [vmem:[%s10288_s2 + $0x10] sm:$0xff]   ;;  %vm1732_vm4 = vcmask 785408  }
  0x19   : > { %s5550_s16 = sshll.u32 %s273_s15, 7  ;;  %v6074_v24 = vpack.i.bf16 %v6322_v3, %v6369_v22  ;;  %5571 = vmatprep.subr.bf16.mxu1 %v6097_v27  ;;  %v6101_v31 = vld [vmem:[%s10288_s2 + $0x58] sm:$0xff]   ;;  %v6103_v33 = vld [vmem:[%s10288_s2 + $0x60] sm:$0xff]   ;;  %v6105_v35 = vld [vmem:[%s10288_s2 + $0x68] sm:$0xff]   ;;  %v607_v48 = vshrl.u32 %v606_v42, 7  ;;  %s6222_s29 = smov 112  }
  0x1a   : > { %s6330_s19 = scalar_lea.vmem %s10286_s0, %s5550_s16  ;;  %6065 = vrot.lane.b32.xlu1 %v6064_v4, %s6219_s20  ;;  %6060 = vrot.lane.b32.xlu0 %v6059_v21, %s6220_s21  ;;  %10526 = vst [vmem:[#allocation7_spill] sm:$0xff] %v6374_v23  ;;  %v6102_v32 = vld [vmem:[%s10288_s2 + $0x18] sm:$0xff]   ;;  %v6104_v34 = vld [vmem:[%s10288_s2 + $0x20] sm:$0xff]   ;;  %s6223_s8 = smov 80   ;;  %vm790_vm5 = vcmask 1040384   ;;  %vm1193_vm6 = vcmask 1045504  }
  0x1b   : > { %v6079_v5 = vld [vmem:[%s6330_s19] sm:$0xff]   ;;  %v6080_v6 = vld [vmem:[%s6330_s19 + $0x8] sm:$0xff]   ;;  %v6081_v7 = vld [vmem:[%s6330_s19 + $0x10] sm:$0xff]   ;;  %v6438_v57 = vsub.s32 0, %v607_v48  ;;  %v6447_v60 = vsub.s32 1, %v607_v48  ;;  %vm1017_vm7 = vcmask 1046528  }
  0x1c   : > { %5925 = vmatprep.mubr.msk.bf16.mxu0 %vm392_vm1, %v6079_v5  ;;  %v6082_v8 = vld [vmem:[%s6330_s19 + $0x18] sm:$0xff]   ;;  %v6083_v9 = vld [vmem:[%s6330_s19 + $0x20] sm:$0xff]   ;;  %v6084_v10 = vld [vmem:[%s6330_s19 + $0x28] sm:$0xff]   ;;  %5572 = vmatpush3.bf16.msra.mxu1 %v6098_v28  ;;  %vm840_vm8 = vsmask.f32 7424  ;;  %s6224_s15 = smov 16  }
  0x1d   : > { %5926 = vmatmul.mubr.msk.bf16.vlgmr.msra.gmra.mrb[0].mxu0 %vm392_vm1, %v6080_v6  ;;  %v6085_v11 = vld [vmem:[%s6330_s19 + $0x30] sm:$0xff]   ;;  %v6086_v12 = vld [vmem:[%s6330_s19 + $0x38] sm:$0xff]   ;;  %v6087_v13 = vld [vmem:[%s6330_s19 + $0x40] sm:$0xff]   ;;  %5573 = vmatprep.subr.bf16.mxu1 %v6099_v29  ;;  %10528 = vst [vmem:[#allocation9_spill] sm:$0xff] %v6438_v57  ;;  %vm1062_vm9 = vsmask.f32 6400 }
  0x1e   : > { %5929 = vmatprep.mubr.msk.bf16.mxu0 %vm392_vm1, %v6081_v7  ;;  %v6088_v14 = vld [vmem:[%s6330_s19 + $0x48] sm:$0xff]   ;;  %v6089_v15 = vld [vmem:[%s6330_s19 + $0x50] sm:$0xff]   ;;  %v6090_v16 = vld [vmem:[%s6330_s19 + $0x58] sm:$0xff]   ;;  %6070 = vrot.lane.b32.xlu1 %v6059_v21, %s6221_s22  ;;  %10530 = vst [vmem:[#allocation11_spill] sm:$0xff] %v6447_v60  ;;  %vm3801_vm10 = vsmask.f32 256 }
  0x1f   : > { %v6091_v17 = vld [vmem:[%s6330_s19 + $0x60] sm:$0xff]   ;;  %v6092_v18 = vld [vmem:[%s6330_s19 + $0x68] sm:$0xff]   ;;  %v6093_v19 = vld [vmem:[%s6330_s19 + $0x70] sm:$0xff]   ;;  %1352 = vrot.lane.b32.xlu0 %v6374_v23, %s6221_s22  ;;  %s6225_s23 = smov 48   ;;  %vm4327_vm12 = vcmask 130048   ;;  %vm4391_vm13 = vcmask 392192  }
  0x20   : > { %v6094_v20 = vld [vmem:[%s6330_s19 + $0x78] sm:$0xff]   ;;  %5574 = vmatpush3.bf16.msra.mxu1 %v6100_v30  ;;  %v6106_v36 = vld [vmem:[%s10288_s2 + $0x28] sm:$0xff]   ;;  %v6107_v37 = vld [vmem:[%s10288_s2 + $0x70] sm:$0xff]   ;;  %vm4456_vm14 = vcmask 654336   ;;  %vm4520_vm15 = vcmask 916480   ;;  %s6226_s18 = smov [#allocation2]  }
  0x21   : > { %5575 = vmatprep.subr.bf16.mxu1 %v6101_v31  ;;  %v6108_v38 = vld [vmem:[%s10288_s2 + $0x30] sm:$0xff]   ;;  %v6109_v39 = vld [vmem:[%s10288_s2 + $0x78] sm:$0xff]   ;;  %v310_v59 = vld [vmem:[%s10290_s4] sm:$0x3] }
  0x22   : > { %6075 = vrot.lane.b32.xlu1 %v6074_v24, %s6220_s21  ;;  %v6110_v40 = vld [vmem:[%s10288_s2 + $0x38] sm:$0xff]   ;;  %v6450_v61 = vrot.slane %v310_v59, %v6438_v57  ;;  %v6453_v62 = vrot.slane %v310_v59, %v6447_v60  ;;  %vm8127_vm11 = vmand %vm790_vm5, %vm3801_vm10 }
  0x24   : > { %5576 = vmatpush3.bf16.msra.mxu1 %v6102_v32 }
  0x25   : > { %5930 = vmatmul.mubr.msk.bf16.gmra.mrb[4].mxu0 %vm392_vm1, %v6082_v8  ;;  %5577 = vmatprep.subr.bf16.mxu1 %v6103_v33 }
  0x26   : > { %5933 = vmatprep.mubr.msk.bf16.mxu0 %vm392_vm1, %v6083_v9 }
  0x28   : > { %5578 = vmatpush3.bf16.msra.mxu1 %v6104_v34 }
  0x29   : > { %5579 = vmatprep.subr.bf16.mxu1 %v6105_v35 }
  0x2c   : > { %5580 = vmatpush3.bf16.msra.mxu1 %v6106_v36 }
  0x2d   : > { %5934 = vmatmul.mubr.msk.bf16.gmra.mrb[8].mxu0 %vm392_vm1, %v6084_v10  ;;  %5581 = vmatprep.subr.bf16.mxu1 %v6107_v37 }
  0x2e   : > { %5937 = vmatprep.mubr.msk.bf16.mxu0 %vm392_vm1, %v6085_v11 }
  0x30   : > { %5582 = vmatpush3.bf16.msra.mxu1 %v6108_v38 }
  0x31   : > { %5583 = vmatprep.subr.bf16.mxu1 %v6109_v39 }
  0x34   : > { %5584 = vmatpush3.bf16.msra.mxu1 %v6110_v40 }
  0x35   : > { %5938 = vmatmul.mubr.msk.bf16.gmra.mrb[12].mxu0 %vm392_vm1, %v6086_v12 }
  0x36   : > { %5941 = vmatprep.mubr.msk.bf16.mxu0 %vm392_vm1, %v6087_v13 }
  0x3d   : > { %5942 = vmatmul.mubr.msk.bf16.gmra.mrb[16].mxu0 %vm392_vm1, %v6088_v14 }
  0x3e   : > { %5945 = vmatprep.mubr.msk.bf16.mxu0 %vm392_vm1, %v6089_v15 }
  0x45   : > { %5946 = vmatmul.mubr.msk.bf16.gmra.mrb[20].mxu0 %vm392_vm1, %v6090_v16 }
  0x46   : > { %5949 = vmatprep.mubr.msk.bf16.mxu0 %vm392_vm1, %v6091_v17 }
  0x4d   : > { %5950 = vmatmul.mubr.msk.bf16.gmra.mrb[24].mxu0 %vm392_vm1, %v6092_v18 }
  0x4e   : > { %5953 = vmatprep.mubr.msk.bf16.mxu0 %vm392_vm1, %v6093_v19 }
  0x55   : > { %5954 = vmatmul.mubr.msk.bf16.gmra.mrb[28].mxu0 %vm392_vm1, %v6094_v20 }
  0x8c   : > { %v6066_v41 = vpop.permute.xlu1 %6065  ;;  %v6061_v45 = vpop.permute.xlu0 %6060 }
  0x8d   : > { %v6068_v43 = vunpack.i.h.bf16 %v6066_v41  ;;  %v6067_v44 = vunpack.i.l.bf16 %v6066_v41  ;;  %v6063_v46 = vunpack.i.h.bf16 %v6061_v45  ;;  %v6062_v47 = vunpack.i.l.bf16 %v6061_v45 }
  0x8f   : > { %v1672_v50 = vsel %vm1670_vm2, 0, %v6062_v47  ;;  %v1780_v52 = vsel %vm1670_vm2, %v6369_v22, %v6063_v46 }
  0x90   : > { %v6429_v49 = vpop.permute.xlu1 %6070  ;;  %v1703_v53 = vsel %vm1701_vm3, %v1672_v50, %v6067_v44  ;;  %v1826_v54 = vsel %vm1701_vm3, %v1780_v52, %v6068_v43 }
  0x91   : > { %10527 = vst [vmem:[#allocation8_spill] sm:$0xff] %v6429_v49  ;;  %v6072_v51 = vunpack.i.l.bf16 %v6429_v49  ;;  %v1353_v55 = vpop.permute.xlu0 %1352 }
  0x92   : > { %v6441_v58 = vsel %vm1732_vm4, %v1703_v53, %v1353_v55 }
  0x93   : > { %v1858_v56 = vsel %vm1732_vm4, %v1826_v54, %v6072_v51  ;;  %10529 = vst [vmem:[#allocation10_spill] sm:$0xff] %v6441_v58 }
  0x94   : > { %2876 = vmatprep.mubr.bf16.mxu1 %v1858_v56 }
  0x95   : > { %2877 = vmatmul.mubr.bf16.vlgmr.msra.gmra.mrb[0].mxu1 %v6441_v58 }
  0xf0   : > { %v5927_v63 = vpop.f32.mrb[0].mxu0 }
  0xf1   : > { %v612_v0 = vmul.f32 %v5927_v63, %v6450_v61  ;;  %v479_v1 = vpop.f32.mrb[1].mxu0 }
  0xf2   : > { %v610_v4 = vmul.f32 %v6450_v61, %v479_v1  ;;  %v5928_v5 = vpop.f32.mrb[2].mxu0 }
  0xf3   : > { %v6458_v6 = vadd.f32 %v6453_v62, %v612_v0  ;;  %v613_v7 = vmul.f32 %v5928_v5, %v6450_v61  ;;  %v482_v8 = vpop.f32.mrb[3].mxu0 }
  0xf4   : > { %v6462_v9 = vadd.f32 %v6453_v62, %v610_v4  ;;  %v611_v10 = vmul.f32 %v6450_v61, %v482_v8 }
  0xf5   : > { %10531 = vst [vmem:[#allocation12_spill] sm:$0xff] %v6458_v6  ;;  %v6466_v11 = vadd.f32 %v6453_v62, %v613_v7  ;;  %v10317_v13 = vmax.f32 %v6458_v6, 0.0 }
  0xf6   : > { %10532 = vst [vmem:[#allocation13_spill] sm:$0xff] %v6462_v9  ;;  %v6469_v12 = vadd.f32 %v6453_v62, %v611_v10  ;;  %v10325_v15 = vmax.f32 %v6462_v9, 0.0 }
  0xf7   : > { %10533 = vst [vmem:[#allocation14_spill] sm:$0xff] %v6466_v11  ;;  %v10314_v14 = vmax.f32 %v6466_v11, 0.0 }
  0xf8   : > { %10534 = vst [vmem:[#allocation15_spill] sm:$0xff] %v6469_v12  ;;  %v10324_v16 = vmax.f32 %v6469_v12, 0.0  ;;  %v5931_v17 = vpop.f32.mrb[4].mxu0 }
  0xf9   : > { %v711_v18 = vpack.c.bf16 %v10314_v14, %v10317_v13  ;;  %v616_v19 = vmul.f32 %v5931_v17, %v6450_v61  ;;  %v495_v20 = vpop.f32.mrb[5].mxu0 }
  0xfa   : > { %v710_v21 = vpack.c.bf16 %v10324_v16, %v10325_v15  ;;  %v614_v24 = vmul.f32 %v6450_v61, %v495_v20  ;;  %v5932_v25 = vpop.f32.mrb[6].mxu0 }
  0xfb   : > { %v743_v26 = vrot.slane %v711_v18, 7  ;;  %v3600_v27 = vshrl.u32 %v711_v18, 16  ;;  %v6486_v28 = vadd.f32 %v6453_v62, %v616_v19  ;;  %v498_v29 = vpop.f32.mrb[7].mxu0  ;;  %v3603_v33 = vshll.u32 %v711_v18, 16 }
  0xfc   : > { %v3593_v30 = vshrl.u32 %v710_v21, 16  ;;  %v6489_v31 = vadd.f32 %v6453_v62, %v614_v24  ;;  %v617_v34 = vmul.f32 %v5932_v25, %v6450_v61  ;;  %v615_v35 = vmul.f32 %v6450_v61, %v498_v29 }
  0xfd   : > { %10535 = vst [vmem:[#allocation16_spill] sm:$0xff] %v6486_v28  ;;  %760 = vrot.lane.b32.xlu0 %v743_v26, %s6222_s29  ;;  %v3602_v32 = vrot.slane %v3600_v27, 7  ;;  %v742_v36 = vrot.slane %v710_v21, 7  ;;  %v10311_v38 = vmax.f32 %v6486_v28, 0.0  ;;  %v3596_v44 = vshll.u32 %v710_v21, 16 }
  0xfe   : > { %10536 = vst [vmem:[#allocation17_spill] sm:$0xff] %v6489_v31  ;;  %v3595_v37 = vrot.slane %v3593_v30, 7  ;;  %v10313_v40 = vmax.f32 %v6489_v31, 0.0  ;;  %v6497_v41 = vadd.f32 %v6453_v62, %v617_v34  ;;  %v6500_v42 = vadd.f32 %v6453_v62, %v615_v35 }
  0xff   : > { %v3605_v39 = vor.u32 %v3603_v33, %v3602_v32 }
 0x100   : > { %10537 = vst [vmem:[#allocation18_spill] sm:$0xff] %v6497_v41  ;;  %10538 = vst [vmem:[#allocation19_spill] sm:$0xff] %v6500_v42  ;;  %v5935_v43 = vpop.f32.mrb[8].mxu0  ;;  %v10310_v45 = vmax.f32 %v6497_v41, 0.0  ;;  %v10312_v46 = vmax.f32 %v6500_v42, 0.0  ;;  %v3598_v52 = vor.u32 %v3596_v44, %v3595_v37 }
 0x101   : > { %3708 = vrot.lane.b32.xlu1 %v3605_v39, %s6223_s8  ;;  %758 = vrot.lane.b32.xlu0 %v742_v36, %s6222_s29  ;;  %v620_v47 = vmul.f32 %v5935_v43, %v6450_v61  ;;  %v511_v48 = vpop.f32.mrb[9].mxu0 }
 0x102   : > { %v618_v50 = vmul.f32 %v6450_v61, %v511_v48  ;;  %v5936_v51 = vpop.f32.mrb[10].mxu0  ;;  %v6512_v53 = vpack.c.bf16 %v10310_v45, %v10311_v38  ;;  %v712_v54 = vpack.c.bf16 %v10312_v46, %v10313_v40 }
 0x103   : > { %v621_v55 = vmul.f32 %v5936_v51, %v6450_v61  ;;  %v514_v56 = vpop.f32.mrb[11].mxu0  ;;  %v6527_v5 = vadd.f32 %v6453_v62, %v620_v47 }
 0x104   : > { %10539 = vst [vmem:[#allocation20_spill] sm:$0xff] %v6512_v53  ;;  %v6520_v59 = vadd.f32 %v6453_v62, %v618_v50  ;;  %v619_v63 = vmul.f32 %v6450_v61, %v514_v56  ;;  %v745_v0 = vrot.slane %v6512_v53, 7  ;;  %v3607_v1 = vshrl.u32 %v712_v54, 16 }
 0x105   : > { %3704 = vrot.lane.b32.xlu1 %v3598_v52, %s6223_s8  ;;  %3710 = vrot.lane.b32.xlu0 %v3602_v32, %s6223_s8  ;;  %v3610_v4 = vshll.u32 %v712_v54, 16  ;;  %10541 = vst [vmem:[#allocation22_spill] sm:$0xff] %v6527_v5  ;;  %v6531_v8 = vadd.f32 %v6453_v62, %v621_v55  ;;  %v744_v18 = vrot.slane %v712_v54, 7  ;;  %v10303_v24 = vmax.f32 %v6527_v5, 0.0 }
 0x106   : > { %10540 = vst [vmem:[#allocation21_spill] sm:$0xff] %v6520_v59  ;;  %v10307_v7 = vmax.f32 %v6520_v59, 0.0  ;;  %v6534_v10 = vadd.f32 %v6453_v62, %v619_v63  ;;  %v3609_v17 = vrot.slane %v3607_v1, 7 }
 0x107   : > { %10542 = vst [vmem:[#allocation23_spill] sm:$0xff] %v6531_v8  ;;  %v10302_v25 = vmax.f32 %v6531_v8, 0.0 }
 0x108   : > { %10543 = vst [vmem:[#allocation24_spill] sm:$0xff] %v6534_v10  ;;  %v10304_v19 = vmax.f32 %v6534_v10, 0.0  ;;  %v5939_v20 = vpop.f32.mrb[12].mxu0  ;;  %v3612_v21 = vor.u32 %v3610_v4, %v3609_v17 }
 0x109   : > { %3706 = vrot.lane.b32.xlu0 %v3595_v37, %s6223_s8  ;;  %764 = vrot.lane.b32.xlu1 %v745_v0, %s6222_s29  ;;  %v624_v26 = vmul.f32 %v5939_v20, %v6450_v61  ;;  %v527_v27 = vpop.f32.mrb[13].mxu0  ;;  %v6563_v39 = vpack.c.bf16 %v10302_v25, %v10303_v24 }
 0x10a   : > { %v6546_v29 = vpack.c.bf16 %v10304_v19, %v10307_v7  ;;  %v622_v30 = vmul.f32 %v6450_v61, %v527_v27  ;;  %v5940_v32 = vpop.f32.mrb[14].mxu0 }
 0x10b   : > { %v6550_v33 = vadd.f32 %v6453_v62, %v624_v26  ;;  %v625_v34 = vmul.f32 %v5940_v32, %v6450_v61  ;;  %v530_v35 = vpop.f32.mrb[15].mxu0  ;;  %10547 = vst [vmem:[#allocation28_spill] sm:$0xff] %v6563_v39  ;;  %v747_v56 = vrot.slane %v6563_v39, 7 }
 0x10c   : > { %10544 = vst [vmem:[#allocation25_spill] sm:$0xff] %v6546_v29  ;;  %v6554_v36 = vadd.f32 %v6453_v62, %v622_v30  ;;  %v623_v37 = vmul.f32 %v6450_v61, %v530_v35  ;;  %v746_v47 = vrot.slane %v6546_v29, 7 }
 0x10d   : > { %10545 = vst [vmem:[#allocation26_spill] sm:$0xff] %v6550_v33  ;;  %762 = vrot.lane.b32.xlu1 %v744_v18, %s6222_s29  ;;  %3712 = vrot.lane.b32.xlu0 %v3612_v21, %s6223_s8  ;;  %v10297_v43 = vmax.f32 %v6550_v33, 0.0  ;;  %v6567_v44 = vadd.f32 %v6453_v62, %v625_v34 }
 0x10e   : > { %10546 = vst [vmem:[#allocation27_spill] sm:$0xff] %v6554_v36  ;;  %v10301_v48 = vmax.f32 %v6554_v36, 0.0  ;;  %v6572_v50 = vadd.f32 %v6453_v62, %v623_v37 }
 0x10f   : > { %10548 = vst [vmem:[#allocation29_spill] sm:$0xff] %v6567_v44  ;;  %v10296_v51 = vmax.f32 %v6567_v44, 0.0 }
 0x110   : > { %10549 = vst [vmem:[#allocation30_spill] sm:$0xff] %v6572_v50  ;;  %v10300_v52 = vmax.f32 %v6572_v50, 0.0  ;;  %v5943_v54 = vpop.f32.mrb[16].mxu0 }
 0x111   : > { %3714 = vrot.lane.b32.xlu1 %v3609_v17, %s6223_s8  ;;  %v6581_v55 = vpack.c.bf16 %v10296_v51, %v10297_v43  ;;  %766 = vrot.lane.b32.xlu0 %v746_v47, %s6222_s29  ;;  %v628_v63 = vmul.f32 %v5943_v54, %v6450_v61  ;;  %v543_v0 = vpop.f32.mrb[17].mxu0 }
 0x112   : > { %v6590_v1 = vpack.c.bf16 %v10300_v52, %v10301_v48  ;;  %v626_v4 = vmul.f32 %v6450_v61, %v543_v0  ;;  %v5944_v17 = vpop.f32.mrb[18].mxu0 }
 0x113   : > { %10550 = vst [vmem:[#allocation31_spill] sm:$0xff] %v6581_v55  ;;  %v6594_v18 = vadd.f32 %v6453_v62, %v628_v63  ;;  %v629_v20 = vmul.f32 %v5944_v17, %v6450_v61  ;;  %v546_v21 = vpop.f32.mrb[19].mxu0  ;;  %v749_v35 = vrot.slane %v6581_v55, 7 }
 0x114   : > { %10551 = vst [vmem:[#allocation32_spill] sm:$0xff] %v6590_v1  ;;  %v6598_v26 = vadd.f32 %v6453_v62, %v626_v4  ;;  %v627_v27 = vmul.f32 %v6450_v61, %v546_v21  ;;  %v748_v30 = vrot.slane %v6590_v1, 7 }
 0x115   : > { %10552 = vst [vmem:[#allocation33_spill] sm:$0xff] %v6594_v18  ;;  %768 = vrot.lane.b32.xlu1 %v747_v56, %s6222_s29  ;;  %v10295_v32 = vmax.f32 %v6594_v18, 0.0  ;;  %v6605_v34 = vadd.f32 %v6453_v62, %v629_v20  ;;  %v6840_v18 = vpop.permute.xlu1 %6075 }
 0x116   : > { %10553 = vst [vmem:[#allocation34_spill] sm:$0xff] %v6598_v26  ;;  %v10299_v37 = vmax.f32 %v6598_v26, 0.0  ;;  %v6610_v47 = vadd.f32 %v6453_v62, %v627_v27  ;;  %770 = vrot.lane.b32.xlu0 %v748_v30, %s6222_s29  ;;  %10578 = vst [vmem:[#allocation59_spill] sm:$0xff] %v6840_v18 }
 0x117   : > { %10554 = vst [vmem:[#allocation35_spill] sm:$0xff] %v6605_v34  ;;  %v10294_v54 = vmax.f32 %v6605_v34, 0.0 }
 0x118   : > { %10555 = vst [vmem:[#allocation36_spill] sm:$0xff] %v6610_v47  ;;  %v10298_v63 = vmax.f32 %v6610_v47, 0.0  ;;  %v5947_v0 = vpop.f32.mrb[20].mxu0 }
 0x119   : > { %v6619_v56 = vpack.c.bf16 %v10294_v54, %v10295_v32  ;;  %772 = vrot.lane.b32.xlu1 %v749_v35, %s6222_s29  ;;  %v632_v4 = vmul.f32 %v5947_v0, %v6450_v61  ;;  %v559_v17 = vpop.f32.mrb[21].mxu0 }
 0x11a   : > { %v6627_v20 = vpack.c.bf16 %v10298_v63, %v10299_v37  ;;  %v630_v21 = vmul.f32 %v6450_v61, %v559_v17  ;;  %v5948_v27 = vpop.f32.mrb[22].mxu0 }
 0x11b   : > { %10556 = vst [vmem:[#allocation37_spill] sm:$0xff] %v6619_v56  ;;  %v6631_v30 = vadd.f32 %v6453_v62, %v632_v4  ;;  %v633_v54 = vmul.f32 %v5948_v27, %v6450_v61  ;;  %v562_v32 = vpop.f32.mrb[23].mxu0  ;;  %v751_v35 = vrot.slane %v6619_v56, 7 }
 0x11c   : > { %10557 = vst [vmem:[#allocation38_spill] sm:$0xff] %v6627_v20  ;;  %v6636_v0 = vadd.f32 %v6453_v62, %v630_v21  ;;  %v631_v51 = vmul.f32 %v6450_v61, %v562_v32  ;;  %v750_v43 = vrot.slane %v6627_v20, 7 }
 0x11d   : > { %10558 = vst [vmem:[#allocation39_spill] sm:$0xff] %v6631_v30  ;;  %v10306_v63 = vmax.f32 %v6631_v30, 0.0  ;;  %v6642_v17 = vadd.f32 %v6453_v62, %v633_v54  ;;  %776 = vrot.lane.b32.xlu1 %v751_v35, %s6222_s29  ;;  %v6122_v30 = vld [vmem:[%s10288_s2 + $0xa8] sm:$0xff]  }
 0x11e   : > { %10559 = vst [vmem:[#allocation40_spill] sm:$0xff] %v6636_v0  ;;  %v10309_v4 = vmax.f32 %v6636_v0, 0.0  ;;  %v6647_v27 = vadd.f32 %v6453_v62, %v631_v51  ;;  %774 = vrot.lane.b32.xlu0 %v750_v43, %s6222_s29 }
 0x11f   : > { %10560 = vst [vmem:[#allocation41_spill] sm:$0xff] %v6642_v17  ;;  %v10305_v21 = vmax.f32 %v6642_v17, 0.0  ;;  %v6121_v17 = vld [vmem:[%s10288_s2 + $0xe8] sm:$0xff]  }
 0x120   : > { %10561 = vst [vmem:[#allocation42_spill] sm:$0xff] %v6647_v27  ;;  %v10308_v32 = vmax.f32 %v6647_v27, 0.0  ;;  %v5951_v37 = vpop.f32.mrb[24].mxu0 }
 0x121   : > { %v6656_v54 = vpack.c.bf16 %v10305_v21, %v10306_v63  ;;  %v636_v35 = vmul.f32 %v5951_v37, %v6450_v61  ;;  %v575_v52 = vpop.f32.mrb[25].mxu0 }
 0x122   : > { %v6663_v51 = vpack.c.bf16 %v10308_v32, %v10309_v4  ;;  %v634_v43 = vmul.f32 %v6450_v61, %v575_v52  ;;  %v5952_v48 = vpop.f32.mrb[26].mxu0 }
 0x123   : > { %10562 = vst [vmem:[#allocation43_spill] sm:$0xff] %v6656_v54  ;;  %v6667_v25 = vadd.f32 %v6453_v62, %v636_v35  ;;  %v637_v24 = vmul.f32 %v5952_v48, %v6450_v61  ;;  %v578_v19 = vpop.f32.mrb[27].mxu0  ;;  %v753_v21 = vrot.slane %v6656_v54, 7 }
 0x124   : > { %10563 = vst [vmem:[#allocation44_spill] sm:$0xff] %v6663_v51  ;;  %v6672_v37 = vadd.f32 %v6453_v62, %v634_v43  ;;  %v635_v63 = vmul.f32 %v6450_v61, %v578_v19  ;;  %v752_v7 = vrot.slane %v6663_v51, 7 }
 0x125   : > { %10564 = vst [vmem:[#allocation45_spill] sm:$0xff] %v6667_v25  ;;  %v10316_v32 = vmax.f32 %v6667_v25, 0.0  ;;  %v6678_v52 = vadd.f32 %v6453_v62, %v637_v24  ;;  %780 = vrot.lane.b32.xlu1 %v753_v21, %s6222_s29 }
 0x126   : > { %10565 = vst [vmem:[#allocation46_spill] sm:$0xff] %v6672_v37  ;;  %v10323_v35 = vmax.f32 %v6672_v37, 0.0  ;;  %v6683_v48 = vadd.f32 %v6453_v62, %v635_v63  ;;  %778 = vrot.lane.b32.xlu0 %v752_v7, %s6222_s29 }
 0x127   : > { %10566 = vst [vmem:[#allocation47_spill] sm:$0xff] %v6678_v52  ;;  %v10315_v43 = vmax.f32 %v6678_v52, 0.0 }
 0x128   : > { %10567 = vst [vmem:[#allocation48_spill] sm:$0xff] %v6683_v48  ;;  %v10318_v19 = vmax.f32 %v6683_v48, 0.0  ;;  %v5955_v4 = vpop.f32.mrb[28].mxu0 }
 0x129   : > { %v6692_v24 = vpack.c.bf16 %v10315_v43, %v10316_v32  ;;  %v640_v21 = vmul.f32 %v5955_v4, %v6450_v61  ;;  %v591_v45 = vpop.f32.mrb[29].mxu0 }
 0x12a   : > { %v6699_v63 = vpack.c.bf16 %v10318_v19, %v10323_v35  ;;  %v638_v7 = vmul.f32 %v6450_v61, %v591_v45  ;;  %v5956_v38 = vpop.f32.mrb[30].mxu0 }
 0x12b   : > { %10568 = vst [vmem:[#allocation49_spill] sm:$0xff] %v6692_v24  ;;  %v6703_v46 = vadd.f32 %v6453_v62, %v640_v21  ;;  %v641_v40 = vmul.f32 %v5956_v38, %v6450_v61  ;;  %v594_v14 = vpop.f32.mrb[31].mxu0  ;;  %v755_v43 = vrot.slane %v6692_v24, 7 }
 0x12c   : > { %10569 = vst [vmem:[#allocation50_spill] sm:$0xff] %v6699_v63  ;;  %v6708_v4 = vadd.f32 %v6453_v62, %v638_v7  ;;  %v639_v32 = vmul.f32 %v6450_v61, %v594_v14  ;;  %v754_v13 = vrot.slane %v6699_v63, 7 }
 0x12d   : > { %10570 = vst [vmem:[#allocation51_spill] sm:$0xff] %v6703_v46  ;;  %v10320_v19 = vmax.f32 %v6703_v46, 0.0  ;;  %v6714_v45 = vadd.f32 %v6453_v62, %v641_v40  ;;  %784 = vrot.lane.b32.xlu1 %v755_v43, %s6222_s29  ;;  %v6111_v43 = vld [vmem:[%s10288_s2 + $0xc0] sm:$0xff]   ;;  %v6115_v46 = vld [vmem:[%s10288_s2 + $0xd0] sm:$0xff]  }
 0x12e   : > { %10571 = vst [vmem:[#allocation52_spill] sm:$0xff] %v6708_v4  ;;  %v10322_v21 = vmax.f32 %v6708_v4, 0.0  ;;  %v6719_v38 = vadd.f32 %v6453_v62, %v639_v32  ;;  %782 = vrot.lane.b32.xlu0 %v754_v13, %s6222_s29  ;;  %5681 = vmatprep.subr.bf16.mxu0 %v6111_v43  ;;  %v6118_v4 = vld [vmem:[%s10288_s2 + $0x98] sm:$0xff]  }
 0x12f   : > { %10572 = vst [vmem:[#allocation53_spill] sm:$0xff] %v6714_v45  ;;  %v10319_v7 = vmax.f32 %v6714_v45, 0.0  ;;  %5993 = vmatprep.subr.bf16.mxu1 %v6111_v43 }
 0x130   : > { %10573 = vst [vmem:[#allocation54_spill] sm:$0xff] %v6719_v38  ;;  %v10321_v61 = vmax.f32 %v6719_v38, 0.0  ;;  %v6117_v38 = vld [vmem:[%s10288_s2 + $0xd8] sm:$0xff]  }
 0x131   : > { %v6728_v14 = vpack.c.bf16 %v10319_v7, %v10320_v19  ;;  %v6112_v7 = vld [vmem:[%s10288_s2 + $0x80] sm:$0xff]  }
 0x132   : > { %v6734_v40 = vpack.c.bf16 %v10321_v61, %v10322_v21  ;;  %5682 = vmatpush3.bf16.msra.mxu0 %v6112_v7  ;;  %v6114_v21 = vld [vmem:[%s10288_s2 + $0x88] sm:$0xff]   ;;  %6001 = vmatpush3.bf16.msra.mxu1 %v6112_v7 }
 0x133   : > { %10574 = vst [vmem:[#allocation55_spill] sm:$0xff] %v6728_v14  ;;  %v757_v62 = vrot.slane %v6728_v14, 7 }
 0x134   : > { %10575 = vst [vmem:[#allocation56_spill] sm:$0xff] %v6734_v40  ;;  %v756_v13 = vrot.slane %v6734_v40, 7 }
 0x135   : > { %788 = vrot.lane.b32.xlu1 %v757_v62, %s6222_s29 }
 0x136   : > { %786 = vrot.lane.b32.xlu0 %v756_v13, %s6222_s29  ;;  %v6113_v13 = vld [vmem:[%s10288_s2 + $0xc8] sm:$0xff]  }
 0x137   : > { %5683 = vmatprep.subr.bf16.mxu0 %v6113_v13  ;;  %5994 = vmatprep.subr.bf16.mxu1 %v6113_v13  ;;  %v6116_v13 = vld [vmem:[%s10288_s2 + $0x90] sm:$0xff]  }
 0x138   : > { %5684 = vmatpush3.bf16.msra.mxu0 %v6114_v21  ;;  %6002 = vmatpush3.bf16.msra.mxu1 %v6114_v21 }
 0x139   : > { %5685 = vmatprep.subr.bf16.mxu0 %v6115_v46  ;;  %5995 = vmatprep.subr.bf16.mxu1 %v6115_v46 }
 0x13c   : > { %5686 = vmatpush3.bf16.msra.mxu0 %v6116_v13  ;;  %6003 = vmatpush3.bf16.msra.mxu1 %v6116_v13  ;;  %v6120_v13 = vld [vmem:[%s10288_s2 + $0xa0] sm:$0xff]  }
 0x13d   : > { %5687 = vmatprep.subr.bf16.mxu0 %v6117_v38  ;;  %5996 = vmatprep.subr.bf16.mxu1 %v6117_v38 }
 0x140   : > { %5688 = vmatpush3.bf16.msra.mxu0 %v6118_v4  ;;  %6004 = vmatpush3.bf16.msra.mxu1 %v6118_v4 }
 0x16f   : > { %v761_v32 = vpop.permute.xlu0 %760 }
 0x170   : > { %v6747_v19 = vsel %vm790_vm5, 0, %v761_v32  ;;  %v6750_v61 = vsel %vm790_vm5, %v761_v32, 0 }
 0x171   : > { %1638 = vrot.lane.b32.xlu1 %v6747_v19, %s6221_s22  ;;  %1386 = vrot.lane.b32.xlu0 %v6747_v19, %s6220_s21  ;;  %v1200_v32 = vrot.slane %v6750_v61, 2  ;;  %v1199_v16 = vrot.slane %v6747_v19, 2  ;;  %v1024_v7 = vrot.slane %v6750_v61, 1  ;;  %v1023_v2 = vrot.slane %v6747_v19, 1 }
 0x172   : > { %v864_v4 = vshll.u32 %v6750_v61, 16  ;;  %v1079_v38 = vshrl.u32 %v6750_v61, 16  ;;  %v858_v52 = vshrl.u32 %v6747_v19, 16 }
 0x173   : > { %v759_v62 = vpop.permute.xlu0 %758  ;;  %v6776_v15 = vsel %vm1193_vm6, %v1199_v16, %v1200_v32  ;;  %v6792_v16 = vsel %vm1017_vm7, %v1023_v2, %v1024_v7  ;;  %v860_v32 = vshll.u32 %v6747_v19, 16 }
 0x174   : > { %v6764_v35 = vsel %vm790_vm5, 0, %v759_v62  ;;  %v6768_v43 = vsel %vm790_vm5, %v759_v62, 0  ;;  %10576 = vst [vmem:[#allocation57_spill] sm:$0xff] %v6776_v15  ;;  %10577 = vst [vmem:[#allocation58_spill] sm:$0xff] %v6792_v16  ;;  %v1082_v0 = vrot.slane %v864_v4, 2  ;;  %v866_v34 = vrot.slane %v864_v4, 1 }
 0x175   : > { %1384 = vrot.lane.b32.xlu1 %v6764_v35, %s6220_s21  ;;  %1512 = vrot.lane.b32.xlu0 %v6747_v19, %s6219_s20  ;;  %v1020_v62 = vrot.slane %v6764_v35, 1  ;;  %v1021_v45 = vrot.slane %v6768_v43, 1  ;;  %v1196_v2 = vrot.slane %v6764_v35, 2  ;;  %v1197_v46 = vrot.slane %v6768_v43, 2  ;;  %v6123_v4 = vld [vmem:[%s10288_s2 + $0xf0] sm:$0xff]  }
 0x176   : > { %v850_v7 = vshll.u32 %v6764_v35, 16  ;;  %v854_v25 = vshll.u32 %v6768_v43, 16  ;;  %v1070_v48 = vshrl.u32 %v6768_v43, 16  ;;  %v848_v37 = vshrl.u32 %v6764_v35, 16 }
 0x177   : > { %v6795_v21 = vsel %vm1017_vm7, %v1020_v62, %v1021_v45  ;;  %v862_v45 = vrot.slane %v860_v32, 1  ;;  %v6119_v62 = vld [vmem:[%s10288_s2 + $0xe0] sm:$0xff]   ;;  %v6834_v61 = vsel %vm1193_vm6, %v1196_v2, %v1197_v46  ;;  %v1081_v43 = vrot.slane %v1079_v38, 1  ;;  %v6862_v38 = vpop.permute.xlu1 %3708 }
 0x178   : > { %5689 = vmatprep.subr.bf16.mxu0 %v6119_v62  ;;  %5997 = vmatprep.subr.bf16.mxu1 %v6119_v62  ;;  %v852_v27 = vrot.slane %v850_v7, 1  ;;  %v1067_v47 = vrot.slane %v848_v37, 1  ;;  %v1068_v2 = vrot.slane %v850_v7, 2  ;;  %v1073_v46 = vrot.slane %v854_v25, 2  ;;  %v6126_v7 = vld [vmem:[%s10288_s2 + $0xb8] sm:$0xff]   ;;  %10580 = vst [vmem:[#allocation61_spill] sm:$0xff] %v6862_v38 }
 0x179   : > { %1510 = vrot.lane.b32.xlu1 %v6764_v35, %s6219_s20  ;;  %1608 = vrot.lane.b32.xlu0 %v6776_v15, %s6219_s20  ;;  %v863_v62 = vor.u32 %v862_v45, %v858_v52  ;;  %v1076_v44 = vrot.slane %v858_v52, 1  ;;  %v1077_v33 = vrot.slane %v860_v32, 2  ;;  %v6125_v32 = vld [vmem:[%s10288_s2 + $0xf8] sm:$0xff]  }
 0x17a   : > { %5690 = vmatpush3.bf16.msra.mxu0 %v6120_v13  ;;  %6005 = vmatpush3.bf16.msra.mxu1 %v6120_v13  ;;  %v1072_v13 = vrot.slane %v1070_v48, 1  ;;  %v853_v26 = vor.u32 %v852_v27, %v848_v37  ;;  %v1083_v48 = vor.u32 %v1082_v0, %v1081_v43 }
 0x17b   : > { %5691 = vmatprep.subr.bf16.mxu0 %v6121_v17  ;;  %5998 = vmatprep.subr.bf16.mxu1 %v6121_v17  ;;  %v6843_v45 = vsel %vm840_vm8, %v863_v62, %v866_v34  ;;  %v6124_v17 = vld [vmem:[%s10288_s2 + $0xb0] sm:$0xff]   ;;  %v1069_v34 = vor.u32 %v1068_v2, %v1067_v47  ;;  %v1078_v52 = vor.u32 %v1077_v33, %v1076_v44  ;;  %v6877_v44 = vpop.permute.xlu1 %3704 }
 0x17c   : > { %10579 = vst [vmem:[#allocation60_spill] sm:$0xff] %v6843_v45  ;;  %v1074_v37 = vor.u32 %v1073_v46, %v1072_v13  ;;  %10582 = vst [vmem:[#allocation63_spill] sm:$0xff] %v6877_v44 }
 0x17d   : > { %1326 = vrot.lane.b32.xlu1 %v6792_v16, %s6219_s20  ;;  %1324 = vrot.lane.b32.xlu0 %v6795_v21, %s6219_s20  ;;  %v6871_v33 = vsel %vm1062_vm9, %v1078_v52, %v1083_v48 }
 0x17e   : > { %5692 = vmatpush3.bf16.msra.mxu0 %v6122_v30  ;;  %6006 = vmatpush3.bf16.msra.mxu1 %v6122_v30  ;;  %v856_v30 = vrot.slane %v854_v25, 1  ;;  %v6868_v25 = vsel %vm1062_vm9, %v1069_v34, %v1074_v37  ;;  %10581 = vst [vmem:[#allocation62_spill] sm:$0xff] %v6871_v33 }
 0x17f   : > { %5693 = vmatprep.subr.bf16.mxu0 %v6123_v4  ;;  %5999 = vmatprep.subr.bf16.mxu1 %v6123_v4 }
 0x180   : > { %v857_v27 = vsel %vm840_vm8, %v853_v26, %v856_v30  ;;  %v765_v26 = vpop.permute.xlu1 %764 }
 0x181   : > { %1450 = vrot.lane.b32.xlu1 %v6792_v16, %s6221_s22  ;;  %1448 = vrot.lane.b32.xlu0 %v6795_v21, %s6221_s22  ;;  %v6887_v47 = vsel %vm790_vm5, 0, %v765_v26  ;;  %v827_v43 = vsel %vm790_vm5, %v765_v26, 0 }
 0x182   : > { %5694 = vmatpush3.bf16.msra.mxu0 %v6124_v17  ;;  %6007 = vmatpush3.bf16.msra.mxu1 %v6124_v17  ;;  %v1206_v13 = vrot.slane %v827_v43, 2  ;;  %v1205_v2 = vrot.slane %v6887_v47, 2  ;;  %v1030_v4 = vrot.slane %v827_v43, 1  ;;  %v1029_v34 = vrot.slane %v6887_v47, 1 }
 0x183   : > { %5695 = vmatprep.subr.bf16.mxu0 %v6125_v32  ;;  %6000 = vmatprep.subr.bf16.mxu1 %v6125_v32  ;;  %v880_v37 = vshll.u32 %v6887_v47, 16  ;;  %v884_v32 = vshll.u32 %v827_v43, 16 }
 0x184   : > { %v763_v0 = vpop.permute.xlu1 %762  ;;  %v6907_v30 = vsel %vm1193_vm6, %v1205_v2, %v1206_v13  ;;  %v6917_v52 = vsel %vm1017_vm7, %v1029_v34, %v1030_v4  ;;  %v1097_v4 = vshrl.u32 %v827_v43, 16 }
 0x185   : > { %1482 = vrot.lane.b32.xlu1 %v6776_v15, %s6220_s21  ;;  %1480 = vrot.lane.b32.xlu0 %v6834_v61, %s6220_s21  ;;  %v6894_v62 = vsel %vm790_vm5, 0, %v763_v0  ;;  %v826_v46 = vsel %vm790_vm5, %v763_v0, 0  ;;  %v882_v26 = vrot.slane %v880_v37, 1  ;;  %v886_v50 = vrot.slane %v884_v32, 1 }
 0x186   : > { %5696 = vmatpush3.bf16.msra.mxu0 %v6126_v7  ;;  %6008 = vmatpush3.bf16.msra.mxu1 %v6126_v7  ;;  %v1027_v17 = vrot.slane %v826_v46, 1  ;;  %v878_v7 = vshrl.u32 %v6887_v47, 16  ;;  %v1203_v0 = vrot.slane %v826_v46, 2  ;;  %v1202_v13 = vrot.slane %v6894_v62, 2 }
 0x187   : > { %v870_v2 = vshll.u32 %v6894_v62, 16  ;;  %v874_v34 = vshll.u32 %v826_v46, 16  ;;  %v868_v36 = vshrl.u32 %v6894_v62, 16  ;;  %v1099_v10 = vrot.slane %v1097_v4, 1 }
 0x188   : > { %v6935_v8 = vsel %vm1193_vm6, %v1202_v13, %v1203_v0  ;;  %v1100_v59 = vrot.slane %v884_v32, 2  ;;  %v1094_v0 = vrot.slane %v878_v7, 1  ;;  %v1095_v13 = vrot.slane %v880_v37, 2 }
 0x189   : > { %1418 = vrot.lane.b32.xlu1 %v6843_v45, %s6219_s20  ;;  %1606 = vrot.lane.b32.xlu0 %v6834_v61, %s6219_s20  ;;  %v872_v5 = vrot.slane %v870_v2, 1  ;;  %v1091_v43 = vrot.slane %v874_v34, 2  ;;  %v1085_v28 = vrot.slane %v868_v36, 1  ;;  %v1086_v31 = vrot.slane %v870_v2, 2 }
 0x18b   : > { %v873_v42 = vor.u32 %v872_v5, %v868_v36  ;;  %v1087_v4 = vor.u32 %v1086_v31, %v1085_v28  ;;  %v5585_v5 = vpop.f32.mrb[0].mxu1 }
 0x18c   : > { %v5586_v36 = vpop.f32.mrb[1].mxu1 }
 0x18d   : > { %1294 = vrot.lane.b32.xlu1 %v857_v27, %s6220_s21  ;;  %1296 = vrot.lane.b32.xlu0 %v6843_v45, %s6220_s21  ;;  %v6957_v37 = vadd.f32 %v5586_v36, %v5585_v5 }
 0x18f   : > { %10587 = vst [vmem:[#allocation68_spill] sm:$0xff] %v6957_v37 }
 0x191   : > { %1354 = vrot.lane.b32.xlu1 %v6868_v25, %s6221_s22  ;;  %1356 = vrot.lane.b32.xlu0 %v6871_v33, %s6221_s22 }
 0x195   : > { %1542 = vrot.lane.b32.xlu1 %v857_v27, %s6221_s22  ;;  %1544 = vrot.lane.b32.xlu0 %v6843_v45, %s6221_s22 }
 0x199   : > { %1574 = vrot.lane.b32.xlu1 %v6868_v25, %s6220_s21  ;;  %1576 = vrot.lane.b32.xlu0 %v6871_v33, %s6220_s21 }
 0x19d   : > { %1642 = vrot.lane.b32.xlu1 %v6887_v47, %s6221_s22  ;;  %1390 = vrot.lane.b32.xlu0 %v6887_v47, %s6220_s21 }
 0x1a1   : > { %1388 = vrot.lane.b32.xlu1 %v6894_v62, %s6220_s21  ;;  %1416 = vrot.lane.b32.xlu0 %v857_v27, %s6219_s20  ;;  %v1026_v27 = vrot.slane %v6894_v62, 1 }
 0x1a3   : > { %v6920_v48 = vsel %vm1017_vm7, %v1026_v27, %v1027_v17  ;;  %v1088_v17 = vshrl.u32 %v826_v46, 16  ;;  %v883_v27 = vor.u32 %v882_v26, %v878_v7  ;;  %v876_v26 = vrot.slane %v874_v34, 1  ;;  %v5588_v7 = vpop.f32.mrb[2].mxu1 }
 0x1a4   : > { %10583 = vst [vmem:[#allocation64_spill] sm:$0xff] %v6920_v48  ;;  %v5589_v31 = vpop.f32.mrb[3].mxu1 }
 0x1a5   : > { %1514 = vrot.lane.b32.xlu1 %v6894_v62, %s6219_s20  ;;  %1516 = vrot.lane.b32.xlu0 %v6887_v47, %s6219_s20  ;;  %v1090_v41 = vrot.slane %v1088_v17, 1  ;;  %v6942_v46 = vsel %vm840_vm8, %v883_v27, %v886_v50  ;;  %v6949_v32 = vsel %vm840_vm8, %v873_v42, %v876_v26  ;;  %v1096_v17 = vor.u32 %v1095_v13, %v1094_v0  ;;  %v6951_v27 = vpop.permute.xlu0 %3710 }
 0x1a6   : > { %10584 = vst [vmem:[#allocation65_spill] sm:$0xff] %v6942_v46  ;;  %10585 = vst [vmem:[#allocation66_spill] sm:$0xff] %v6949_v32  ;;  %v1101_v50 = vor.u32 %v1100_v59, %v1099_v10  ;;  %v6969_v42 = vadd.f32 %v5589_v31, %v5588_v7  ;;  %v6973_v10 = vpop.permute.xlu1 %3714 }
 0x1a7   : > { %v1092_v11 = vor.u32 %v1091_v43, %v1090_v41  ;;  %10586 = vst [vmem:[#allocation67_spill] sm:$0xff] %v6951_v27  ;;  %10592 = vst [vmem:[#allocation73_spill] sm:$0xff] %v6973_v10 }
 0x1a8   : > { %v6963_v28 = vsel %vm1062_vm9, %v1096_v17, %v1101_v50  ;;  %10590 = vst [vmem:[#allocation71_spill] sm:$0xff] %v6969_v42 }
 0x1a9   : > { %1640 = vrot.lane.b32.xlu1 %v6894_v62, %s6221_s22  ;;  %1612 = vrot.lane.b32.xlu0 %v6907_v30, %s6219_s20  ;;  %v6960_v41 = vsel %vm1062_vm9, %v1087_v4, %v1092_v11  ;;  %10589 = vst [vmem:[#allocation70_spill] sm:$0xff] %v6963_v28  ;;  %v6971_v59 = vpop.permute.xlu0 %3706 }
 0x1aa   : > { %10588 = vst [vmem:[#allocation69_spill] sm:$0xff] %v6960_v41  ;;  %10591 = vst [vmem:[#allocation72_spill] sm:$0xff] %v6971_v59  ;;  %v769_v2 = vpop.permute.xlu1 %768 }
 0x1ab   : > { %v6986_v43 = vsel %vm790_vm5, 0, %v769_v2  ;;  %v829_v4 = vsel %vm790_vm5, %v769_v2, 0 }
 0x1ac   : > { %10594 = vst [vmem:[#allocation75_spill] sm:$0xff] %v6986_v43  ;;  %v1212_v5 = vrot.slane %v829_v4, 2  ;;  %v1211_v7 = vrot.slane %v6986_v43, 2  ;;  %v1036_v12 = vrot.slane %v829_v4, 1  ;;  %v1035_v60 = vrot.slane %v6986_v43, 1 }
 0x1ad   : > { %1330 = vrot.lane.b32.xlu1 %v6917_v52, %s6219_s20  ;;  %1328 = vrot.lane.b32.xlu0 %v6920_v48, %s6219_s20  ;;  %v6979_v11 = vpop.permute.xlu0 %3712  ;;  %v898_v49 = vshrl.u32 %v6986_v43, 16 }
 0x1ae   : > { %10593 = vst [vmem:[#allocation74_spill] sm:$0xff] %v6979_v11  ;;  %v6992_v26 = vpop.permute.xlu1 %772  ;;  %v7019_v9 = vsel %vm1193_vm6, %v1211_v7, %v1212_v5  ;;  %v904_v7 = vshll.u32 %v829_v4, 16 }
 0x1af   : > { %10596 = vst [vmem:[#allocation77_spill] sm:$0xff] %v7019_v9  ;;  %v1112_v1 = vrot.slane %v898_v49, 1 }
 0x1b0   : > { %v906_v27 = vrot.slane %v904_v7, 1  ;;  %v1118_v44 = vrot.slane %v904_v7, 2 }
 0x1b1   : > { %1454 = vrot.lane.b32.xlu1 %v6917_v52, %s6221_s22  ;;  %1452 = vrot.lane.b32.xlu0 %v6920_v48, %s6221_s22  ;;  %v767_v34 = vpop.permute.xlu0 %766 }
 0x1b2   : > { %v6997_v13 = vsel %vm790_vm5, 0, %v767_v34  ;;  %v7004_v17 = vpop.permute.xlu1 %776  ;;  %v828_v36 = vsel %vm790_vm5, %v767_v34, 0 }
 0x1b3   : > { %10595 = vst [vmem:[#allocation76_spill] sm:$0xff] %v6997_v13  ;;  %v1033_v31 = vrot.slane %v828_v36, 1  ;;  %v1032_v34 = vrot.slane %v6997_v13, 1  ;;  %v1209_v63 = vrot.slane %v828_v36, 2  ;;  %v1106_v54 = vshrl.u32 %v828_v36, 16 }
 0x1b4   : > { %v888_v38 = vshrl.u32 %v6997_v13, 16 }
 0x1b5   : > { %1486 = vrot.lane.b32.xlu1 %v6907_v30, %s6220_s21  ;;  %1484 = vrot.lane.b32.xlu0 %v6935_v8, %s6220_s21  ;;  %v6994_v0 = vpop.permute.xlu0 %770  ;;  %v7036_v5 = vsel %vm1017_vm7, %v1032_v34, %v1033_v31  ;;  %v1115_v31 = vshrl.u32 %v829_v4, 16  ;;  %v894_v34 = vshll.u32 %v828_v36, 16  ;;  %v1108_v36 = vrot.slane %v1106_v54, 1 }
 0x1b6   : > { %v7014_v2 = vpop.permute.xlu1 %780  ;;  %v7148_v53 = vsel %vm790_vm5, %v6994_v0, 0 }
 0x1b7   : > { %v1117_v4 = vrot.slane %v1115_v31, 1  ;;  %v1109_v59 = vrot.slane %v894_v34, 2 }
 0x1b9   : > { %1422 = vrot.lane.b32.xlu1 %v6942_v46, %s6219_s20  ;;  %1610 = vrot.lane.b32.xlu0 %v6935_v8, %s6219_s20  ;;  %v7006_v50 = vpop.permute.xlu0 %774  ;;  %v1110_v31 = vor.u32 %v1109_v59, %v1108_v36 }
 0x1ba   : > { %v7027_v57 = vpop.permute.xlu1 %784 }
 0x1bb   : > { %10597 = vst [vmem:[#allocation78_spill] sm:$0xff] %v7027_v57 }
 0x1bd   : > { %1298 = vrot.lane.b32.xlu1 %v6949_v32, %s6220_s21  ;;  %1300 = vrot.lane.b32.xlu0 %v6942_v46, %s6220_s21  ;;  %v7016_v6 = vpop.permute.xlu0 %778 }
 0x1be   : > { %v7042_v40 = vpop.permute.xlu1 %788 }
 0x1bf   : > { %10600 = vst [vmem:[#allocation81_spill] sm:$0xff] %v7042_v40 }
 0x1c1   : > { %1358 = vrot.lane.b32.xlu1 %v6960_v41, %s6221_s22  ;;  %1360 = vrot.lane.b32.xlu0 %v6963_v28, %s6221_s22  ;;  %v7029_v14 = vpop.permute.xlu0 %782 }
 0x1c2   : > { %10598 = vst [vmem:[#allocation79_spill] sm:$0xff] %v7029_v14 }
 0x1c5   : > { %1546 = vrot.lane.b32.xlu1 %v6949_v32, %s6221_s22  ;;  %1548 = vrot.lane.b32.xlu0 %v6942_v46, %s6221_s22  ;;  %v900_v46 = vshll.u32 %v6986_v43, 16  ;;  %v7044_v45 = vpop.permute.xlu0 %786 }
 0x1c6   : > { %10601 = vst [vmem:[#allocation82_spill] sm:$0xff] %v7044_v45  ;;  %v1039_v45 = vrot.slane %v7148_v53, 1 }
 0x1c7   : > { %v902_v24 = vrot.slane %v900_v46, 1  ;;  %v1113_v39 = vrot.slane %v900_v46, 2 }
 0x1c9   : > { %1578 = vrot.lane.b32.xlu1 %v6960_v41, %s6220_s21  ;;  %1580 = vrot.lane.b32.xlu0 %v6963_v28, %s6220_s21  ;;  %v903_v51 = vor.u32 %v902_v24, %v898_v49 }
 0x1cb   : > { %v7070_v55 = vsel %vm840_vm8, %v903_v51, %v906_v27 }
 0x1cc   : > { %10602 = vst [vmem:[#allocation83_spill] sm:$0xff] %v7070_v55 }
 0x1cd   : > { %1646 = vrot.lane.b32.xlu1 %v6986_v43, %s6221_s22  ;;  %1394 = vrot.lane.b32.xlu0 %v6986_v43, %s6220_s21 }
 0x1d1   : > { %1392 = vrot.lane.b32.xlu1 %v6997_v13, %s6220_s21  ;;  %1420 = vrot.lane.b32.xlu0 %v6949_v32, %s6219_s20  ;;  %v7033_v32 = vsel %vm1017_vm7, %v1035_v60, %v1036_v12  ;;  %v1208_v60 = vrot.slane %v6997_v13, 2  ;;  %v890_v12 = vshll.u32 %v6997_v13, 16 }
 0x1d2   : > { %10599 = vst [vmem:[#allocation80_spill] sm:$0xff] %v7033_v32 }
 0x1d3   : > { %v7059_v56 = vsel %vm1193_vm6, %v1208_v60, %v1209_v63  ;;  %v892_v3 = vrot.slane %v890_v12, 1  ;;  %v896_v63 = vrot.slane %v894_v34, 1  ;;  %v1103_v60 = vrot.slane %v888_v38, 1 }
 0x1d4   : > { %v1104_v37 = vrot.slane %v890_v12, 2  ;;  %v1114_v34 = vor.u32 %v1113_v39, %v1112_v1 }
 0x1d5   : > { %1518 = vrot.lane.b32.xlu1 %v6997_v13, %s6219_s20  ;;  %1520 = vrot.lane.b32.xlu0 %v6986_v43, %s6219_s20  ;;  %v893_v42 = vor.u32 %v892_v3, %v888_v38  ;;  %v1119_v3 = vor.u32 %v1118_v44, %v1117_v4  ;;  %v7121_v4 = vsel %vm790_vm5, 0, %v6992_v26 }
 0x1d6   : > { %v1105_v27 = vor.u32 %v1104_v37, %v1103_v60  ;;  %10606 = vst [vmem:[#allocation87_spill] sm:$0xff] %v7121_v4  ;;  %v7133_v60 = vsel %vm790_vm5, 0, %v6994_v0 }
 0x1d7   : > { %v7081_v51 = vsel %vm840_vm8, %v893_v42, %v896_v63  ;;  %v7095_v59 = vsel %vm1062_vm9, %v1114_v34, %v1119_v3  ;;  %v1038_v0 = vrot.slane %v7133_v60, 1 }
 0x1d8   : > { %10603 = vst [vmem:[#allocation84_spill] sm:$0xff] %v7081_v51  ;;  %v7092_v46 = vsel %vm1062_vm9, %v1105_v27, %v1110_v31  ;;  %10605 = vst [vmem:[#allocation86_spill] sm:$0xff] %v7095_v59  ;;  %v831_v31 = vsel %vm790_vm5, %v6992_v26, 0 }
 0x1d9   : > { %1644 = vrot.lane.b32.xlu1 %v6997_v13, %s6221_s22  ;;  %1616 = vrot.lane.b32.xlu0 %v7019_v9, %s6219_s20  ;;  %10604 = vst [vmem:[#allocation85_spill] sm:$0xff] %v7092_v46  ;;  %v1218_v3 = vrot.slane %v831_v31, 2  ;;  %v1042_v26 = vrot.slane %v831_v31, 1  ;;  %v920_v13 = vshll.u32 %v7121_v4, 16 }
 0x1dd   : > { %1334 = vrot.lane.b32.xlu1 %v7033_v32, %s6219_s20  ;;  %1332 = vrot.lane.b32.xlu0 %v7036_v5, %s6219_s20 }
 0x1e1   : > { %1458 = vrot.lane.b32.xlu1 %v7033_v32, %s6221_s22  ;;  %1456 = vrot.lane.b32.xlu0 %v7036_v5, %s6221_s22 }
 0x1e3   : > { %v7053_v10 = vpop.permute.xlu1 %1638  ;;  %v7055_v11 = vpop.permute.xlu0 %1386 }
 0x1e5   : > { %1490 = vrot.lane.b32.xlu1 %v7019_v9, %s6220_s21  ;;  %1488 = vrot.lane.b32.xlu0 %v7059_v56, %s6220_s21  ;;  %v6077_v9 = vunpack.i.l.bf16 %v6840_v18  ;;  %v924_v18 = vshll.u32 %v831_v31, 16 }
 0x1e7   : > { %v7065_v20 = vpop.permute.xlu1 %1384  ;;  %v7067_v24 = vpop.permute.xlu0 %1512  ;;  %v1907_v32 = vsel %vm1670_vm2, %v6374_v23, %v6077_v9  ;;  %v918_v23 = vshrl.u32 %v7121_v4, 16 }
 0x1e9   : > { %1426 = vrot.lane.b32.xlu1 %v7070_v55, %s6219_s20  ;;  %1614 = vrot.lane.b32.xlu0 %v7059_v56, %s6219_s20 }
 0x1eb   : > { %v7076_v54 = vpop.permute.xlu1 %1510  ;;  %v7078_v7 = vpop.permute.xlu0 %1608 }
 0x1ed   : > { %1302 = vrot.lane.b32.xlu1 %v7081_v51, %s6220_s21  ;;  %1304 = vrot.lane.b32.xlu0 %v7070_v55, %s6220_s21 }
 0x1ef   : > { %v7087_v49 = vpop.permute.xlu1 %1326  ;;  %v7089_v38 = vpop.permute.xlu0 %1324 }
 0x1f1   : > { %1362 = vrot.lane.b32.xlu1 %v7092_v46, %s6221_s22  ;;  %1364 = vrot.lane.b32.xlu0 %v7095_v59, %s6221_s22 }
 0x1f3   : > { %v7101_v39 = vpop.permute.xlu1 %1450  ;;  %v7103_v1 = vpop.permute.xlu0 %1448 }
 0x1f5   : > { %1550 = vrot.lane.b32.xlu1 %v7081_v51, %s6221_s22  ;;  %1552 = vrot.lane.b32.xlu0 %v7070_v55, %s6221_s22  ;;  %v1217_v55 = vrot.slane %v7121_v4, 2 }
 0x1f7   : > { %v7109_v44 = vpop.permute.xlu1 %1482  ;;  %v7111_v37 = vpop.permute.xlu0 %1480  ;;  %v7158_v40 = vsel %vm1193_vm6, %v1217_v55, %v1218_v3  ;;  %v7173_v3 = vsel %vm1017_vm7, %v1038_v0, %v1039_v45  ;;  %v1954_v45 = vsel %vm1701_vm3, %v1907_v32, %v7076_v54 }
 0x1f8   : > { %10607 = vst [vmem:[#allocation88_spill] sm:$0xff] %v7158_v40 }
 0x1f9   : > { %1582 = vrot.lane.b32.xlu1 %v7092_v46, %s6220_s21  ;;  %1584 = vrot.lane.b32.xlu0 %v7095_v59, %s6220_s21  ;;  %v1041_v59 = vrot.slane %v7121_v4, 1  ;;  %v1133_v46 = vshrl.u32 %v831_v31, 16  ;;  %v1214_v31 = vrot.slane %v7133_v60, 2 }
 0x1fb   : > { %v7117_v42 = vpop.permute.xlu1 %1418  ;;  %v1607_v12 = vpop.permute.xlu0 %1606  ;;  %v7170_v55 = vsel %vm1017_vm7, %v1041_v59, %v1042_v26  ;;  %v1135_v32 = vrot.slane %v1133_v46, 1 }
 0x1fc   : > { %10608 = vst [vmem:[#allocation89_spill] sm:$0xff] %v7170_v55 }
 0x1fd   : > { %1650 = vrot.lane.b32.xlu1 %v7121_v4, %s6221_s22  ;;  %1398 = vrot.lane.b32.xlu0 %v7121_v4, %s6220_s21 }
 0x1ff   : > { %v7127_v36 = vpop.permute.xlu1 %1294  ;;  %v7129_v63 = vpop.permute.xlu0 %1296 }
 0x201   : > { %1396 = vrot.lane.b32.xlu1 %v7133_v60, %s6220_s21  ;;  %1424 = vrot.lane.b32.xlu0 %v7081_v51, %s6219_s20 }
 0x203   : > { %v7141_v27 = vpop.permute.xlu1 %1354  ;;  %v7143_v34 = vpop.permute.xlu0 %1356 }
 0x205   : > { %1522 = vrot.lane.b32.xlu1 %v7133_v60, %s6219_s20  ;;  %1524 = vrot.lane.b32.xlu0 %v7121_v4, %s6219_s20  ;;  %v1131_v4 = vrot.slane %v920_v13, 2 }
 0x207   : > { %v1543_v29 = vpop.permute.xlu1 %1542  ;;  %v7154_v51 = vpop.permute.xlu0 %1544 }
 0x208   : > { %v1986_v9 = vsel %vm1732_vm4, %v1954_v45, %v1543_v29  ;;  %v926_v29 = vrot.slane %v924_v18, 1 }
 0x209   : > { %1648 = vrot.lane.b32.xlu1 %v7133_v60, %s6221_s22  ;;  %1620 = vrot.lane.b32.xlu0 %v7158_v40, %s6219_s20 }
 0x20b   : > { %v1575_v43 = vpop.permute.xlu1 %1574  ;;  %v1577_v14 = vpop.permute.xlu0 %1576 }
 0x20c   : > { %v2035_v57 = vsel %vm1670_vm2, %v6795_v21, %v1575_v43  ;;  %v1215_v43 = vrot.slane %v7148_v53, 2 }
 0x20d   : > { %1338 = vrot.lane.b32.xlu1 %v7170_v55, %s6219_s20  ;;  %1336 = vrot.lane.b32.xlu0 %v7173_v3, %s6219_s20  ;;  %v2082_v21 = vsel %vm1701_vm3, %v2035_v57, %v1607_v12  ;;  %v922_v57 = vrot.slane %v920_v13, 1  ;;  %v1785_v12 = vsel %vm1670_vm2, %v6834_v61, %v7055_v11  ;;  %v914_v61 = vshll.u32 %v7148_v53, 16 }
 0x20e   : > { %v2114_v59 = vsel %vm1732_vm4, %v2082_v21, %v7053_v10  ;;  %v1136_v10 = vrot.slane %v924_v18, 2  ;;  %v7200_v54 = vsel %vm1193_vm6, %v1214_v31, %v1215_v43  ;;  %v1782_v21 = vsel %vm1670_vm2, %v6369_v22, %v7065_v20 }
 0x20f   : > { %v7190_v26 = vpop.permute.xlu1 %1642  ;;  %3037 = vmatprep.mubr.bf16.mxu0 %v2114_v59  ;;  %v7192_v0 = vpop.permute.xlu0 %1390  ;;  %10609 = vst [vmem:[#allocation90_spill] sm:$0xff] %v7200_v54  ;;  %v1830_v46 = vsel %vm1701_vm3, %v1785_v12, %v7117_v42  ;;  %v923_v31 = vor.u32 %v922_v57, %v918_v23  ;;  %v910_v18 = vshll.u32 %v7133_v60, 16  ;;  %v1124_v11 = vshrl.u32 %v7148_v53, 16 }
 0x210   : > { %3038 = vmatmul.mubr.bf16.vlgmr.msra.gmra.mrb[32].mxu0 %v1986_v9  ;;  %v1130_v9 = vrot.slane %v918_v23, 1  ;;  %v1864_v42 = vsel %vm1732_vm4, %v1830_v46, %v7101_v39  ;;  %v1137_v57 = vor.u32 %v1136_v10, %v1135_v32  ;;  %v908_v12 = vshrl.u32 %v7133_v60, 16 }
 0x211   : > { %1462 = vrot.lane.b32.xlu1 %v7170_v55, %s6221_s22  ;;  %1460 = vrot.lane.b32.xlu0 %v7173_v3, %s6221_s22  ;;  %v1910_v39 = vsel %vm1670_vm2, %v6868_v25, %v7111_v37  ;;  %v1126_v32 = vrot.slane %v1124_v11, 1  ;;  %v1122_v25 = vrot.slane %v910_v18, 2 }
 0x212   : > { %v1132_v53 = vor.u32 %v1131_v4, %v1130_v9  ;;  %v916_v9 = vrot.slane %v914_v61, 1  ;;  %v1121_v46 = vrot.slane %v908_v12, 1 }
 0x213   : > { %v7208_v45 = vpop.permute.xlu1 %1388  ;;  %v1417_v59 = vpop.permute.xlu0 %1416 }
 0x214   : > { %v1828_v43 = vsel %vm1701_vm3, %v1782_v21, %v1417_v59  ;;  %v7233_v21 = vsel %vm840_vm8, %v923_v31, %v926_v29  ;;  %v912_v59 = vrot.slane %v910_v18, 1  ;;  %v7250_v31 = vsel %vm1062_vm9, %v1132_v53, %v1137_v57 }
 0x215   : > { %1494 = vrot.lane.b32.xlu1 %v7158_v40, %s6220_s21  ;;  %1492 = vrot.lane.b32.xlu0 %v7200_v54, %s6220_s21  ;;  %v1861_v20 = vsel %vm1732_vm4, %v1828_v43, %v7103_v1  ;;  %v2038_v1 = vsel %vm1670_vm2, %v6792_v16, %v1577_v14  ;;  %10610 = vst [vmem:[#allocation91_spill] sm:$0xff] %v7233_v21  ;;  %v1127_v43 = vrot.slane %v914_v61, 2  ;;  %10611 = vst [vmem:[#allocation92_spill] sm:$0xff] %v7250_v31 }
 0x216   : > { %2884 = vmatprep.mubr.bf16.mxu1 %v1861_v20  ;;  %v1674_v14 = vsel %vm1670_vm2, %v6764_v35, %v7127_v36  ;;  %v2084_v4 = vsel %vm1701_vm3, %v2038_v1, %v7078_v7  ;;  %v1956_v35 = vsel %vm1701_vm3, %v1910_v39, %v7067_v24  ;;  %v1123_v24 = vor.u32 %v1122_v25, %v1121_v46 }
 0x217   : > { %v7222_v13 = vpop.permute.xlu1 %1514  ;;  %2885 = vmatmul.mubr.bf16.gmra.mrb[4].mxu1 %v6441_v58  ;;  %v7225_v23 = vpop.permute.xlu0 %1516  ;;  %v1705_v7 = vsel %vm1701_vm3, %v1674_v14, %v7089_v38  ;;  %v1989_v37 = vsel %vm1732_vm4, %v1956_v35, %v7154_v51  ;;  %v1128_v57 = vor.u32 %v1127_v43, %v1126_v32  ;;  %v7293_v53 = vsel %vm790_vm5, 0, %v7004_v17 }
 0x218   : > { %2892 = vmatprep.mubr.bf16.mxu1 %v1864_v42  ;;  %v913_v42 = vor.u32 %v912_v59, %v908_v12  ;;  %v1737_v36 = vsel %vm1732_vm4, %v1705_v7, %v7141_v27  ;;  %v7303_v39 = vsel %vm790_vm5, %v7006_v50, 0  ;;  %v7311_v14 = vsel %vm790_vm5, 0, %v7006_v50 }
 0x219   : > { %1618 = vrot.lane.b32.xlu1 %v7200_v54, %s6219_s20  ;;  %1308 = vrot.lane.b32.xlu0 %v7233_v21, %s6220_s21  ;;  %v7281_v27 = vsel %vm1062_vm9, %v1123_v24, %v1128_v57  ;;  %v833_v35 = vsel %vm790_vm5, %v7004_v17, 0  ;;  %v1221_v7 = vrot.slane %v7303_v39, 2  ;;  %v938_v22 = vshrl.u32 %v7293_v53, 16 }
 0x21a   : > { %v7270_v11 = vsel %vm840_vm8, %v913_v42, %v916_v9  ;;  %10613 = vst [vmem:[#allocation94_spill] sm:$0xff] %v7281_v27  ;;  %v1044_v9 = vrot.slane %v7311_v14, 1  ;;  %v944_v24 = vshll.u32 %v833_v35, 16  ;;  %v1048_v57 = vrot.slane %v833_v35, 1 }
 0x21b   : > { %v1641_v10 = vpop.permute.xlu1 %1640  ;;  %v7245_v29 = vpop.permute.xlu0 %1612  ;;  %10612 = vst [vmem:[#allocation93_spill] sm:$0xff] %v7270_v11  ;;  %v1148_v55 = vrot.slane %v938_v22, 1 }
 0x21c   : > { %v2117_v20 = vsel %vm1732_vm4, %v2084_v4, %v1641_v10  ;;  %v1045_v4 = vrot.slane %v7303_v39, 1 }
 0x21d   : > { %1430 = vrot.lane.b32.xlu1 %v7233_v21, %s6219_s20  ;;  %1368 = vrot.lane.b32.xlu0 %v7250_v31, %s6221_s22 }
 0x21e   : > { %3045 = vmatprep.mubr.bf16.mxu0 %v2117_v20  ;;  %v7328_v50 = vsel %vm1017_vm7, %v1044_v9, %v1045_v4  ;;  %v1151_v4 = vshrl.u32 %v833_v35, 16 }
 0x21f   : > { %3046 = vmatmul.mubr.bf16.gmra.mrb[36].mxu0 %v1989_v37  ;;  %v7265_v18 = vpop.permute.xlu1 %1330  ;;  %2893 = vmatmul.mubr.bf16.gmra.mrb[8].mxu1 %v1737_v36  ;;  %v7267_v61 = vpop.permute.xlu0 %1328  ;;  %10614 = vst [vmem:[#allocation95_spill] sm:$0xff] %v7328_v50  ;;  %v1220_v37 = vrot.slane %v7311_v14, 2  ;;  %v940_v36 = vshll.u32 %v7293_v53, 16 }
 0x221   : > { %1306 = vrot.lane.b32.xlu1 %v7270_v11, %s6220_s21  ;;  %1556 = vrot.lane.b32.xlu0 %v7233_v21, %s6221_s22  ;;  %v1047_v21 = vrot.slane %v7293_v53, 1  ;;  %v942_v16 = vrot.slane %v940_v36, 1 }
 0x223   : > { %v7276_v51 = vpop.permute.xlu1 %1454  ;;  %v7278_v38 = vpop.permute.xlu0 %1452 }
 0x225   : > { %1366 = vrot.lane.b32.xlu1 %v7281_v27, %s6221_s22  ;;  %1588 = vrot.lane.b32.xlu0 %v7250_v31, %s6220_s21 }
 0x227   : > { %v7287_v12 = vpop.permute.xlu1 %1486  ;;  %v7289_v1 = vpop.permute.xlu0 %1484 }
 0x229   : > { %1554 = vrot.lane.b32.xlu1 %v7270_v11, %s6221_s22  ;;  %1402 = vrot.lane.b32.xlu0 %v7293_v53, %s6220_s21 }
 0x22b   : > { %v7299_v59 = vpop.permute.xlu1 %1422  ;;  %v1611_v43 = vpop.permute.xlu0 %1610 }
 0x22d   : > { %1586 = vrot.lane.b32.xlu1 %v7281_v27, %s6220_s21  ;;  %1428 = vrot.lane.b32.xlu0 %v7270_v11, %s6219_s20  ;;  %v7349_v11 = vsel %vm1193_vm6, %v1220_v37, %v1221_v7  ;;  %v1153_v37 = vrot.slane %v1151_v4, 1  ;;  %v7370_v27 = vsel %vm1017_vm7, %v1047_v21, %v1048_v57  ;;  %v1791_v21 = vsel %vm1670_vm2, %v6935_v8, %v7192_v0 }
 0x22e   : > { %10615 = vst [vmem:[#allocation96_spill] sm:$0xff] %v7349_v11  ;;  %v934_v4 = vshll.u32 %v7303_v39, 16 }
 0x22f   : > { %v7313_v32 = vpop.permute.xlu1 %1298  ;;  %v7315_v10 = vpop.permute.xlu0 %1300 }
 0x231   : > { %1654 = vrot.lane.b32.xlu1 %v7293_v53, %s6221_s22  ;;  %1528 = vrot.lane.b32.xlu0 %v7293_v53, %s6219_s20 }
 0x233   : > { %v7323_v46 = vpop.permute.xlu1 %1358  ;;  %v7325_v20 = vpop.permute.xlu0 %1360 }
 0x235   : > { %1400 = vrot.lane.b32.xlu1 %v7311_v14, %s6220_s21  ;;  %1340 = vrot.lane.b32.xlu0 %v7328_v50, %s6219_s20 }
 0x237   : > { %v1547_v42 = vpop.permute.xlu1 %1546  ;;  %v7334_v25 = vpop.permute.xlu0 %1548 }
 0x239   : > { %1526 = vrot.lane.b32.xlu1 %v7311_v14, %s6219_s20  ;;  %1464 = vrot.lane.b32.xlu0 %v7328_v50, %s6221_s22  ;;  %v1913_v50 = vsel %vm1670_vm2, %v6871_v33, %v7109_v44 }
 0x23b   : > { %v1579_v9 = vpop.permute.xlu1 %1578  ;;  %v1581_v58 = vpop.permute.xlu0 %1580 }
 0x23c   : > { %v2041_v17 = vsel %vm1670_vm2, %v6920_v48, %v1579_v9  ;;  %v1958_v9 = vsel %vm1701_vm3, %v1913_v50, %v7222_v13  ;;  %v1154_v48 = vrot.slane %v944_v24, 2  ;;  %v1149_v13 = vrot.slane %v940_v36, 2 }
 0x23d   : > { %1652 = vrot.lane.b32.xlu1 %v7311_v14, %s6221_s22  ;;  %1496 = vrot.lane.b32.xlu0 %v7349_v11, %s6220_s21  ;;  %v2086_v31 = vsel %vm1701_vm3, %v2041_v17, %v1611_v43  ;;  %v1992_v33 = vsel %vm1732_vm4, %v1958_v9, %v1547_v42  ;;  %v943_v43 = vor.u32 %v942_v16, %v938_v22  ;;  %v946_v17 = vrot.slane %v944_v24, 1 }
 0x23e   : > { %v2120_v7 = vsel %vm1732_vm4, %v2086_v31, %v7190_v26  ;;  %v1224_v26 = vrot.slane %v833_v35, 2  ;;  %v1676_v31 = vsel %vm1670_vm2, %v6747_v19, %v7129_v63  ;;  %v1788_v22 = vsel %vm1670_vm2, %v6776_v15, %v7208_v45  ;;  %v10647_v15 = vld [vmem:[#allocation86_spill] sm:$0xff] }
 0x23f   : > { %v7364_v40 = vpop.permute.xlu1 %1646  ;;  %3053 = vmatprep.mubr.bf16.mxu0 %v2120_v7  ;;  %v7366_v44 = vpop.permute.xlu0 %1394  ;;  %v1223_v50 = vrot.slane %v7293_v53, 2  ;;  %v1155_v42 = vor.u32 %v1154_v48, %v1153_v37  ;;  %v1834_v35 = vsel %vm1701_vm3, %v1791_v21, %v7299_v59  ;;  %v7392_v19 = vsel %vm840_vm8, %v943_v43, %v946_v17 }
 0x240   : > { %3054 = vmatmul.mubr.bf16.gmra.mrb[40].mxu0 %v1992_v33  ;;  %10616 = vst [vmem:[#allocation97_spill] sm:$0xff] %v7392_v19  ;;  %v1150_v63 = vor.u32 %v1149_v13, %v1148_v55  ;;  %v1707_v48 = vsel %vm1701_vm3, %v1676_v31, %v7087_v49  ;;  %v1870_v24 = vsel %vm1732_vm4, %v1834_v35, %v7276_v51  ;;  %v1142_v9 = vshrl.u32 %v7303_v39, 16 }
 0x241   : > { %1342 = vrot.lane.b32.xlu1 %v7370_v27, %s6219_s20  ;;  %1622 = vrot.lane.b32.xlu0 %v7349_v11, %s6219_s20  ;;  %v1740_v45 = vsel %vm1732_vm4, %v1707_v48, %v7143_v34  ;;  %v2044_v57 = vsel %vm1670_vm2, %v6917_v52, %v1581_v58  ;;  %v930_v34 = vshll.u32 %v7311_v14, 16  ;;  %v1916_v51 = vsel %vm1670_vm2, %v6960_v41, %v7289_v1 }
 0x242   : > { %v7416_v49 = vsel %vm1062_vm9, %v1150_v63, %v1155_v42  ;;  %v1678_v58 = vsel %vm1670_vm2, %v6894_v62, %v7313_v32  ;;  %v2088_v43 = vsel %vm1701_vm3, %v2044_v57, %v7245_v29  ;;  %v928_v13 = vshrl.u32 %v7311_v14, 16 }
 0x243   : > { %v7385_v16 = vpop.permute.xlu1 %1392  ;;  %v1421_v33 = vpop.permute.xlu0 %1420  ;;  %10618 = vst [vmem:[#allocation99_spill] sm:$0xff] %v7416_v49  ;;  %v1960_v62 = vsel %vm1701_vm3, %v1916_v51, %v7225_v23  ;;  %v1709_v1 = vsel %vm1701_vm3, %v1678_v58, %v7267_v61  ;;  %v1144_v32 = vrot.slane %v1142_v9, 1  ;;  %v1145_v31 = vrot.slane %v934_v4, 2 }
 0x244   : > { %v1832_v36 = vsel %vm1701_vm3, %v1788_v22, %v1421_v33  ;;  %v1995_v29 = vsel %vm1732_vm4, %v1960_v62, %v7334_v25  ;;  %v7449_v39 = vsel %vm1732_vm4, %v1709_v1, %v7323_v46  ;;  %v936_v33 = vrot.slane %v934_v4, 1 }
 0x245   : > { %1466 = vrot.lane.b32.xlu1 %v7370_v27, %s6221_s22  ;;  %1312 = vrot.lane.b32.xlu0 %v7392_v19, %s6220_s21  ;;  %v1867_v0 = vsel %vm1732_vm4, %v1832_v36, %v7278_v38  ;;  %v7413_v38 = vsel %vm1193_vm6, %v1223_v50, %v1224_v26  ;;  %v932_v26 = vrot.slane %v930_v34, 1  ;;  %10619 = vst [vmem:[#allocation100_spill] sm:$0xff] %v7449_v39  ;;  %v1139_v61 = vrot.slane %v928_v13, 1 }
 0x246   : > { %2900 = vmatprep.mubr.bf16.mxu1 %v1867_v0  ;;  %10617 = vst [vmem:[#allocation98_spill] sm:$0xff] %v7413_v38  ;;  %v1140_v50 = vrot.slane %v930_v34, 2  ;;  %v7466_v42 = vsel %vm790_vm5, 0, %v7014_v2  ;;  %v1146_v63 = vor.u32 %v1145_v31, %v1144_v32  ;;  %v835_v34 = vsel %vm790_vm5, %v7014_v2, 0  ;;  %v6127_v2 = vld [vmem:[%s10288_s2 + $0x180] sm:$0xff]   ;;  %v6128_v32 = vld [vmem:[%s10288_s2 + $0x188] sm:$0xff]  }
 0x247   : > { %v7404_v59 = vpop.permute.xlu1 %1518  ;;  %2901 = vmatmul.mubr.bf16.gmra.mrb[12].mxu1 %v1740_v45  ;;  %v7406_v55 = vpop.permute.xlu0 %1520  ;;  %v933_v23 = vor.u32 %v932_v26, %v928_v13  ;;  %10620 = vst [vmem:[#allocation101_spill] sm:$0xff] %v7466_v42  ;;  %v1230_v4 = vrot.slane %v835_v34, 2  ;;  %v7500_v9 = vsel %vm790_vm5, 0, %v7016_v6  ;;  %5957 = vmatprep.subr.bf16.mxu0 %v6127_v2 }
 0x248   : > { %2908 = vmatprep.mubr.bf16.mxu1 %v1870_v24  ;;  %v1141_v36 = vor.u32 %v1140_v50, %v1139_v61  ;;  %10623 = vst [vmem:[#allocation104_spill] sm:$0xff] %v7500_v9  ;;  %5958 = vmatpush3.bf16.msra.mxu0 %v6127_v2  ;;  %v10626_v2 = vmov 0  }
 0x249   : > { %1498 = vrot.lane.b32.xlu1 %v7413_v38, %s6220_s21  ;;  %1372 = vrot.lane.b32.xlu0 %v7416_v49, %s6221_s22  ;;  %v7469_v35 = vsel %vm840_vm8, %v933_v23, %v936_v33  ;;  %v1054_v23 = vrot.slane %v835_v34, 1 }
 0x24a   : > { %10621 = vst [vmem:[#allocation102_spill] sm:$0xff] %v7469_v35  ;;  %v7480_v45 = vsel %vm1062_vm9, %v1141_v36, %v1146_v63  ;;  %5959 = vmatprep.subr.bf16.mxu0 %v6128_v32  ;;  %v1053_v63 = vrot.slane %v7466_v42, 1 }
 0x24b   : > { %v1645_v7 = vpop.permute.xlu1 %1644  ;;  %v7431_v37 = vpop.permute.xlu0 %1616  ;;  %10622 = vst [vmem:[#allocation103_spill] sm:$0xff] %v7480_v45 }
 0x24c   : > { %v2123_v17 = vsel %vm1732_vm4, %v2088_v43, %v1645_v7  ;;  %v1229_v7 = vrot.slane %v7466_v42, 2  ;;  %v7508_v43 = vsel %vm790_vm5, %v7016_v6, 0  ;;  %v1050_v6 = vrot.slane %v7500_v9, 1  ;;  %5960 = vmatpush3.bf16.msra.mxu0 %v6128_v32 }
 0x24d   : > { %1624 = vrot.lane.b32.xlu1 %v7413_v38, %s6219_s20  ;;  %1560 = vrot.lane.b32.xlu0 %v7392_v19, %s6221_s22  ;;  %v1051_v26 = vrot.slane %v7508_v43, 1  ;;  %v1227_v33 = vrot.slane %v7508_v43, 2  ;;  %v964_v32 = vshll.u32 %v835_v34, 16 }
 0x24e   : > { %3061 = vmatprep.mubr.bf16.mxu0 %v2123_v17  ;;  %v7520_v62 = vsel %vm1193_vm6, %v1229_v7, %v1230_v4  ;;  %v1226_v4 = vrot.slane %v7500_v9, 2  ;;  %v960_v7 = vshll.u32 %v7466_v42, 16  ;;  %4690 = vmatprep.subr.bf16.mxu0 %v10626_v2 }
 0x24f   : > { %3062 = vmatmul.mubr.bf16.gmra.mrb[44].mxu0 %v1995_v29  ;;  %v7451_v21 = vpop.permute.xlu1 %1334  ;;  %2909 = vmatmul.mubr.bf16.gmra.mrb[16].mxu1 %v7449_v39  ;;  %v7454_v22 = vpop.permute.xlu0 %1332  ;;  %10624 = vst [vmem:[#allocation105_spill] sm:$0xff] %v7520_v62  ;;  %v7533_v31 = vsel %vm1017_vm7, %v1050_v6, %v1051_v26  ;;  %v1919_v26 = vsel %vm1670_vm2, %v6963_v28, %v7287_v12  ;;  %v958_v28 = vshrl.u32 %v7466_v42, 16 }
 0x250   : > { %10625 = vst [vmem:[#allocation106_spill] sm:$0xff] %v7533_v31 }
 0x251   : > { %1434 = vrot.lane.b32.xlu1 %v7392_v19, %s6219_s20  ;;  %1592 = vrot.lane.b32.xlu0 %v7416_v49, %s6220_s21  ;;  %v1962_v19 = vsel %vm1701_vm3, %v1919_v26, %v7404_v59  ;;  %v962_v59 = vrot.slane %v960_v7, 1 }
 0x253   : > { %v7460_v46 = vpop.permute.xlu1 %1458  ;;  %v7462_v25 = vpop.permute.xlu0 %1456 }
 0x255   : > { %1310 = vrot.lane.b32.xlu1 %v7469_v35, %s6220_s21  ;;  %1406 = vrot.lane.b32.xlu0 %v7466_v42, %s6220_s21 }
 0x257   : > { %v7475_v0 = vpop.permute.xlu1 %1490  ;;  %v7477_v48 = vpop.permute.xlu0 %1488 }
 0x259   : > { %1370 = vrot.lane.b32.xlu1 %v7480_v45, %s6221_s22  ;;  %1432 = vrot.lane.b32.xlu0 %v7469_v35, %s6219_s20 }
 0x25b   : > { %v7486_v24 = vpop.permute.xlu1 %1426  ;;  %v1615_v57 = vpop.permute.xlu0 %1614 }
 0x25d   : > { %1558 = vrot.lane.b32.xlu1 %v7469_v35, %s6221_s22  ;;  %1532 = vrot.lane.b32.xlu0 %v7466_v42, %s6219_s20 }
 0x25f   : > { %v7494_v51 = vpop.permute.xlu1 %1302  ;;  %v7496_v58 = vpop.permute.xlu0 %1304 }
 0x261   : > { %1590 = vrot.lane.b32.xlu1 %v7480_v45, %s6220_s21  ;;  %1656 = vrot.lane.b32.xlu0 %v7500_v9, %s6221_s22 }
 0x263   : > { %v7514_v17 = vpop.permute.xlu1 %1362  ;;  %v7516_v13 = vpop.permute.xlu0 %1364 }
 0x265   : > { %1658 = vrot.lane.b32.xlu1 %v7466_v42, %s6221_s22  ;;  %1628 = vrot.lane.b32.xlu0 %v7520_v62, %s6219_s20 }
 0x267   : > { %v1551_v1 = vpop.permute.xlu1 %1550  ;;  %v7527_v29 = vpop.permute.xlu0 %1552 }
 0x268   : > { %v1998_v49 = vsel %vm1732_vm4, %v1962_v19, %v1551_v1  ;;  %v1680_v19 = vsel %vm1670_vm2, %v6887_v47, %v7315_v10  ;;  %v1797_v1 = vsel %vm1670_vm2, %v7059_v56, %v7366_v44  ;;  %v963_v47 = vor.u32 %v962_v59, %v958_v28 }
 0x269   : > { %1404 = vrot.lane.b32.xlu1 %v7500_v9, %s6220_s21  ;;  %1344 = vrot.lane.b32.xlu0 %v7533_v31, %s6219_s20  ;;  %v1838_v26 = vsel %vm1701_vm3, %v1797_v1, %v7486_v24  ;;  %v950_v10 = vshll.u32 %v7500_v9, 16  ;;  %v1160_v24 = vshrl.u32 %v7508_v43, 16 }
 0x26b   : > { %v1583_v61 = vpop.permute.xlu1 %1582  ;;  %v1585_v50 = vpop.permute.xlu0 %1584 }
 0x26c   : > { %v2047_v36 = vsel %vm1670_vm2, %v7036_v5, %v1583_v61  ;;  %v1169_v61 = vshrl.u32 %v835_v34, 16  ;;  %v7568_v34 = vsel %vm1193_vm6, %v1226_v4, %v1227_v33  ;;  %v1167_v4 = vrot.slane %v960_v7, 2 }
 0x26d   : > { %1530 = vrot.lane.b32.xlu1 %v7500_v9, %s6219_s20  ;;  %1468 = vrot.lane.b32.xlu0 %v7533_v31, %s6221_s22  ;;  %v2090_v6 = vsel %vm1701_vm3, %v2047_v36, %v1615_v57  ;;  %v7565_v57 = vsel %vm1017_vm7, %v1053_v63, %v1054_v23  ;;  %10628 = vst [vmem:[#allocation108_spill] sm:$0xff] %v7568_v34  ;;  %v1166_v63 = vrot.slane %v958_v28, 1  ;;  %v954_v7 = vshll.u32 %v7508_v43, 16 }
 0x26e   : > { %v2126_v35 = vsel %vm1732_vm4, %v2090_v6, %v7364_v40  ;;  %10627 = vst [vmem:[#allocation107_spill] sm:$0xff] %v7565_v57  ;;  %v1171_v40 = vrot.slane %v1169_v61, 1  ;;  %v1794_v23 = vsel %vm1670_vm2, %v6907_v30, %v7385_v16  ;;  %v1711_v16 = vsel %vm1701_vm3, %v1680_v19, %v7265_v18  ;;  %v10630_v19 = vld [vmem:[#allocation80_spill] sm:$0xff] }
 0x26f   : > { %v7558_v39 = vpop.permute.xlu1 %1650  ;;  %3069 = vmatprep.mubr.bf16.mxu0 %v2126_v35  ;;  %v7560_v12 = vpop.permute.xlu0 %1398  ;;  %v1172_v35 = vrot.slane %v964_v32, 2  ;;  %v7600_v28 = vsel %vm1732_vm4, %v1711_v16, %v7325_v20  ;;  %v948_v18 = vshrl.u32 %v7500_v9, 16  ;;  %v2050_v1 = vsel %vm1670_vm2, %v10630_v19, %v1585_v50 }
 0x270   : > { %3070 = vmatmul.mubr.bf16.gmra.mrb[48].mxu0 %v1998_v49  ;;  %v966_v49 = vrot.slane %v964_v32, 1  ;;  %10629 = vst [vmem:[#allocation109_spill] sm:$0xff] %v7600_v28  ;;  %v1168_v43 = vor.u32 %v1167_v4, %v1166_v63  ;;  %v2092_v63 = vsel %vm1701_vm3, %v2050_v1, %v7431_v37  ;;  %v956_v4 = vrot.slane %v954_v7, 1 }
 0x271   : > { %1346 = vrot.lane.b32.xlu1 %v7565_v57, %s6219_s20  ;;  %1500 = vrot.lane.b32.xlu0 %v7568_v34, %s6220_s21  ;;  %v1173_v59 = vor.u32 %v1172_v35, %v1171_v40  ;;  %v10633_v35 = vld [vmem:[#allocation76_spill] sm:$0xff] }
 0x272   : > { %v7614_v20 = vsel %vm840_vm8, %v963_v47, %v966_v49  ;;  %v1682_v50 = vsel %vm1670_vm2, %v10633_v35, %v7494_v51  ;;  %v1157_v47 = vrot.slane %v948_v18, 1 }
 0x273   : > { %v7583_v33 = vpop.permute.xlu1 %1396  ;;  %v1425_v36 = vpop.permute.xlu0 %1424  ;;  %10631 = vst [vmem:[#allocation80_spill] sm:$0xff] %v7614_v20  ;;  %v1713_v37 = vsel %vm1701_vm3, %v1682_v50, %v7454_v22 }
 0x274   : > { %v1836_v6 = vsel %vm1701_vm3, %v1794_v23, %v1425_v36  ;;  %v952_v23 = vrot.slane %v950_v10, 1  ;;  %v1163_v36 = vrot.slane %v954_v7, 2 }
 0x275   : > { %1470 = vrot.lane.b32.xlu1 %v7565_v57, %s6221_s22  ;;  %1626 = vrot.lane.b32.xlu0 %v7568_v34, %s6219_s20  ;;  %v1873_v44 = vsel %vm1732_vm4, %v1836_v6, %v7462_v25  ;;  %v1876_v25 = vsel %vm1732_vm4, %v1838_v26, %v7460_v46  ;;  %v10632_v46 = vld [vmem:[#allocation85_spill] sm:$0xff]  ;;  %v1162_v26 = vrot.slane %v1160_v24, 1  ;;  %v7646_v24 = vsel %vm1732_vm4, %v1713_v37, %v7514_v17 }
 0x276   : > { %2916 = vmatprep.mubr.bf16.mxu1 %v1873_v44  ;;  %v1922_v40 = vsel %vm1670_vm2, %v10632_v46, %v7477_v48  ;;  %v7631_v44 = vsel %vm1062_vm9, %v1168_v43, %v1173_v59  ;;  %v1158_v48 = vrot.slane %v950_v10, 2  ;;  %10635 = vst [vmem:[#allocation110_spill] sm:$0xff] %v7646_v24  ;;  %v10645_v46 = vld [vmem:[#allocation75_spill] sm:$0xff]  ;;  %v1925_v34 = vsel %vm1670_vm2, %v10647_v15, %v7475_v0 }
 0x277   : > { %v7603_v32 = vpop.permute.xlu1 %1522  ;;  %2917 = vmatmul.mubr.bf16.gmra.mrb[20].mxu1 %v7600_v28  ;;  %v7606_v61 = vpop.permute.xlu0 %1524  ;;  %10634 = vst [vmem:[#allocation76_spill] sm:$0xff] %v7631_v44  ;;  %v1964_v51 = vsel %vm1701_vm3, %v1922_v40, %v7406_v55  ;;  %v1164_v22 = vor.u32 %v1163_v36, %v1162_v26  ;;  %v10638_v36 = vld [vmem:[#allocation78_spill] sm:$0xff]  ;;  %v1684_v42 = vsel %vm1670_vm2, %v10645_v46, %v7496_v58 }
 0x278   : > { %2924 = vmatprep.mubr.bf16.mxu1 %v1876_v25  ;;  %v953_v25 = vor.u32 %v952_v23, %v948_v18  ;;  %v2001_v7 = vsel %vm1732_vm4, %v1964_v51, %v7527_v29  ;;  %v1159_v18 = vor.u32 %v1158_v48, %v1157_v47  ;;  %v7675_v40 = vsel %vm790_vm5, 0, %v10638_v36 }
 0x279   : > { %1502 = vrot.lane.b32.xlu1 %v7520_v62, %s6220_s21  ;;  %1316 = vrot.lane.b32.xlu0 %v7614_v20, %s6220_s21  ;;  %10639 = vst [vmem:[#allocation78_spill] sm:$0xff] %v7675_v40  ;;  %v1235_v51 = vrot.slane %v7675_v40, 2 }
 0x27a   : > { %v7654_v55 = vsel %vm840_vm8, %v953_v25, %v956_v4  ;;  %v7663_v1 = vsel %vm1062_vm9, %v1159_v18, %v1164_v22  ;;  %v10640_v25 = vld [vmem:[#allocation79_spill] sm:$0xff] }
 0x27b   : > { %v1649_v49 = vpop.permute.xlu1 %1648  ;;  %v7626_v6 = vpop.permute.xlu0 %1620  ;;  %10636 = vst [vmem:[#allocation111_spill] sm:$0xff] %v7654_v55  ;;  %10637 = vst [vmem:[#allocation112_spill] sm:$0xff] %v7663_v1  ;;  %v7701_v48 = vsel %vm790_vm5, 0, %v10640_v25  ;;  %v7706_v37 = vsel %vm790_vm5, %v10640_v25, 0 }
 0x27c   : > { %v2129_v16 = vsel %vm1732_vm4, %v2092_v63, %v1649_v49  ;;  %v837_v63 = vsel %vm790_vm5, %v10638_v36, 0  ;;  %10641 = vst [vmem:[#allocation79_spill] sm:$0xff] %v7701_v48  ;;  %v1057_v36 = vrot.slane %v7706_v37, 1  ;;  %v1056_v25 = vrot.slane %v7701_v48, 1 }
 0x27d   : > { %1438 = vrot.lane.b32.xlu1 %v7614_v20, %s6219_s20  ;;  %1376 = vrot.lane.b32.xlu0 %v7631_v44, %s6221_s22  ;;  %v984_v57 = vshll.u32 %v837_v63, 16  ;;  %v1233_v31 = vrot.slane %v7706_v37, 2 }
 0x27e   : > { %3077 = vmatprep.mubr.bf16.mxu0 %v2129_v16  ;;  %v1236_v16 = vrot.slane %v837_v63, 2 }
 0x27f   : > { %3078 = vmatmul.mubr.bf16.gmra.mrb[52].mxu0 %v2001_v7  ;;  %v7648_v10 = vpop.permute.xlu1 %1338  ;;  %2925 = vmatmul.mubr.bf16.gmra.mrb[24].mxu1 %v7646_v24  ;;  %v7651_v59 = vpop.permute.xlu0 %1336  ;;  %v1060_v7 = vrot.slane %v837_v63, 1 }
 0x281   : > { %1314 = vrot.lane.b32.xlu1 %v7654_v55, %s6220_s21  ;;  %1564 = vrot.lane.b32.xlu0 %v7614_v20, %s6221_s22  ;;  %v7718_v20 = vsel %vm1193_vm6, %v1235_v51, %v1236_v16  ;;  %v7733_v16 = vsel %vm1017_vm7, %v1056_v25, %v1057_v36  ;;  %v1187_v51 = vshrl.u32 %v837_v63, 16  ;;  %v10646_v36 = vld [vmem:[#allocation77_spill] sm:$0xff]  ;;  %v978_v63 = vshrl.u32 %v7675_v40, 16 }
 0x282   : > { %10642 = vst [vmem:[#allocation113_spill] sm:$0xff] %v7718_v20  ;;  %10644 = vst [vmem:[#allocation115_spill] sm:$0xff] %v7733_v16  ;;  %v1800_v25 = vsel %vm1670_vm2, %v10646_v36, %v7583_v33 }
 0x283   : > { %v7660_v17 = vpop.permute.xlu1 %1462  ;;  %v1461_v29 = vpop.permute.xlu0 %1460  ;;  %v1189_v38 = vrot.slane %v1187_v51, 1 }
 0x285   : > { %1374 = vrot.lane.b32.xlu1 %v7663_v1, %s6221_s22  ;;  %1596 = vrot.lane.b32.xlu0 %v7631_v44, %s6220_s21  ;;  %v980_v44 = vshll.u32 %v7675_v40, 16 }
 0x287   : > { %v7669_v43 = vpop.permute.xlu1 %1494  ;;  %v7671_v23 = vpop.permute.xlu0 %1492  ;;  %v982_v9 = vrot.slane %v980_v44, 1 }
 0x289   : > { %1562 = vrot.lane.b32.xlu1 %v7654_v55, %s6221_s22  ;;  %1410 = vrot.lane.b32.xlu0 %v7675_v40, %s6220_s21 }
 0x28b   : > { %v1619_v35 = vpop.permute.xlu1 %1618  ;;  %v7681_v50 = vpop.permute.xlu0 %1308 }
 0x28d   : > { %1594 = vrot.lane.b32.xlu1 %v7663_v1, %s6220_s21  ;;  %1436 = vrot.lane.b32.xlu0 %v7654_v55, %s6219_s20  ;;  %v1059_v55 = vrot.slane %v7675_v40, 1 }
 0x28f   : > { %v1431_v26 = vpop.permute.xlu1 %1430  ;;  %v7687_v49 = vpop.permute.xlu0 %1368  ;;  %v7730_v1 = vsel %vm1017_vm7, %v1059_v55, %v1060_v7  ;;  %v1232_v55 = vrot.slane %v7701_v48, 2  ;;  %v1803_v7 = vsel %vm1670_vm2, %v7200_v54, %v7560_v12 }
 0x290   : > { %10643 = vst [vmem:[#allocation114_spill] sm:$0xff] %v7730_v1  ;;  %v1842_v58 = vsel %vm1701_vm3, %v1803_v7, %v1431_v26  ;;  %v1190_v26 = vrot.slane %v984_v57, 2 }
 0x291   : > { %1662 = vrot.lane.b32.xlu1 %v7675_v40, %s6221_s22  ;;  %1536 = vrot.lane.b32.xlu0 %v7675_v40, %s6219_s20  ;;  %v1715_v40 = vsel %vm1701_vm3, %v1684_v42, %v7451_v21  ;;  %v1882_v42 = vsel %vm1732_vm4, %v1842_v58, %v7660_v17 }
 0x293   : > { %v7695_v4 = vpop.permute.xlu1 %1306  ;;  %v7697_v47 = vpop.permute.xlu0 %1556 }
 0x295   : > { %1408 = vrot.lane.b32.xlu1 %v7701_v48, %s6220_s21  ;;  %1660 = vrot.lane.b32.xlu0 %v7701_v48, %s6221_s22 }
 0x297   : > { %v7712_v18 = vpop.permute.xlu1 %1366  ;;  %v7714_v22 = vpop.permute.xlu0 %1588 }
 0x299   : > { %1534 = vrot.lane.b32.xlu1 %v7701_v48, %s6219_s20  ;;  %1632 = vrot.lane.b32.xlu0 %v7718_v20, %s6219_s20 }
 0x29b   : > { %v1555_v24 = vpop.permute.xlu1 %1554  ;;  %v7726_v28 = vpop.permute.xlu0 %1402 }
 0x29d   : > { %1350 = vrot.lane.b32.xlu1 %v7730_v1, %s6219_s20  ;;  %1348 = vrot.lane.b32.xlu0 %v7733_v16, %s6219_s20 }
 0x29f   : > { %v1587_v41 = vpop.permute.xlu1 %1586  ;;  %v1429_v62 = vpop.permute.xlu0 %1428 }
 0x2a0   : > { %v2053_v46 = vsel %vm1670_vm2, %v7173_v3, %v1587_v41  ;;  %v1840_v12 = vsel %vm1701_vm3, %v1800_v25, %v1429_v62  ;;  %v1966_v41 = vsel %vm1701_vm3, %v1925_v34, %v7603_v32  ;;  %v7770_v62 = vsel %vm1732_vm4, %v1715_v40, %v7516_v13 }
 0x2a1   : > { %1474 = vrot.lane.b32.xlu1 %v7730_v1, %s6221_s22  ;;  %1472 = vrot.lane.b32.xlu0 %v7733_v16, %s6221_s22  ;;  %v1879_v33 = vsel %vm1732_vm4, %v1840_v12, %v1461_v29  ;;  %v2094_v0 = vsel %vm1701_vm3, %v2053_v46, %v1619_v35  ;;  %10648 = vst [vmem:[#allocation75_spill] sm:$0xff] %v7770_v62  ;;  %v986_v13 = vrot.slane %v984_v57, 1  ;;  %v1185_v40 = vrot.slane %v980_v44, 2 }
 0x2a2   : > { %2932 = vmatprep.mubr.bf16.mxu1 %v1879_v33  ;;  %v2132_v51 = vsel %vm1732_vm4, %v2094_v0, %v7558_v39  ;;  %v2004_v34 = vsel %vm1732_vm4, %v1966_v41, %v1555_v24  ;;  %v7783_v32 = vsel %vm1193_vm6, %v1232_v55, %v1233_v31  ;;  %v983_v29 = vor.u32 %v982_v9, %v978_v63 }
 0x2a3   : > { %v7774_v7 = vpop.permute.xlu1 %1654  ;;  %2933 = vmatmul.mubr.bf16.gmra.mrb[28].mxu1 %v7770_v62  ;;  %3085 = vmatprep.mubr.bf16.mxu0 %v2132_v51  ;;  %v7777_v21 = vpop.permute.xlu0 %1528  ;;  %10649 = vst [vmem:[#allocation77_spill] sm:$0xff] %v7783_v32  ;;  %v1184_v39 = vrot.slane %v978_v63, 1  ;;  %v970_v35 = vshll.u32 %v7701_v48, 16  ;;  %v1686_v24 = vsel %vm1670_vm2, %v7133_v60, %v7695_v4  ;;  %v974_v31 = vshll.u32 %v7706_v37, 16 }
 0x2a4   : > { %2940 = vmatprep.mubr.bf16.mxu1 %v1882_v42  ;;  %3086 = vmatmul.mubr.bf16.gmra.mrb[56].mxu0 %v2004_v34  ;;  %v1178_v57 = vshrl.u32 %v7706_v37, 16  ;;  %v968_v44 = vshrl.u32 %v7701_v48, 16  ;;  %v7801_v55 = vsel %vm840_vm8, %v983_v29, %v986_v13  ;;  %v1191_v63 = vor.u32 %v1190_v26, %v1189_v38  ;;  %v10652_v26 = vld [vmem:[#allocation89_spill] sm:$0xff]  ;;  %v10654_v42 = vld [vmem:[#allocation94_spill] sm:$0xff] }
 0x2a5   : > { %1506 = vrot.lane.b32.xlu1 %v7718_v20, %s6220_s21  ;;  %1504 = vrot.lane.b32.xlu0 %v7783_v32, %s6220_s21  ;;  %10650 = vst [vmem:[#allocation116_spill] sm:$0xff] %v7801_v55  ;;  %v1186_v25 = vor.u32 %v1185_v40, %v1184_v39  ;;  %v972_v58 = vrot.slane %v970_v35, 1  ;;  %v1717_v60 = vsel %vm1701_vm3, %v1686_v24, %v7651_v59  ;;  %v1181_v46 = vrot.slane %v974_v31, 2 }
 0x2a6   : > { %v7811_v4 = vsel %vm1732_vm4, %v1717_v60, %v7712_v18  ;;  %v1180_v37 = vrot.slane %v1178_v57, 1  ;;  %v976_v33 = vrot.slane %v974_v31, 1  ;;  %v1175_v0 = vrot.slane %v968_v44, 1 }
 0x2a7   : > { %v7795_v17 = vpop.permute.xlu1 %1400  ;;  %v7797_v9 = vpop.permute.xlu0 %1340  ;;  %10651 = vst [vmem:[#allocation117_spill] sm:$0xff] %v7811_v4  ;;  %v2056_v41 = vsel %vm1670_vm2, %v10652_v26, %v7714_v22  ;;  %v7822_v59 = vsel %vm1062_vm9, %v1186_v25, %v1191_v63  ;;  %v973_v51 = vor.u32 %v972_v58, %v968_v44  ;;  %v1176_v18 = vrot.slane %v970_v35, 2  ;;  %v10660_v58 = vld [vmem:[#allocation81_spill] sm:$0xff] }
 0x2a8   : > { %10653 = vst [vmem:[#allocation89_spill] sm:$0xff] %v7822_v59  ;;  %v1928_v34 = vsel %vm1670_vm2, %v10654_v42, %v7671_v23  ;;  %v2096_v22 = vsel %vm1701_vm3, %v2056_v41, %v7626_v6  ;;  %v1182_v24 = vor.u32 %v1181_v46, %v1180_v37  ;;  %v7872_v60 = vsel %vm790_vm5, 0, %v10660_v58  ;;  %v10662_v37 = vld [vmem:[#allocation82_spill] sm:$0xff] }
 0x2a9   : > { %1630 = vrot.lane.b32.xlu1 %v7783_v32, %s6219_s20  ;;  %1320 = vrot.lane.b32.xlu0 %v7801_v55, %s6220_s21  ;;  %v7836_v39 = vsel %vm840_vm8, %v973_v51, %v976_v33  ;;  %v1177_v35 = vor.u32 %v1176_v18, %v1175_v0  ;;  %v1968_v23 = vsel %vm1701_vm3, %v1928_v34, %v7606_v61  ;;  %v838_v46 = vsel %vm790_vm5, %v10662_v37, 0 }
 0x2aa   : > { %10655 = vst [vmem:[#allocation118_spill] sm:$0xff] %v7836_v39  ;;  %v2007_v6 = vsel %vm1732_vm4, %v1968_v23, %v7697_v47  ;;  %10661 = vst [vmem:[#allocation81_spill] sm:$0xff] %v7872_v60  ;;  %v7882_v33 = vsel %vm790_vm5, 0, %v10662_v37  ;;  %v7890_v51 = vsel %vm790_vm5, %v10660_v58, 0  ;;  %v1251_v18 = vrot.slane %v838_v46, 1 }
 0x2ab   : > { %v7813_v12 = vpop.permute.xlu1 %1526  ;;  %2941 = vmatmul.mubr.bf16.gmra.mrb[32].mxu1 %v7811_v4  ;;  %v7816_v38 = vpop.permute.xlu0 %1464  ;;  %v7852_v44 = vsel %vm1062_vm9, %v1177_v35, %v1182_v24  ;;  %10663 = vst [vmem:[#allocation82_spill] sm:$0xff] %v7882_v33  ;;  %10664 = vst [vmem:[#allocation123_spill] sm:$0xff] %v7890_v51  ;;  %v1250_v34 = vrot.slane %v7882_v33, 1  ;;  %v1240_v58 = vshll.u32 %v7882_v33, 16  ;;  %v1267_v37 = vshll.u32 %v7872_v60, 16 }
 0x2ac   : > { %10657 = vst [vmem:[#allocation120_spill] sm:$0xff] %v7852_v44  ;;  %v1256_v4 = vshrl.u32 %v838_v46, 16  ;;  %v1289_v62 = vrot.slane %v7872_v60, 2 }
 0x2ad   : > { %1442 = vrot.lane.b32.xlu1 %v7801_v55, %s6219_s20  ;;  %1380 = vrot.lane.b32.xlu0 %v7822_v59, %s6221_s22  ;;  %v7902_v23 = vsel %vm1017_vm7, %v1250_v34, %v1251_v18  ;;  %v1238_v18 = vshrl.u32 %v7882_v33, 16  ;;  %v1269_v1 = vrot.slane %v1267_v37, 1  ;;  %v1254_v20 = vrot.slane %v1240_v58, 2 }
 0x2ae   : > { %10665 = vst [vmem:[#allocation124_spill] sm:$0xff] %v7902_v23  ;;  %v1258_v16 = vrot.slane %v1256_v4, 1  ;;  %v1809_v4 = vsel %vm1670_vm2, %v7349_v11, %v7726_v28 }
 0x2af   : > { %v1653_v13 = vpop.permute.xlu1 %1652  ;;  %v7831_v29 = vpop.permute.xlu0 %1496 }
 0x2b0   : > { %v2135_v40 = vsel %vm1732_vm4, %v2096_v22, %v1653_v13  ;;  %v1271_v13 = vshll.u32 %v7890_v51, 16  ;;  %v1283_v22 = vshrl.u32 %v7890_v51, 16 }
 0x2b1   : > { %1318 = vrot.lane.b32.xlu1 %v7836_v39, %s6220_s21  ;;  %1568 = vrot.lane.b32.xlu0 %v7801_v55, %s6221_s22  ;;  %v1290_v55 = vrot.slane %v7890_v51, 2 }
 0x2b2   : > { %3093 = vmatprep.mubr.bf16.mxu0 %v2135_v40  ;;  %v1263_v40 = vrot.slane %v838_v46, 2  ;;  %v1285_v34 = vrot.slane %v1283_v22, 1  ;;  %v1286_v15 = vrot.slane %v1271_v13, 2 }
 0x2b3   : > { %3094 = vmatmul.mubr.bf16.gmra.mrb[60].mxu0 %v2007_v6  ;;  %v7847_v31 = vpop.permute.xlu1 %1342  ;;  %v7849_v57 = vpop.permute.xlu0 %1622  ;;  %v1262_v6 = vrot.slane %v7882_v33, 2  ;;  %v7925_v22 = vsel %vm1193_vm6, %v1289_v62, %v1290_v55  ;;  %v1281_v55 = vrot.slane %v1267_v37, 2  ;;  %v10676_v37 = vld [vmem:[#allocation92_spill] sm:$0xff] }
 0x2b4   : > { %10656 = vst [vmem:[#allocation119_spill] sm:$0xff] %v7847_v31  ;;  %10668 = vst [vmem:[#allocation127_spill] sm:$0xff] %v7925_v22 }
 0x2b5   : > { %1378 = vrot.lane.b32.xlu1 %v7852_v44, %s6221_s22  ;;  %1600 = vrot.lane.b32.xlu0 %v7822_v59, %s6220_s21  ;;  %v7918_v51 = vsel %vm1193_vm6, %v1262_v6, %v1263_v40  ;;  %v1273_v40 = vrot.slane %v1271_v13, 1  ;;  %v1253_v6 = vrot.slane %v1238_v18, 1 }
 0x2b6   : > { %10667 = vst [vmem:[#allocation126_spill] sm:$0xff] %v7918_v51 }
 0x2b7   : > { %v7858_v25 = vpop.permute.xlu1 %1466  ;;  %v7860_v61 = vpop.permute.xlu0 %1312 }
 0x2b9   : > { %1566 = vrot.lane.b32.xlu1 %v7836_v39, %s6221_s22  ;;  %1440 = vrot.lane.b32.xlu0 %v7836_v39, %s6219_s20  ;;  %v1244_v39 = vshll.u32 %v838_v46, 16  ;;  %v1242_v46 = vrot.slane %v1240_v58, 1 }
 0x2bb   : > { %v7866_v47 = vpop.permute.xlu1 %1498  ;;  %v7868_v63 = vpop.permute.xlu0 %1372 }
 0x2bc   : > { %10658 = vst [vmem:[#allocation121_spill] sm:$0xff] %v7866_v47  ;;  %10659 = vst [vmem:[#allocation122_spill] sm:$0xff] %v7868_v63  ;;  %v1259_v47 = vrot.slane %v1244_v39, 2 }
 0x2bd   : > { %1598 = vrot.lane.b32.xlu1 %v7852_v44, %s6220_s21  ;;  %1540 = vrot.lane.b32.xlu0 %v7872_v60, %s6219_s20  ;;  %v1265_v44 = vshrl.u32 %v7872_v60, 16 }
 0x2bf   : > { %v7884_v0 = vpop.permute.xlu1 %1624  ;;  %v7886_v41 = vpop.permute.xlu0 %1560  ;;  %v1280_v62 = vrot.slane %v1265_v44, 1 }
 0x2c1   : > { %1666 = vrot.lane.b32.xlu1 %v7872_v60, %s6221_s22  ;;  %1664 = vrot.lane.b32.xlu0 %v7882_v33, %s6221_s22  ;;  %v10669_v60 = vld [vmem:[#allocation87_spill] sm:$0xff] }
 0x2c2   : > { %v1688_v48 = vsel %vm1670_vm2, %v10669_v60, %v7681_v50  ;;  %v1243_v50 = vor.u32 %v1242_v46, %v1238_v18  ;;  %v1270_v60 = vor.u32 %v1269_v1, %v1265_v44  ;;  %v1255_v44 = vor.u32 %v1254_v20, %v1253_v6  ;;  %v10674_v20 = vld [vmem:[#allocation25_spill] sm:$0xff] }
 0x2c3   : > { %v1435_v35 = vpop.permute.xlu1 %1434  ;;  %v7899_v24 = vpop.permute.xlu0 %1592  ;;  %v1931_v18 = vsel %vm1670_vm2, %v10676_v37, %v7669_v43 }
 0x2c4   : > { %v1970_v6 = vsel %vm1701_vm3, %v1931_v18, %v7813_v12  ;;  %v3624_v12 = vshll.u32 %v10674_v20, 16 }
 0x2c5   : > { %1412 = vrot.lane.b32.xlu1 %v7882_v33, %s6220_s21  ;;  %1476 = vrot.lane.b32.xlu0 %v7902_v23, %s6221_s22  ;;  %v1246_v23 = vrot.slane %v1244_v39, 1  ;;  %v1846_v39 = vsel %vm1701_vm3, %v1809_v4, %v1435_v35  ;;  %v1260_v35 = vor.u32 %v1259_v47, %v1258_v16  ;;  %v3621_v16 = vshrl.u32 %v10674_v20, 16 }
 0x2c7   : > { %v1311_v42 = vpop.permute.xlu1 %1310  ;;  %v7914_v59 = vpop.permute.xlu0 %1406  ;;  %v7975_v46 = vsel %vm1062_vm9, %v1255_v44, %v1260_v35 }
 0x2c8   : > { %10666 = vst [vmem:[#allocation125_spill] sm:$0xff] %v7914_v59  ;;  %10678 = vst [vmem:[#allocation25_spill] sm:$0xff] %v7975_v46 }
 0x2c9   : > { %1538 = vrot.lane.b32.xlu1 %v7882_v33, %s6219_s20  ;;  %1508 = vrot.lane.b32.xlu0 %v7918_v51, %s6220_s21  ;;  %v10670_v33 = vld [vmem:[#allocation88_spill] sm:$0xff] }
 0x2ca   : > { %v1806_v32 = vsel %vm1670_vm2, %v10670_v33, %v7795_v17  ;;  %v1719_v17 = vsel %vm1701_vm3, %v1688_v48, %v7648_v10  ;;  %v7959_v10 = vsel %vm840_vm8, %v1270_v60, %v1273_v40  ;;  %v1282_v48 = vor.u32 %v1281_v55, %v1280_v62  ;;  %v10681_v60 = vld [vmem:[#allocation28_spill] sm:$0xff] }
 0x2cb   : > { %v1371_v63 = vpop.permute.xlu1 %1370  ;;  %v1433_v31 = vpop.permute.xlu0 %1432  ;;  %v7948_v13 = vsel %vm1732_vm4, %v1719_v17, %v7687_v49  ;;  %10673 = vst [vmem:[#allocation129_spill] sm:$0xff] %v7959_v10  ;;  %v1287_v49 = vor.u32 %v1286_v15, %v1285_v34  ;;  %v10677_v15 = vld [vmem:[#allocation95_spill] sm:$0xff]  ;;  %v1934_v17 = vsel %vm1670_vm2, %v7480_v45, %v7831_v29  ;;  %v3631_v20 = vshll.u32 %v10681_v60, 16 }
 0x2cc   : > { %v1844_v59 = vsel %vm1701_vm3, %v1806_v32, %v1433_v31  ;;  %10671 = vst [vmem:[#allocation87_spill] sm:$0xff] %v7948_v13  ;;  %v1888_v31 = vsel %vm1732_vm4, %v1846_v39, %v7858_v25  ;;  %v1972_v35 = vsel %vm1701_vm3, %v1934_v17, %v7777_v21  ;;  %v10684_v21 = vld [vmem:[#allocation32_spill] sm:$0xff]  ;;  %v10689_v17 = vld [vmem:[#allocation31_spill] sm:$0xff] }
 0x2cd   : > { %1636 = vrot.lane.b32.xlu1 %v7925_v22, %s6219_s20  ;;  %1634 = vrot.lane.b32.xlu0 %v7918_v51, %s6219_s20  ;;  %v1885_v28 = vsel %vm1732_vm4, %v1844_v59, %v7816_v38  ;;  %v7956_v38 = vsel %vm840_vm8, %v1243_v50, %v1246_v23  ;;  %v1690_v59 = vsel %vm1670_vm2, %v7311_v14, %v1311_v42  ;;  %v10675_v23 = vld [vmem:[#allocation20_spill] sm:$0xff]  ;;  %v3623_v50 = vrot.slane %v3621_v16, 7 }
 0x2ce   : > { %2948 = vmatprep.mubr.bf16.mxu1 %v1885_v28  ;;  %10672 = vst [vmem:[#allocation128_spill] sm:$0xff] %v7956_v38  ;;  %v3614_v58 = vshrl.u32 %v10675_v23, 16  ;;  %v7978_v40 = vsel %vm1062_vm9, %v1282_v48, %v1287_v49  ;;  %v2062_v14 = vsel %vm1670_vm2, %v7370_v27, %v7899_v24  ;;  %v1721_v43 = vsel %vm1701_vm3, %v1690_v59, %v7797_v9  ;;  %v10682_v16 = vld [vmem:[#allocation64_spill] sm:$0xff] }
 0x2cf   : > { %v1559_v32 = vpop.permute.xlu1 %1558  ;;  %2949 = vmatmul.mubr.bf16.gmra.mrb[36].mxu1 %v7948_v13  ;;  %v7951_v1 = vpop.permute.xlu0 %1532  ;;  %10679 = vst [vmem:[#allocation20_spill] sm:$0xff] %v7978_v40  ;;  %v7994_v4 = vsel %vm1732_vm4, %v1721_v43, %v1371_v63  ;;  %v3617_v62 = vshll.u32 %v10675_v23, 16  ;;  %v2100_v63 = vsel %vm1701_vm3, %v2062_v14, %v7884_v0  ;;  %v3628_v28 = vshrl.u32 %v10681_v60, 16 }
 0x2d0   : > { %2956 = vmatprep.mubr.bf16.mxu1 %v1888_v31  ;;  %10680 = vst [vmem:[#allocation95_spill] sm:$0xff] %v7994_v4  ;;  %v3616_v39 = vrot.slane %v3614_v58, 7  ;;  %v3626_v44 = vor.u32 %v3624_v12, %v3623_v50  ;;  %v2013_v29 = vsel %vm1732_vm4, %v1972_v35, %v7886_v41  ;;  %v3638_v12 = vshll.u32 %v10684_v21, 16 }
 0x2d1   : > { %1570 = vrot.lane.b32.xlu1 %v7956_v38, %s6221_s22  ;;  %1572 = vrot.lane.b32.xlu0 %v7959_v10, %s6221_s22  ;;  %v3630_v59 = vrot.slane %v3628_v28, 7 }
 0x2d2   : > { %v3619_v0 = vor.u32 %v3617_v62, %v3616_v39 }
 0x2d3   : > { %v1591_v25 = vpop.permute.xlu1 %1590  ;;  %v1657_v47 = vpop.permute.xlu0 %1656  ;;  %v3633_v18 = vor.u32 %v3631_v20, %v3630_v59 }
 0x2d4   : > { %v2059_v34 = vsel %vm1670_vm2, %v10677_v15, %v1591_v25  ;;  %v10683_v25 = vld [vmem:[#allocation58_spill] sm:$0xff] }
 0x2d5   : > { %1602 = vrot.lane.b32.xlu1 %v7975_v46, %s6220_s21  ;;  %1604 = vrot.lane.b32.xlu0 %v7978_v40, %s6220_s21  ;;  %v2098_v42 = vsel %vm1701_vm3, %v2059_v34, %v7849_v57  ;;  %v2010_v57 = vsel %vm1732_vm4, %v1970_v6, %v1559_v32  ;;  %v10685_v6 = vld [vmem:[#allocation68_spill] sm:$0xff] }
 0x2d6   : > { %v2138_v24 = vsel %vm1732_vm4, %v2098_v42, %v7774_v7  ;;  %v2141_v7 = vsel %vm1732_vm4, %v2100_v63, %v1657_v47  ;;  %v3635_v47 = vshrl.u32 %v10684_v21, 16  ;;  %v6129_v63 = vld [vmem:[%s10288_s2 + $0x140] sm:$0xff]  }
 0x2d7   : > { %v7999_v55 = vpop.permute.xlu1 %1658  ;;  %2957 = vmatmul.mubr.bf16.gmra.mrb[40].mxu1 %v7994_v4  ;;  %3101 = vmatprep.mubr.bf16.mxu0 %v2138_v24  ;;  %v8002_v9 = vpop.permute.xlu0 %1628 }
 0x2d8   : > { %3102 = vmatmul.mubr.bf16.gmra.mrb[64].mxu0 %v2010_v57  ;;  %5793 = vmatprep.subr.bf16.mxu1 %v6129_v63 }
 0x2d9   : > { %3718 = vrot.lane.b32.xlu1 %v3616_v39, %s6223_s8  ;;  %1444 = vrot.lane.b32.xlu0 %v7956_v38, %s6219_s20  ;;  %v3637_v39 = vrot.slane %v3635_v47, 7  ;;  %v10717_v38 = vld [vmem:[#allocation44_spill] sm:$0xff] }
 0x2da   : > { %3109 = vmatprep.mubr.bf16.mxu0 %v2141_v7 }
 0x2db   : > { %v8016_v32 = vpop.permute.xlu1 %1404  ;;  %v8018_v31 = vpop.permute.xlu0 %1344 }
 0x2dd   : > { %3720 = vrot.lane.b32.xlu1 %v3626_v44, %s6223_s8  ;;  %3716 = vrot.lane.b32.xlu0 %v3619_v0, %s6223_s8  ;;  %v3642_v44 = vshrl.u32 %v10689_v17, 16 }
 0x2df   : > { %v8024_v48 = vpop.permute.xlu1 %1530  ;;  %v8026_v49 = vpop.permute.xlu0 %1468  ;;  %v3644_v47 = vrot.slane %v3642_v44, 7  ;;  %v6136_v44 = vld [vmem:[%s10289_s3 + $0x8] sm:$0xff]  }
 0x2e0   : > { %3110 = vmatmul.mubr.bf16.gmra.mrb[68].mxu0 %v2013_v29  ;;  %v3640_v29 = vor.u32 %v3638_v12, %v3637_v39 }
 0x2e1   : > { %2163 = vrot.lane.b32.xlu1 %v10682_v16, %s6220_s21  ;;  %2161 = vrot.lane.b32.xlu0 %v10683_v25, %s6220_s21 }
 0x2e2   : > { %5961 = vmatprep.mubr.msk.bf16.mxu0 %vm1670_vm2, %v6935_v8 }
 0x2e3   : > { %v8038_v23 = vpop.permute.xlu1 %1346  ;;  %v5697_v58 = vpop.f32.mrb[32].mxu0 }
 0x2e4   : > { %v8040_v41 = vpop.permute.xlu0 %1500  ;;  %v5698_v34 = vpop.f32.mrb[33].mxu0 }
 0x2e5   : > { %v5699_v14 = vadd.f32 %v5698_v34, %v5697_v58  ;;  %3724 = vrot.lane.b32.xlu1 %v3633_v18, %s6223_s8  ;;  %v5700_v43 = vpop.f32.mrb[34].mxu0  ;;  %3722 = vrot.lane.b32.xlu0 %v3623_v50, %s6223_s8  ;;  %v10687_v50 = vld [vmem:[#allocation71_spill] sm:$0xff]  ;;  %v3645_v58 = vshll.u32 %v10689_v17, 16  ;;  %v6133_v18 = vld [vmem:[%s10289_s3] sm:$0xff]  }
 0x2e6   : > { %v5701_v42 = vpop.f32.mrb[35].mxu0 }
 0x2e7   : > { %v8045_v24 = vadd.f32 %v5699_v14, %v10685_v6  ;;  %v5702_v62 = vadd.f32 %v5701_v42, %v5700_v43  ;;  %v8047_v57 = vpop.permute.xlu1 %1470  ;;  %v10690_v43 = vld [vmem:[#allocation38_spill] sm:$0xff]  ;;  %v3647_v12 = vor.u32 %v3645_v58, %v3644_v47 }
 0x2e8   : > { %v8053_v7 = vpop.permute.xlu0 %1626  ;;  %5962 = vmatmul.mubr.msk.bf16.vlgmr.msra.gmra.mrb[72].mxu0 %vm1670_vm2, %v6907_v30  ;;  %v3649_v42 = vshrl.u32 %v10690_v43, 16 }
 0x2e9   : > { %10686 = vst [vmem:[#allocation28_spill] sm:$0xff] %v8045_v24  ;;  %v8058_v60 = vadd.f32 %v5702_v62, %v10687_v50  ;;  %2167 = vrot.lane.b32.xlu1 %v7036_v5, %s6220_s21  ;;  %2165 = vrot.lane.b32.xlu0 %v6917_v52, %s6220_s21  ;;  %v6153_v24 = vld [vmem:[%s10289_s3 + $0x40] sm:$0xff]  }
 0x2ea   : > { %5965 = vmatprep.mubr.msk.bf16.mxu0 %vm1670_vm2, %v7059_v56  ;;  %v5591_v28 = vpop.f32.mrb[4].mxu1  ;;  %4691 = vmatpush1.bf16.msra.mxu0 %v6133_v18 }
 0x2eb   : > { %10688 = vst [vmem:[#allocation64_spill] sm:$0xff] %v8058_v60  ;;  %v8067_v0 = vpop.permute.xlu1 %1502  ;;  %v5592_v35 = vpop.f32.mrb[5].mxu1  ;;  %4692 = vmatprep.subr.bf16.mxu0 %v10626_v2 }
 0x2ec   : > { %v5593_v20 = vadd.f32 %v5592_v35, %v5591_v28  ;;  %v8069_v16 = vpop.permute.xlu0 %1316  ;;  %v5594_v25 = vpop.f32.mrb[6].mxu1 }
 0x2ed   : > { %3728 = vrot.lane.b32.xlu1 %v3640_v29, %s6223_s8  ;;  %v5595_v5 = vpop.f32.mrb[7].mxu1  ;;  %3726 = vrot.lane.b32.xlu0 %v3630_v59, %s6223_s8 }
 0x2ee   : > { %v5596_v52 = vadd.f32 %v5595_v5, %v5594_v25  ;;  %4693 = vmatpush1.bf16.msra.mxu0 %v6136_v44 }
 0x2ef   : > { %v8073_v21 = vpop.permute.xlu1 %1438  ;;  %4694 = vmatprep.subr.bf16.mxu0 %v10626_v2 }
 0x2f0   : > { %v8079_v34 = vpop.permute.xlu0 %1376  ;;  %5966 = vmatmul.mubr.msk.bf16.gmra.mrb[76].mxu0 %vm1670_vm2, %v10646_v36 }
 0x2f1   : > { %2171 = vrot.lane.b32.xlu1 %v7173_v3, %s6220_s21  ;;  %2169 = vrot.lane.b32.xlu0 %v10630_v19, %s6220_s21 }
 0x2f2   : > { %v5703_v59 = vpop.f32.mrb[36].mxu0  ;;  %5969 = vmatprep.mubr.msk.bf16.mxu0 %vm1670_vm2, %v7200_v54  ;;  %v5597_v14 = vpop.f32.mrb[8].mxu1 }
 0x2f3   : > { %v5704_v6 = vpop.f32.mrb[37].mxu0  ;;  %v8090_v62 = vpop.permute.xlu1 %1314 }
 0x2f4   : > { %v5705_v63 = vadd.f32 %v5704_v6, %v5703_v59  ;;  %v5598_v50 = vpop.f32.mrb[9].mxu1  ;;  %v5706_v3 = vpop.f32.mrb[38].mxu0  ;;  %v8108_v59 = vrot.slane %v3649_v42, 7  ;;  %v10695_v42 = vld [vmem:[#allocation63_spill] sm:$0xff] }
 0x2f5   : > { %v8093_v28 = vadd.f32 %v5598_v50, %v5597_v14  ;;  %v8095_v19 = vpop.permute.xlu0 %1564  ;;  %v5600_v17 = vpop.f32.mrb[10].mxu1  ;;  %3732 = vrot.lane.b32.xlu1 %v3647_v12, %s6223_s8  ;;  %3730 = vrot.lane.b32.xlu0 %v3637_v39, %s6223_s8  ;;  %v3652_v14 = vshll.u32 %v10690_v43, 16  ;;  %v6139_v39 = vld [vmem:[%s10289_s3 + $0x10] sm:$0xff]  }
 0x2f6   : > { %v8102_v35 = vadd.f32 %v5705_v63, %v5593_v20  ;;  %v5707_v29 = vpop.f32.mrb[39].mxu0  ;;  %v5601_v25 = vpop.f32.mrb[11].mxu1  ;;  %4695 = vmatpush1.bf16.msra.mxu0 %v6139_v39  ;;  %v10700_v39 = vld [vmem:[#allocation108_spill] sm:$0xff] }
 0x2f7   : > { %v5708_v5 = vadd.f32 %v5707_v29, %v5706_v3  ;;  %v8104_v58 = vadd.f32 %v5601_v25, %v5600_v17  ;;  %v8106_v18 = vpop.permute.xlu1 %1374  ;;  %4696 = vmatprep.subr.bf16.mxu0 %v10626_v2  ;;  %v6142_v17 = vld [vmem:[%s10289_s3 + $0x18] sm:$0xff]   ;;  %v1692_v25 = vsel %vm1670_vm2, %v7293_v53, %v7860_v61 }
 0x2f8   : > { %10691 = vst [vmem:[#allocation58_spill] sm:$0xff] %v8102_v35  ;;  %5970 = vmatmul.mubr.msk.bf16.gmra.mrb[80].mxu0 %vm1670_vm2, %v10670_v33  ;;  %v10702_v35 = vld [vmem:[#allocation119_spill] sm:$0xff]  ;;  %v10725_v33 = vld [vmem:[#allocation70_spill] sm:$0xff] }
 0x2f9   : > { %v8117_v20 = vadd.f32 %v5708_v5, %v5596_v52  ;;  %v8119_v6 = vpop.permute.xlu0 %1596  ;;  %2175 = vrot.lane.b32.xlu1 %v10677_v15, %s6220_s21  ;;  %2173 = vrot.lane.b32.xlu0 %v10652_v26, %s6220_s21  ;;  %v8136_v52 = vsel %vm8127_vm11, 0, %v10695_v42  ;;  %v3654_v15 = vor.u32 %v3652_v14, %v8108_v59  ;;  %v10697_v26 = vld [vmem:[#allocation72_spill] sm:$0xff]  ;;  %v10698_v5 = vld [vmem:[#allocation98_spill] sm:$0xff]  ;;  %v10699_v14 = vld [vmem:[#allocation125_spill] sm:$0xff] }
 0x2fa   : > { %5973 = vmatprep.mubr.msk.bf16.mxu0 %vm1670_vm2, %v7349_v11  ;;  %10696 = vst [vmem:[#allocation68_spill] sm:$0xff] %v8136_v52  ;;  %v3819_v63 = vsel %vm8127_vm11, %v10697_v26, 0  ;;  %v3838_v3 = vshll.u32 %v8136_v52, 16  ;;  %v1812_v42 = vsel %vm1670_vm2, %v10698_v5, %v8016_v32  ;;  %v10701_v26 = vld [vmem:[#allocation57_spill] sm:$0xff]  ;;  %4697 = vmatpush1.bf16.msra.mxu0 %v6142_v17 }
 0x2fb   : > { %10692 = vst [vmem:[#allocation32_spill] sm:$0xff] %v8117_v20  ;;  %v8138_v12 = vpop.permute.xlu1 %1562  ;;  %v3843_v29 = vshll.u32 %v3819_v63, 16  ;;  %4698 = vmatprep.subr.bf16.mxu0 %v10626_v2 }
 0x2fc   : > { %v3840_v20 = vrot.slane %v3838_v3, 1 }
 0x2fd   : > { %v8145_v50 = vpop.permute.xlu0 %1410  ;;  %3736 = vrot.lane.b32.xlu1 %v3654_v15, %s6223_s8  ;;  %3734 = vrot.lane.b32.xlu0 %v3644_v47, %s6223_s8  ;;  %v1815_v47 = vsel %vm1670_vm2, %v10700_v39, %v10699_v14  ;;  %v3845_v3 = vrot.slane %v3843_v29, 1 }
 0x2fe   : > { %v1850_v53 = vsel %vm1701_vm3, %v1815_v47, %v8073_v21  ;;  %v3836_v21 = vshrl.u32 %v8136_v52, 16  ;;  %v10703_v47 = vld [vmem:[#allocation122_spill] sm:$0xff] }
 0x2ff   : > { %v8153_v44 = vpop.permute.xlu1 %1594 }
 0x300   : > { %5974 = vmatmul.mubr.msk.bf16.gmra.mrb[84].mxu0 %vm1670_vm2, %v10698_v5  ;;  %v3841_v29 = vor.u32 %v3840_v20, %v3836_v21 }
 0x301   : > { %v1437_v15 = vpop.permute.xlu0 %1436  ;;  %2225 = vrot.lane.b32.xlu1 %v10701_v26, %s6221_s22  ;;  %2177 = vrot.lane.b32.xlu0 %v7370_v27, %s6220_s21  ;;  %v1723_v26 = vsel %vm1701_vm3, %v1692_v25, %v10702_v35  ;;  %v6145_v27 = vld [vmem:[%s10289_s3 + $0x20] sm:$0xff]   ;;  %v1894_v35 = vsel %vm1732_vm4, %v1850_v53, %v8047_v57  ;;  %v10708_v57 = vld [vmem:[#allocation104_spill] sm:$0xff] }
 0x302   : > { %v1848_v61 = vsel %vm1701_vm3, %v1812_v42, %v1437_v15  ;;  %5977 = vmatprep.mubr.msk.bf16.mxu0 %vm1670_vm2, %v10700_v39  ;;  %v8188_v17 = vsel %vm1732_vm4, %v1723_v26, %v10703_v47  ;;  %v10705_v25 = vld [vmem:[#allocation5_spill] sm:$0xff]  ;;  %v10706_v42 = vld [vmem:[#allocation62_spill] sm:$0xff]  ;;  %4699 = vmatpush1.bf16.msra.mxu0 %v6145_v27  ;;  %v4046_v47 = vrot.slane %v3819_v63, 1  ;;  %v1694_v53 = vsel %vm1670_vm2, %v10708_v57, %v8090_v62 }
 0x303   : > { %v1891_v32 = vsel %vm1732_vm4, %v1848_v61, %v8026_v49  ;;  %v8177_v14 = vpop.permute.xlu1 %1662  ;;  %10704 = vst [vmem:[#allocation71_spill] sm:$0xff] %v8188_v17  ;;  %v6148_v61 = vld [vmem:[%s10289_s3 + $0x28] sm:$0xff]   ;;  %4700 = vmatprep.subr.bf16.mxu0 %v10626_v2  ;;  %v10710_v27 = vld [vmem:[#allocation77_spill] sm:$0xff]  ;;  %v4045_v63 = vrot.slane %v8136_v52, 1  ;;  %v1725_v21 = vsel %vm1701_vm3, %v1694_v53, %v8018_v31 }
 0x304   : > { %2964 = vmatprep.mubr.bf16.mxu1 %v1891_v32  ;;  %v10707_v32 = vld [vmem:[#allocation37_spill] sm:$0xff] }
 0x305   : > { %2965 = vmatmul.mubr.bf16.gmra.mrb[44].mxu1 %v8188_v17  ;;  %v8191_v49 = vpop.permute.xlu0 %1536  ;;  %4107 = vrot.lane.b32.xlu1 %v10705_v25, %s6224_s15  ;;  %v3656_v26 = vshrl.u32 %v10707_v32, 16  ;;  %v10709_v25 = vld [vmem:[#allocation105_spill] sm:$0xff]  ;;  %v3659_v57 = vshll.u32 %v10707_v32, 16 }
 0x306   : > { %2972 = vmatprep.mubr.bf16.mxu1 %v1894_v35  ;;  %2193 = vrot.lane.b32.xlu0 %v10706_v42, %s6219_s20  ;;  %v3846_v35 = vsel %vm840_vm8, %v3841_v29, %v3845_v3  ;;  %v6151_v3 = vld [vmem:[%s10289_s3 + $0x30] sm:$0xff]   ;;  %v8229_v42 = vsel %vm1732_vm4, %v1725_v21, %v8106_v18  ;;  %v8232_v29 = vsel %vm1017_vm7, %v4045_v63, %v4046_v47  ;;  %v10712_v32 = vld [vmem:[#allocation61_spill] sm:$0xff] }
 0x307   : > { %v8199_v15 = vpop.permute.xlu1 %1408  ;;  %4701 = vmatpush1.bf16.msra.mxu0 %v6148_v61  ;;  %10711 = vst [vmem:[#allocation31_spill] sm:$0xff] %v8229_v42  ;;  %v6152_v61 = vld [vmem:[%s10289_s3 + $0x38] sm:$0xff]   ;;  %v10714_v47 = vld [vmem:[#allocation113_spill] sm:$0xff]  ;;  %v10715_v21 = vld [vmem:[#allocation67_spill] sm:$0xff] }
 0x308   : > { %5978 = vmatmul.mubr.msk.bf16.gmra.mrb[88].mxu0 %vm1670_vm2, %v10709_v25  ;;  %4702 = vmatprep.subr.bf16.mxu0 %v10626_v2 }
 0x309   : > { %v8212_v20 = vpop.permute.xlu0 %1660  ;;  %4201 = vrot.lane.b32.xlu1 %v3846_v35, %s6219_s20  ;;  %5981 = vmatprep.mubr.msk.bf16.mxu0 %vm1670_vm2, %v10710_v27 }
 0x30a   : > { %3738 = vrot.lane.b32.xlu0 %v8108_v59, %s6223_s8  ;;  %v3658_v59 = vrot.slane %v3656_v26, 7  ;;  %v8251_v26 = vsel %vm8127_vm11, 0, %v10712_v32 }
 0x30b   : > { %v8220_v62 = vpop.permute.xlu1 %1534  ;;  %4703 = vmatpush1.bf16.msra.mxu0 %v6151_v3  ;;  %10713 = vst [vmem:[#allocation38_spill] sm:$0xff] %v8251_v26  ;;  %v3820_v3 = vsel %vm8127_vm11, %v10715_v21, 0  ;;  %v10716_v21 = vld [vmem:[#allocation69_spill] sm:$0xff] }
 0x30c   : > { %v3661_v53 = vor.u32 %v3659_v57, %v3658_v59  ;;  %4704 = vmatprep.subr.bf16.mxu0 %v10626_v2  ;;  %v3850_v57 = vshll.u32 %v8251_v26, 16 }
 0x30d   : > { %2973 = vmatmul.mubr.bf16.gmra.mrb[48].mxu1 %v8229_v42  ;;  %v8237_v31 = vpop.permute.xlu0 %1632  ;;  %4233 = vrot.lane.b32.xlu1 %v8232_v29, %s6223_s8 }
 0x30e   : > { %4169 = vrot.lane.b32.xlu0 %v8136_v52, %s6225_s23 }
 0x30f   : > { %v8243_v18 = vpop.permute.xlu1 %1350  ;;  %4705 = vmatpush1.bf16.msra.mxu0 %v6152_v61  ;;  %v3663_v61 = vshrl.u32 %v10717_v38, 16 }
 0x310   : > { %5982 = vmatmul.mubr.msk.bf16.gmra.mrb[92].mxu0 %vm1670_vm2, %v10714_v47  ;;  %4706 = vmatprep.subr.bf16.mxu0 %v10626_v2  ;;  %v3852_v2 = vrot.slane %v3850_v57, 1 }
 0x311   : > { %v8256_v63 = vpop.permute.xlu0 %1348  ;;  %4265 = vrot.lane.b32.xlu1 %v8251_v26, %s6221_s22  ;;  %5985 = vmatprep.mubr.msk.bf16.mxu0 %vm1670_vm2, %v7918_v51  ;;  %v3855_v51 = vshll.u32 %v3820_v3, 16  ;;  %v8299_v57 = vrot.slane %v3663_v61, 7 }
 0x312   : > { %3740 = vrot.lane.b32.xlu0 %v3661_v53, %s6223_s8 }
 0x313   : > { %v8266_v32 = vpop.permute.xlu1 %1474  ;;  %v5709_v60 = vpop.f32.mrb[40].mxu0  ;;  %4707 = vmatpush1.bf16.msra.mxu0 %v6153_v24 }
 0x314   : > { %v5710_v40 = vpop.f32.mrb[41].mxu0 }
 0x315   : > { %v8273_v42 = vpop.permute.xlu0 %1472  ;;  %v5711_v10 = vadd.f32 %v5710_v40, %v5709_v60  ;;  %3742 = vrot.lane.b32.xlu1 %v3658_v59, %s6223_s8  ;;  %v5712_v53 = vpop.f32.mrb[42].mxu0  ;;  %v3857_v40 = vrot.slane %v3855_v51, 1 }
 0x316   : > { %2195 = vrot.lane.b32.xlu0 %v10716_v21, %s6219_s20  ;;  %v5713_v17 = vpop.f32.mrb[43].mxu0  ;;  %v3848_v21 = vshrl.u32 %v8251_v26, 16 }
 0x317   : > { %v8280_v4 = vadd.f32 %v5711_v10, %v8093_v28  ;;  %v5714_v13 = vadd.f32 %v5713_v17, %v5712_v53  ;;  %v8282_v39 = vpop.permute.xlu1 %1506  ;;  %v10721_v10 = vld [vmem:[#allocation6_spill] sm:$0xff] }
 0x318   : > { %10719 = vst [vmem:[#allocation72_spill] sm:$0xff] %v8282_v39  ;;  %5986 = vmatmul.mubr.msk.bf16.gmra.mrb[96].mxu0 %vm1670_vm2, %v7925_v22  ;;  %v3853_v51 = vor.u32 %v3852_v2, %v3848_v21 }
 0x319   : > { %10718 = vst [vmem:[#allocation63_spill] sm:$0xff] %v8280_v4  ;;  %v8287_v60 = vadd.f32 %v5714_v13, %v8104_v58  ;;  %v8289_v59 = vpop.permute.xlu0 %1504  ;;  %4109 = vrot.lane.b32.xlu1 %v3846_v35, %s6224_s15  ;;  %5989 = vmatprep.mubr.msk.bf16.mxu0 %vm1670_vm2, %v10721_v10  ;;  %v3666_v13 = vshll.u32 %v10717_v38, 16  ;;  %v4049_v58 = vrot.slane %v3820_v3, 1  ;;  %v4048_v38 = vrot.slane %v8251_v26, 1 }
 0x31a   : > { %2227 = vrot.lane.b32.xlu0 %v6935_v8, %s6221_s22  ;;  %v5603_v24 = vpop.f32.mrb[12].mxu1  ;;  %v8312_v2 = vsel %vm840_vm8, %v3853_v51, %v3857_v40 }
 0x31b   : > { %10720 = vst [vmem:[#allocation125_spill] sm:$0xff] %v8287_v60  ;;  %v8297_v28 = vpop.permute.xlu1 %1630  ;;  %v5604_v17 = vpop.f32.mrb[13].mxu1  ;;  %v10722_v60 = vld [vmem:[#allocation74_spill] sm:$0xff]  ;;  %v4050_v21 = vsel %vm1017_vm7, %v4048_v38, %v4049_v58 }
 0x31c   : > { %v5605_v53 = vadd.f32 %v5604_v17, %v5603_v24  ;;  %v5606_v35 = vpop.f32.mrb[14].mxu1  ;;  %v8305_v4 = vsel %vm8127_vm11, 0, %v10722_v60  ;;  %v3668_v60 = vor.u32 %v3666_v13, %v8299_v57  ;;  %v10724_v17 = vld [vmem:[#allocation73_spill] sm:$0xff] }
 0x31d   : > { %10723 = vst [vmem:[#allocation57_spill] sm:$0xff] %v8305_v4  ;;  %v8307_v22 = vpop.permute.xlu0 %1320  ;;  %4171 = vrot.lane.b32.xlu1 %v8251_v26, %s6225_s23  ;;  %v5607_v8 = vpop.f32.mrb[15].mxu1  ;;  %v3862_v24 = vshll.u32 %v8305_v4, 16  ;;  %v8325_v40 = vsel %vm8127_vm11, %v10724_v17, 0  ;;  %v3860_v17 = vshrl.u32 %v8305_v4, 16 }
 0x31e   : > { %v5608_v61 = vadd.f32 %v5607_v8, %v5606_v35  ;;  %4295 = vrot.lane.b32.xlu0 %v8312_v2, %s6222_s29  ;;  %v3867_v38 = vshll.u32 %v8325_v40, 16 }
 0x31f   : > { %v1443_v3 = vpop.permute.xlu1 %1442  ;;  %v3864_v11 = vrot.slane %v3862_v24, 1 }
 0x320   : > { %5990 = vmatmul.mubr.msk.bf16.gmra.mrb[100].mxu0 %vm1670_vm2, %v10721_v10  ;;  %v3869_v24 = vrot.slane %v3867_v38, 1 }
 0x321   : > { %v8327_v51 = vpop.permute.xlu0 %1380  ;;  %3744 = vrot.lane.b32.xlu1 %v3668_v60, %s6223_s8  ;;  %5529 = vmatprep.mubr.msk.bf16.mxu0 %vm4327_vm12, %v4050_v21 }
 0x322   : > { %v5715_v35 = vpop.f32.mrb[44].mxu0  ;;  %4139 = vrot.lane.b32.xlu0 %v8232_v29, %s6220_s21  ;;  %v5609_v13 = vpop.f32.mrb[16].mxu1 }
 0x323   : > { %v5716_v8 = vpop.f32.mrb[45].mxu0  ;;  %v1319_v58 = vpop.permute.xlu1 %1318 }
 0x324   : > { %v5717_v10 = vadd.f32 %v5716_v8, %v5715_v35  ;;  %v5610_v5 = vpop.f32.mrb[17].mxu1  ;;  %v5718_v26 = vpop.f32.mrb[46].mxu0 }
 0x325   : > { %v8335_v45 = vadd.f32 %v5610_v5, %v5609_v13  ;;  %v8337_v60 = vpop.permute.xlu0 %1568  ;;  %v5612_v52 = vpop.f32.mrb[18].mxu1  ;;  %2197 = vrot.lane.b32.xlu1 %v10725_v33, %s6219_s20  ;;  %v3865_v5 = vor.u32 %v3864_v11, %v3860_v17  ;;  %v1821_v11 = vsel %vm1670_vm2, %v10710_v27, %v8145_v50 }
 0x326   : > { %v8341_v29 = vadd.f32 %v5717_v10, %v5605_v53  ;;  %v5719_v37 = vpop.f32.mrb[47].mxu0  ;;  %v5613_v54 = vpop.f32.mrb[19].mxu1  ;;  %4203 = vrot.lane.b32.xlu0 %v8312_v2, %s6219_s20  ;;  %v10728_v10 = vld [vmem:[#allocation101_spill] sm:$0xff] }
 0x327   : > { %v5720_v35 = vadd.f32 %v5719_v37, %v5718_v26  ;;  %v8345_v8 = vadd.f32 %v5613_v54, %v5612_v52  ;;  %v1379_v46 = vpop.permute.xlu1 %1378  ;;  %v1696_v37 = vsel %vm1670_vm2, %v10728_v10, %v8069_v16  ;;  %v8360_v54 = vsel %vm840_vm8, %v3865_v5, %v3869_v24 }
 0x328   : > { %10726 = vst [vmem:[#allocation119_spill] sm:$0xff] %v8341_v29  ;;  %v1818_v52 = vsel %vm1670_vm2, %v10709_v25, %v8199_v15  ;;  %v1854_v26 = vsel %vm1701_vm3, %v1821_v11, %v1443_v3  ;;  %v1727_v50 = vsel %vm1701_vm3, %v1696_v37, %v8038_v23  ;;  %v10730_v23 = vld [vmem:[#allocation43_spill] sm:$0xff]  ;;  %v4051_v5 = vrot.slane %v8305_v4, 1 }
 0x329   : > { %v8347_v13 = vadd.f32 %v5720_v35, %v5608_v61  ;;  %v8349_v39 = vpop.permute.xlu0 %1600  ;;  %2229 = vrot.lane.b32.xlu1 %v6907_v30, %s6221_s22  ;;  %v8382_v15 = vsel %vm1732_vm4, %v1727_v50, %v8079_v34  ;;  %v1900_v38 = vsel %vm1732_vm4, %v1854_v26, %v8266_v32  ;;  %v3670_v17 = vshrl.u32 %v10730_v23, 16  ;;  %v10731_v35 = vld [vmem:[#allocation79_spill] sm:$0xff]  ;;  %v10733_v26 = vld [vmem:[#allocation85_spill] sm:$0xff] }
 0x32a   : > { %4235 = vrot.lane.b32.xlu0 %v4050_v21, %s6223_s8  ;;  %10729 = vst [vmem:[#allocation62_spill] sm:$0xff] %v8382_v15  ;;  %v4052_v34 = vrot.slane %v8325_v40, 1  ;;  %v1698_v24 = vsel %vm1670_vm2, %v10731_v35, %v1319_v58  ;;  %v3673_v37 = vshll.u32 %v10730_v23, 16 }
 0x32b   : > { %10727 = vst [vmem:[#allocation122_spill] sm:$0xff] %v8347_v13  ;;  %v8354_v33 = vpop.permute.xlu1 %1566  ;;  %v8413_v58 = vrot.slane %v3670_v17, 7 }
 0x32c   : > { %v8411_v40 = vsel %vm1017_vm7, %v4051_v5, %v4052_v34 }
 0x32d   : > { %v1441_v30 = vpop.permute.xlu0 %1440  ;;  %4297 = vrot.lane.b32.xlu1 %v8360_v54, %s6222_s29 }
 0x32e   : > { %v1852_v53 = vsel %vm1701_vm3, %v1818_v52, %v1441_v30  ;;  %4267 = vrot.lane.b32.xlu0 %v8305_v4, %s6221_s22 }
 0x32f   : > { %v1897_v16 = vsel %vm1732_vm4, %v1852_v53, %v8273_v42  ;;  %v8376_v61 = vpop.permute.xlu1 %1598 }
 0x330   : > { %2980 = vmatprep.mubr.bf16.mxu1 %v1897_v16 }
 0x331   : > { %2981 = vmatmul.mubr.bf16.gmra.mrb[52].mxu1 %v8382_v15  ;;  %v8385_v3 = vpop.permute.xlu0 %1540  ;;  %4141 = vrot.lane.b32.xlu1 %v4050_v21, %s6220_s21 }
 0x332   : > { %2988 = vmatprep.mubr.bf16.mxu1 %v1900_v38  ;;  %3746 = vrot.lane.b32.xlu0 %v8299_v57, %s6223_s8  ;;  %v1729_v57 = vsel %vm1701_vm3, %v1698_v24, %v8256_v63 }
 0x333   : > { %v8392_v42 = vpop.permute.xlu1 %1666  ;;  %v8408_v21 = vsel %vm1732_vm4, %v1729_v57, %v1379_v46  ;;  %v3675_v46 = vor.u32 %v3673_v37, %v8413_v58 }
 0x334   : > { %10732 = vst [vmem:[#allocation37_spill] sm:$0xff] %v8408_v21 }
 0x335   : > { %v8399_v10 = vpop.permute.xlu0 %1664  ;;  %4205 = vrot.lane.b32.xlu1 %v8360_v54, %s6219_s20 }
 0x336   : > { %4111 = vrot.lane.b32.xlu0 %v8312_v2, %s6224_s15 }
 0x337   : > { %v1413_v32 = vpop.permute.xlu1 %1412 }
 0x339   : > { %2989 = vmatmul.mubr.bf16.gmra.mrb[56].mxu1 %v8408_v21  ;;  %v1477_v11 = vpop.permute.xlu0 %1476  ;;  %4237 = vrot.lane.b32.xlu1 %v8411_v40, %s6223_s8 }
 0x33a   : > { %4173 = vrot.lane.b32.xlu0 %v8305_v4, %s6225_s23 }
 0x33b   : > { %v8421_v63 = vpop.permute.xlu1 %1538 }
 0x33d   : > { %v8424_v2 = vpop.permute.xlu0 %1508 }
 0x33e   : > { %3748 = vrot.lane.b32.xlu0 %v3675_v46, %s6223_s8 }
 0x33f   : > { %v8427_v52 = vpop.permute.xlu1 %1636 }
 0x341   : > { %v8429_v30 = vpop.permute.xlu0 %1634 }
 0x342   : > { %2199 = vrot.lane.b32.xlu0 %v10733_v26, %s6219_s20  ;;  %v10736_v26 = vld [vmem:[#allocation106_spill] sm:$0xff] }
 0x343   : > { %v8433_v53 = vpop.permute.xlu1 %1570  ;;  %v5721_v16 = vpop.f32.mrb[48].mxu0 }
 0x344   : > { %v5722_v50 = vpop.f32.mrb[49].mxu0 }
 0x345   : > { %v8435_v38 = vpop.permute.xlu0 %1572  ;;  %v5723_v23 = vadd.f32 %v5722_v50, %v5721_v16  ;;  %v5724_v17 = vpop.f32.mrb[50].mxu0  ;;  %v2065_v16 = vsel %vm1670_vm2, %v10736_v26, %v8153_v44 }
 0x346   : > { %2231 = vrot.lane.b32.xlu0 %v7059_v56, %s6221_s22  ;;  %v5725_v34 = vpop.f32.mrb[51].mxu0  ;;  %v10737_v56 = vld [vmem:[#allocation78_spill] sm:$0xff]  ;;  %v2102_v29 = vsel %vm1701_vm3, %v2065_v16, %v8053_v7 }
 0x347   : > { %v8440_v35 = vadd.f32 %v5723_v23, %v8335_v45  ;;  %v5726_v24 = vadd.f32 %v5725_v34, %v5724_v17  ;;  %v8442_v5 = vpop.permute.xlu1 %1602  ;;  %v1700_v45 = vsel %vm1670_vm2, %v10737_v56, %v8307_v22  ;;  %v1824_v34 = vsel %vm1670_vm2, %v10714_v47, %v1413_v32 }
 0x348   : > { %v1731_v22 = vsel %vm1701_vm3, %v1700_v45, %v8243_v18  ;;  %v2144_v7 = vsel %vm1732_vm4, %v2102_v29, %v7999_v55  ;;  %v10739_v45 = vld [vmem:[#allocation121_spill] sm:$0xff] }
 0x349   : > { %10734 = vst [vmem:[#allocation104_spill] sm:$0xff] %v8440_v35  ;;  %v8445_v57 = vadd.f32 %v5726_v24, %v8345_v8  ;;  %v8447_v37 = vpop.permute.xlu0 %1604  ;;  %v8471_v32 = vsel %vm1732_vm4, %v1731_v22, %v8327_v51 }
 0x34a   : > { %v5615_v46 = vpop.f32.mrb[20].mxu1  ;;  %10738 = vst [vmem:[#allocation67_spill] sm:$0xff] %v8471_v32 }
 0x34b   : > { %10735 = vst [vmem:[#allocation61_spill] sm:$0xff] %v8445_v57  ;;  %v3719_v50 = vpop.permute.xlu1 %3718  ;;  %v5616_v13 = vpop.f32.mrb[21].mxu1 }
 0x34c   : > { %v5617_v23 = vadd.f32 %v5616_v13, %v5615_v46  ;;  %v5618_v17 = vpop.f32.mrb[22].mxu1  ;;  %v8467_v13 = vsel %vm8127_vm11, %v3719_v50, 0 }
 0x34d   : > { %v1445_v8 = vpop.permute.xlu0 %1444  ;;  %v5619_v24 = vpop.f32.mrb[23].mxu1  ;;  %v3879_v16 = vshll.u32 %v8467_v13, 16 }
 0x34e   : > { %v1856_v57 = vsel %vm1701_vm3, %v1824_v34, %v1445_v8  ;;  %v5620_v35 = vadd.f32 %v5619_v24, %v5618_v17  ;;  %v10740_v17 = vld [vmem:[#allocation99_spill] sm:$0xff] }
 0x34f   : > { %v1903_v44 = vsel %vm1732_vm4, %v1856_v57, %v1477_v11  ;;  %v8461_v21 = vpop.permute.xlu1 %3720  ;;  %v1937_v55 = vsel %vm1670_vm2, %v10740_v17, %v10739_v45  ;;  %v10741_v24 = vld [vmem:[#allocation107_spill] sm:$0xff]  ;;  %v3881_v45 = vrot.slane %v3879_v16, 1  ;;  %v6131_v16 = vld [vmem:[%s10288_s2 + $0x148] sm:$0xff]  }
 0x350   : > { %2996 = vmatprep.mubr.bf16.mxu1 %v1903_v44  ;;  %v2068_v44 = vsel %vm1670_vm2, %v10741_v24, %v8119_v6  ;;  %v1974_v47 = vsel %vm1701_vm3, %v1937_v55, %v8024_v48  ;;  %v10743_v55 = vld [vmem:[#allocation50_spill] sm:$0xff] }
 0x351   : > { %2997 = vmatmul.mubr.bf16.gmra.mrb[60].mxu1 %v8471_v32  ;;  %v3717_v46 = vpop.permute.xlu0 %3716  ;;  %v2016_v48 = vsel %vm1732_vm4, %v1974_v47, %v8138_v12  ;;  %v10746_v47 = vld [vmem:[#allocation112_spill] sm:$0xff] }
 0x352   : > { %v8478_v11 = vsel %vm8127_vm11, 0, %v3717_v46  ;;  %3117 = vmatprep.mubr.bf16.mxu1 %v2144_v7  ;;  %v5727_v18 = vpop.f32.mrb[52].mxu0  ;;  %v5621_v57 = vpop.f32.mrb[24].mxu1 }
 0x353   : > { %4269 = vrot.lane.b32.xlu1 %v8478_v11, %s6221_s22  ;;  %v5728_v51 = vpop.f32.mrb[53].mxu0  ;;  %v8483_v50 = vpop.permute.xlu1 %2163  ;;  %v3874_v56 = vshll.u32 %v8478_v11, 16  ;;  %v3872_v32 = vshrl.u32 %v8478_v11, 16 }
 0x354   : > { %v5729_v29 = vadd.f32 %v5728_v51, %v5727_v18  ;;  %v5622_v34 = vpop.f32.mrb[25].mxu1  ;;  %v5730_v8 = vpop.f32.mrb[54].mxu0 }
 0x355   : > { %v8492_v22 = vadd.f32 %v5622_v34, %v5621_v57  ;;  %v8494_v46 = vpop.permute.xlu0 %2161  ;;  %v5624_v7 = vpop.f32.mrb[26].mxu1  ;;  %v3876_v15 = vrot.slane %v3874_v56, 1  ;;  %v6130_v56 = vld [vmem:[%s10288_s2 + $0x100] sm:$0xff]  }
 0x356   : > { %v8499_v27 = vadd.f32 %v5729_v29, %v5617_v23  ;;  %v5731_v18 = vpop.f32.mrb[55].mxu0  ;;  %v5625_v51 = vpop.f32.mrb[27].mxu1  ;;  %v2104_v23 = vsel %vm1701_vm3, %v2068_v44, %v8002_v9  ;;  %v3677_v29 = vshrl.u32 %v10743_v55, 16  ;;  %v10745_v9 = vld [vmem:[#allocation115_spill] sm:$0xff] }
 0x357   : > { %v5732_v25 = vadd.f32 %v5731_v18, %v5730_v8  ;;  %v8501_v4 = vadd.f32 %v5625_v51, %v5624_v7  ;;  %3750 = vrot.lane.b32.xlu1 %v8413_v58, %s6223_s8  ;;  %v8505_v6 = vpop.permute.xlu1 %3724  ;;  %v3877_v57 = vor.u32 %v3876_v15, %v3872_v32  ;;  %v2147_v32 = vsel %vm1732_vm4, %v2104_v23, %v8212_v20  ;;  %v6132_v20 = vld [vmem:[%s10288_s2 + $0x108] sm:$0xff]   ;;  %v6134_v8 = vld [vmem:[%s10288_s2 + $0x150] sm:$0xff]  }
 0x358   : > { %10742 = vst [vmem:[#allocation69_spill] sm:$0xff] %v8499_v27  ;;  %v2071_v12 = vsel %vm1670_vm2, %v10745_v9, %v8376_v61  ;;  %v8545_v44 = vrot.slane %v3677_v29, 7  ;;  %v6135_v51 = vld [vmem:[%s10288_s2 + $0x110] sm:$0xff]   ;;  %v4055_v23 = vrot.slane %v8467_v13, 1  ;;  %v6140_v13 = vld [vmem:[%s10288_s2 + $0x160] sm:$0xff]   ;;  %v10747_v29 = vld [vmem:[#allocation114_spill] sm:$0xff] }
 0x359   : > { %v8518_v58 = vadd.f32 %v5732_v25, %v5620_v35  ;;  %3118 = vmatmul.mubr.bf16.vlgmr.msra.gmra.mrb[64].mxu1 %v2016_v48  ;;  %v3723_v15 = vpop.permute.xlu0 %3722  ;;  %v8523_v34 = vsel %vm840_vm8, %v3877_v57, %v3881_v45  ;;  %v1940_v35 = vsel %vm1670_vm2, %v10746_v47, %v8040_v41  ;;  %v2106_v7 = vsel %vm1701_vm3, %v2071_v12, %v8297_v28  ;;  %v6137_v28 = vld [vmem:[%s10288_s2 + $0x158] sm:$0xff]  }
 0x35a   : > { %3125 = vmatprep.mubr.bf16.mxu1 %v2147_v32  ;;  %4299 = vrot.lane.b32.xlu0 %v8523_v34, %s6222_s29  ;;  %v1976_v18 = vsel %vm1701_vm3, %v1940_v35, %v7951_v1  ;;  %v8569_v57 = vsel %vm8127_vm11, 0, %v8461_v21  ;;  %v8582_v21 = vsel %vm8127_vm11, %v3723_v15, 0  ;;  %v2074_v15 = vsel %vm1670_vm2, %v10747_v29, %v8349_v39 }
 0x35b   : > { %10744 = vst [vmem:[#allocation44_spill] sm:$0xff] %v8518_v58  ;;  %4113 = vrot.lane.b32.xlu1 %v8360_v54, %s6224_s15  ;;  %v8532_v25 = vpop.permute.xlu1 %2167  ;;  %5794 = vmatpush3.bf16.msra.mxu1 %v6130_v56  ;;  %v3680_v54 = vshll.u32 %v10743_v55, 16  ;;  %v2019_v45 = vsel %vm1732_vm4, %v1976_v18, %v8095_v19  ;;  %v2150_v56 = vsel %vm1732_vm4, %v2106_v7, %v8177_v14  ;;  %v4054_v19 = vrot.slane %v8478_v11, 1  ;;  %v6138_v14 = vld [vmem:[%s10288_s2 + $0x118] sm:$0xff]   ;;  %v10749_v7 = vld [vmem:[#allocation86_spill] sm:$0xff]  ;;  %v6141_v18 = vld [vmem:[%s10288_s2 + $0x120] sm:$0xff]  }
 0x35c   : > { %5795 = vmatprep.subr.bf16.mxu1 %v6131_v16  ;;  %v3886_v55 = vshll.u32 %v8569_v57, 16  ;;  %v10763_v58 = vld [vmem:[#allocation90_spill] sm:$0xff] }
 0x35d   : > { %v8543_v61 = vpop.permute.xlu0 %2165  ;;  %v3682_v48 = vor.u32 %v3680_v54, %v8545_v44  ;;  %v8600_v12 = vsel %vm1017_vm7, %v4054_v19, %v4055_v23 }
 0x35e   : > { %4143 = vrot.lane.b32.xlu0 %v8411_v40, %s6220_s21 }
 0x35f   : > { %4175 = vrot.lane.b32.xlu1 %v8478_v11, %s6225_s23  ;;  %v8554_v41 = vpop.permute.xlu1 %3728  ;;  %5796 = vmatpush3.bf16.msra.mxu1 %v6132_v20  ;;  %v10748_v20 = vld [vmem:[#allocation76_spill] sm:$0xff] }
 0x360   : > { %5797 = vmatprep.subr.bf16.mxu1 %v6134_v8  ;;  %v1943_v35 = vsel %vm1670_vm2, %v10748_v20, %v8067_v0  ;;  %v3891_v8 = vshll.u32 %v8582_v21, 16 }
 0x361   : > { %3126 = vmatmul.mubr.bf16.gmra.mrb[68].mxu1 %v2019_v45  ;;  %v8571_v1 = vpop.permute.xlu0 %3726  ;;  %v1978_v54 = vsel %vm1701_vm3, %v1943_v35, %v8220_v62  ;;  %v3888_v45 = vrot.slane %v3886_v55, 1  ;;  %v6143_v62 = vld [vmem:[%s10288_s2 + $0x168] sm:$0xff]  }
 0x362   : > { %3133 = vmatprep.mubr.bf16.mxu1 %v2150_v56  ;;  %4207 = vrot.lane.b32.xlu0 %v8523_v34, %s6219_s20  ;;  %v2022_v0 = vsel %vm1732_vm4, %v1978_v54, %v8354_v33  ;;  %v3884_v33 = vshrl.u32 %v8569_v57, 16 }
 0x363   : > { %3752 = vrot.lane.b32.xlu1 %v3682_v48, %s6223_s8  ;;  %v8585_v16 = vpop.permute.xlu1 %2171  ;;  %5798 = vmatpush3.bf16.msra.mxu1 %v6135_v51  ;;  %v2108_v51 = vsel %vm1701_vm3, %v2074_v15, %v8237_v31  ;;  %v3893_v48 = vrot.slane %v3891_v8, 1  ;;  %v10750_v31 = vld [vmem:[#allocation124_spill] sm:$0xff]  ;;  %v10753_v8 = vld [vmem:[#allocation81_spill] sm:$0xff] }
 0x364   : > { %5799 = vmatprep.subr.bf16.mxu1 %v6137_v28  ;;  %v2153_v56 = vsel %vm1732_vm4, %v2108_v51, %v8399_v10  ;;  %v2077_v19 = vsel %vm1670_vm2, %v10750_v31, %v8442_v5  ;;  %v6144_v10 = vld [vmem:[%s10288_s2 + $0x128] sm:$0xff]   ;;  %v6146_v5 = vld [vmem:[%s10288_s2 + $0x170] sm:$0xff]   ;;  %v1277_v54 = vrot.slane %v10753_v8, 1 }
 0x365   : > { %v8597_v32 = vpop.permute.xlu0 %2169 }
 0x366   : > { %4239 = vrot.lane.b32.xlu0 %v8600_v12, %s6223_s8 }
 0x367   : > { %2201 = vrot.lane.b32.xlu1 %v10749_v7, %s6219_s20  ;;  %v8612_v39 = vpop.permute.xlu1 %3732  ;;  %5800 = vmatpush3.bf16.msra.mxu1 %v6138_v14  ;;  %v10751_v14 = vld [vmem:[#allocation120_spill] sm:$0xff] }
 0x368   : > { %5801 = vmatprep.subr.bf16.mxu1 %v6140_v13  ;;  %v1946_v55 = vsel %vm1670_vm2, %v10751_v14, %v8289_v59  ;;  %v3889_v13 = vor.u32 %v3888_v45, %v3884_v33  ;;  %v2110_v59 = vsel %vm1701_vm3, %v2077_v19, %v8429_v30  ;;  %v6149_v30 = vld [vmem:[%s10288_s2 + $0x178] sm:$0xff]  }
 0x369   : > { %3134 = vmatmul.mubr.bf16.gmra.mrb[72].mxu1 %v2022_v0  ;;  %v8624_v28 = vpop.permute.xlu0 %3730  ;;  %v1980_v45 = vsel %vm1701_vm3, %v1946_v55, %v8191_v49  ;;  %v10755_v55 = vld [vmem:[#allocation72_spill] sm:$0xff] }
 0x36a   : > { %3141 = vmatprep.mubr.bf16.mxu1 %v2153_v56  ;;  %4271 = vrot.lane.b32.xlu0 %v8569_v57, %s6221_s22  ;;  %v8654_v7 = vsel %vm840_vm8, %v3889_v13, %v3893_v48  ;;  %v2156_v48 = vsel %vm1732_vm4, %v2110_v59, %v8392_v42  ;;  %v10756_v13 = vld [vmem:[#allocation89_spill] sm:$0xff] }
 0x36b   : > { %2233 = vrot.lane.b32.xlu1 %v10646_v36, %s6221_s22  ;;  %v8636_v23 = vpop.permute.xlu1 %2175  ;;  %5802 = vmatpush3.bf16.msra.mxu1 %v6141_v18  ;;  %v10752_v36 = vld [vmem:[#allocation123_spill] sm:$0xff]  ;;  %v10754_v18 = vld [vmem:[#allocation49_spill] sm:$0xff] }
 0x36c   : > { %5803 = vmatprep.subr.bf16.mxu1 %v6143_v62  ;;  %v1278_v35 = vrot.slane %v10752_v36, 1  ;;  %v3684_v0 = vshrl.u32 %v10754_v18, 16  ;;  %v2025_v62 = vsel %vm1732_vm4, %v1980_v45, %v8337_v60  ;;  %v3687_v42 = vshll.u32 %v10754_v18, 16 }
 0x36d   : > { %v8647_v15 = vpop.permute.xlu0 %2173 }
 0x36e   : > { %3754 = vrot.lane.b32.xlu0 %v8545_v44, %s6223_s8  ;;  %v6147_v44 = vld [vmem:[%s10288_s2 + $0x130] sm:$0xff]   ;;  %v8678_v49 = vsel %vm1017_vm7, %v1277_v54, %v1278_v35  ;;  %v8689_v19 = vrot.slane %v3684_v0, 7  ;;  %v10757_v54 = vld [vmem:[#allocation8_spill] sm:$0xff] }
 0x36f   : > { %4301 = vrot.lane.b32.xlu1 %v8654_v7, %s6222_s29  ;;  %v8661_v51 = vpop.permute.xlu1 %3736  ;;  %5804 = vmatpush3.bf16.msra.mxu1 %v6144_v10  ;;  %v2080_v60 = vsel %vm1670_vm2, %v8678_v49, %v8447_v37  ;;  %v6150_v10 = vld [vmem:[%s10288_s2 + $0x138] sm:$0xff]   ;;  %v1949_v37 = vsel %vm1670_vm2, %v10756_v13, %v10755_v55  ;;  %v10518_v59 = vunpack.i.h.bf16 %v10757_v54 }
 0x370   : > { %5805 = vmatprep.subr.bf16.mxu1 %v6146_v5  ;;  %v4058_v5 = vrot.slane %v8582_v21, 1  ;;  %v2112_v35 = vsel %vm1701_vm3, %v2080_v60, %v8427_v52  ;;  %v1982_v18 = vsel %vm1701_vm3, %v1949_v37, %v8421_v63  ;;  %v8714_v21 = vsel %vm8127_vm11, 0, %v8505_v6  ;;  %v10762_v54 = vld [vmem:[#allocation100_spill] sm:$0xff] }
 0x371   : > { %3142 = vmatmul.mubr.bf16.gmra.mrb[76].mxu1 %v2025_v62  ;;  %v8673_v56 = vpop.permute.xlu0 %3734  ;;  %v8727_v6 = vsel %vm8127_vm11, %v8571_v1, 0  ;;  %v10758_v1 = vld [vmem:[#allocation25_spill] sm:$0xff] }
 0x372   : > { %3149 = vmatprep.mubr.bf16.mxu1 %v2156_v48  ;;  %4115 = vrot.lane.b32.xlu0 %v8523_v34, %s6224_s15  ;;  %v4057_v48 = vrot.slane %v8569_v57, 1 }
 0x373   : > { %4145 = vrot.lane.b32.xlu1 %v8600_v12, %s6220_s21  ;;  %v8687_v33 = vpop.permute.xlu1 %2225  ;;  %5806 = vmatpush3.bf16.msra.mxu1 %v6147_v44  ;;  %v3689_v44 = vor.u32 %v3687_v42, %v8689_v19  ;;  %v2159_v42 = vsel %vm1732_vm4, %v2112_v35, %v10518_v59 }
 0x374   : > { %5807 = vmatprep.subr.bf16.mxu1 %v6149_v30  ;;  %v2028_v30 = vsel %vm1732_vm4, %v1982_v18, %v8433_v53 }
 0x375   : > { %v8695_v34 = vpop.permute.xlu0 %2177 }
 0x376   : > { %4177 = vrot.lane.b32.xlu0 %v8569_v57, %s6225_s23  ;;  %v5627_v36 = vpop.f32.mrb[28].mxu1 }
 0x377   : > { %4209 = vrot.lane.b32.xlu1 %v8654_v7, %s6219_s20  ;;  %v4108_v0 = vpop.permute.xlu1 %4107  ;;  %v5628_v45 = vpop.f32.mrb[29].mxu1  ;;  %5808 = vmatpush3.bf16.msra.mxu1 %v6150_v10 }
 0x378   : > { %v8716_v62 = vadd.f32 %v5628_v45, %v5627_v36  ;;  %v5733_v52 = vpop.f32.mrb[56].mxu0  ;;  %v5630_v63 = vpop.f32.mrb[30].mxu1  ;;  %v8731_v36 = vsel %vm1017_vm7, %v4057_v48, %v4058_v5  ;;  %v3903_v5 = vshll.u32 %v8727_v6, 16 }
 0x379   : > { %3150 = vmatmul.mubr.bf16.gmra.mrb[80].mxu1 %v2028_v30  ;;  %v2194_v60 = vpop.permute.xlu0 %2193  ;;  %v5734_v55 = vpop.f32.mrb[57].mxu0  ;;  %v3898_v30 = vshll.u32 %v8714_v21, 16 }
 0x37a   : > { %v5735_v10 = vadd.f32 %v5734_v55, %v5733_v52  ;;  %3157 = vmatprep.mubr.bf16.mxu1 %v2159_v42  ;;  %3756 = vrot.lane.b32.xlu0 %v3689_v44, %s6223_s8  ;;  %v5631_v53 = vpop.f32.mrb[31].mxu1  ;;  %v5736_v37 = vpop.f32.mrb[58].mxu0  ;;  %v1952_v52 = vsel %vm1670_vm2, %v10758_v1, %v8424_v2  ;;  %v10761_v42 = vld [vmem:[#allocation94_spill] sm:$0xff] }
 0x37b   : > { %v8733_v18 = vadd.f32 %v5631_v53, %v5630_v63  ;;  %4241 = vrot.lane.b32.xlu1 %v8731_v36, %s6223_s8  ;;  %v5737_v35 = vpop.f32.mrb[59].mxu0  ;;  %v4202_v45 = vpop.permute.xlu1 %4201 }
 0x37c   : > { %v8742_v44 = vadd.f32 %v5735_v10, %v8492_v22  ;;  %v5738_v55 = vadd.f32 %v5737_v35, %v5736_v37  ;;  %v1984_v22 = vsel %vm1701_vm3, %v1952_v52, %v8385_v3  ;;  %v3900_v10 = vrot.slane %v3898_v30, 1 }
 0x37d   : > { %v8745_v48 = vpop.permute.xlu0 %3738  ;;  %v2031_v35 = vsel %vm1732_vm4, %v1984_v22, %v8435_v38  ;;  %v10764_v38 = vld [vmem:[#allocation59_spill] sm:$0xff]  ;;  %v10766_v22 = vld [vmem:[#allocation56_spill] sm:$0xff] }
 0x37e   : > { %10759 = vst [vmem:[#allocation74_spill] sm:$0xff] %v8742_v44  ;;  %v8748_v63 = vadd.f32 %v5738_v55, %v8501_v4  ;;  %2203 = vrot.lane.b32.xlu0 %v10761_v42, %s6219_s20  ;;  %v5633_v53 = vpop.f32.mrb[32].mxu1  ;;  %v3905_v55 = vrot.slane %v3903_v5, 1  ;;  %v3896_v44 = vshrl.u32 %v8714_v21, 16  ;;  %v10521_v52 = vunpack.i.h.bf16 %v10764_v38  ;;  %v10765_v5 = vld [vmem:[#allocation60_spill] sm:$0xff] }
 0x37f   : > { %4273 = vrot.lane.b32.xlu1 %v8714_v21, %s6221_s22  ;;  %v4234_v59 = vpop.permute.xlu1 %4233  ;;  %v5634_v2 = vpop.f32.mrb[33].mxu1  ;;  %v3694_v38 = vshll.u32 %v10766_v22, 16 }
 0x380   : > { %10760 = vst [vmem:[#allocation73_spill] sm:$0xff] %v8748_v63  ;;  %v8756_v37 = vadd.f32 %v5634_v2, %v5633_v53  ;;  %v5636_v4 = vpop.f32.mrb[34].mxu1  ;;  %v3901_v30 = vor.u32 %v3900_v10, %v3896_v44  ;;  %v2271_v53 = vsel %vm1670_vm2, %v10765_v5, %v8494_v46  ;;  %v4329_v2 = vsel %vm4327_vm12, 0, %v4108_v0 }
 0x381   : > { %3158 = vmatmul.mubr.bf16.gmra.mrb[84].mxu1 %v2031_v35  ;;  %v4170_v63 = vpop.permute.xlu0 %4169  ;;  %v5637_v42 = vpop.f32.mrb[35].mxu1  ;;  %v2318_v35 = vsel %vm1701_vm3, %v2271_v53, %v2194_v60  ;;  %v4360_v46 = vsel %vm1670_vm2, %v4329_v2, %v10521_v52  ;;  %v10768_v52 = vld [vmem:[#allocation109_spill] sm:$0xff] }
 0x382   : > { %3198 = vmatprep.mubr.bf16.mxu1 %v10762_v54  ;;  %2235 = vrot.lane.b32.xlu0 %v10763_v58, %s6221_s22  ;;  %v8764_v27 = vadd.f32 %v5637_v42, %v5636_v4  ;;  %v3691_v54 = vshrl.u32 %v10766_v22, 16  ;;  %v8778_v4 = vsel %vm840_vm8, %v3901_v30, %v3905_v55  ;;  %v2350_v60 = vsel %vm1732_vm4, %v2318_v35, %v8687_v33 }
 0x383   : > { %3758 = vrot.lane.b32.xlu1 %v8689_v19, %s6223_s8  ;;  %v4266_v3 = vpop.permute.xlu1 %4265  ;;  %v4393_v10 = vsel %vm4391_vm13, %v4360_v46, %v4170_v63  ;;  %v4061_v22 = vrot.slane %v8727_v6, 1 }
 0x384   : > { %v3693_v53 = vrot.slane %v3691_v54, 7  ;;  %v4425_v33 = vsel %vm1701_vm3, %v4393_v10, %v4202_v45 }
 0x385   : > { %v8775_v58 = vpop.permute.xlu0 %3740  ;;  %v4458_v46 = vsel %vm4456_vm14, %v4425_v33, %v4234_v59 }
 0x386   : > { %4303 = vrot.lane.b32.xlu0 %v8778_v4, %s6222_s29  ;;  %v5739_v19 = vpop.f32.mrb[60].mxu0 }
 0x387   : > { %4117 = vrot.lane.b32.xlu1 %v8654_v7, %s6224_s15  ;;  %v5740_v0 = vpop.f32.mrb[61].mxu0  ;;  %v8787_v44 = vpop.permute.xlu1 %3742 }
 0x388   : > { %v5741_v55 = vadd.f32 %v5740_v0, %v5739_v19  ;;  %v5742_v42 = vpop.f32.mrb[62].mxu0  ;;  %v3696_v19 = vor.u32 %v3694_v38, %v3693_v53  ;;  %v4060_v38 = vrot.slane %v8714_v21, 1  ;;  %v4490_v0 = vsel %vm1732_vm4, %v4458_v46, %v4266_v3  ;;  %v10774_v46 = vld [vmem:[#allocation65_spill] sm:$0xff] }
 0x389   : > { %3199 = vmatmul.mubr.bf16.vlgmr.msra.gmra.mrb[88].mxu1 %v2350_v60  ;;  %v2196_v30 = vpop.permute.xlu0 %2195  ;;  %v5743_v5 = vpop.f32.mrb[63].mxu0 }
 0x38a   : > { %v8794_v2 = vadd.f32 %v5741_v55, %v8716_v62  ;;  %v5744_v7 = vadd.f32 %v5743_v5, %v5742_v42  ;;  %4147 = vrot.lane.b32.xlu0 %v8731_v36, %s6220_s21  ;;  %3206 = vmatprep.mubr.bf16.mxu1 %v10768_v52  ;;  %v8808_v62 = vsel %vm8127_vm11, 0, %v8554_v41  ;;  %v10770_v52 = vld [vmem:[#allocation66_spill] sm:$0xff]  ;;  %v8829_v10 = vsel %vm1017_vm7, %v4060_v38, %v4061_v22  ;;  %v10775_v38 = vld [vmem:[#allocation68_spill] sm:$0xff] }
 0x38b   : > { %4179 = vrot.lane.b32.xlu1 %v8714_v21, %s6225_s23  ;;  %v4110_v63 = vpop.permute.xlu1 %4109  ;;  %v2274_v45 = vsel %vm1670_vm2, %v10770_v52, %v8483_v50  ;;  %v3910_v59 = vshll.u32 %v8808_v62, 16  ;;  %v10771_v42 = vld [vmem:[#allocation110_spill] sm:$0xff]  ;;  %v3908_v22 = vshrl.u32 %v8808_v62, 16 }
 0x38c   : > { %10767 = vst [vmem:[#allocation70_spill] sm:$0xff] %v8794_v2  ;;  %v8803_v54 = vadd.f32 %v5744_v7, %v8733_v18  ;;  %v8820_v18 = vsel %vm8127_vm11, %v8624_v28, 0  ;;  %v2320_v41 = vsel %vm1701_vm3, %v2274_v45, %v2196_v30  ;;  %v10772_v30 = vld [vmem:[#allocation92_spill] sm:$0xff] }
 0x38d   : > { %v2228_v35 = vpop.permute.xlu0 %2227  ;;  %v3915_v28 = vshll.u32 %v8820_v18, 16  ;;  %v3912_v3 = vrot.slane %v3910_v59, 1 }
 0x38e   : > { %10769 = vst [vmem:[#allocation101_spill] sm:$0xff] %v8803_v54  ;;  %4211 = vrot.lane.b32.xlu0 %v8778_v4, %s6219_s20  ;;  %v2353_v50 = vsel %vm1732_vm4, %v2320_v41, %v2228_v35  ;;  %v10773_v35 = vld [vmem:[#allocation88_spill] sm:$0xff]  ;;  %v2277_v41 = vsel %vm1670_vm2, %v10774_v46, %v8543_v61  ;;  %v8881_v46 = vsel %vm8127_vm11, 0, %v8612_v39 }
 0x38f   : > { %3760 = vrot.lane.b32.xlu1 %v3696_v19, %s6223_s8  ;;  %v4172_v6 = vpop.permute.xlu1 %4171  ;;  %v3917_v33 = vrot.slane %v3915_v28, 1  ;;  %v3913_v52 = vor.u32 %v3912_v3, %v3908_v22 }
 0x391   : > { %3207 = vmatmul.mubr.bf16.gmra.mrb[92].mxu1 %v2353_v50  ;;  %v4296_v60 = vpop.permute.xlu0 %4295  ;;  %v4331_v50 = vsel %vm4327_vm12, %v10775_v38, %v4110_v63 }
 0x392   : > { %v4522_v55 = vsel %vm4520_vm15, %v4490_v0, %v4296_v60  ;;  %4243 = vrot.lane.b32.xlu0 %v8829_v10, %s6223_s8  ;;  %3214 = vmatprep.mubr.bf16.mxu1 %v10771_v42  ;;  %v10776_v60 = vld [vmem:[#allocation55_spill] sm:$0xff] }
 0x393   : > { %2205 = vrot.lane.b32.xlu1 %v10772_v30, %s6219_s20  ;;  %4723 = vmatmul.mubr.bf16.vlgmr.msra.gmra.mrb[104].mxu0 %v4522_v55  ;;  %v8838_v5 = vpop.permute.xlu1 %3744  ;;  %v3698_v28 = vshrl.u32 %v10776_v60, 16 }
 0x394   : > { %5530 = vmatprep.mubr.msk.bf16.mxu0 %vm4327_vm12, %v8411_v40  ;;  %v8852_v40 = vsel %vm840_vm8, %v3913_v52, %v3917_v33 }
 0x395   : > { %v4140_v7 = vpop.permute.xlu0 %4139  ;;  %v3700_v33 = vrot.slane %v3698_v28, 7 }
 0x396   : > { %4275 = vrot.lane.b32.xlu0 %v8808_v62, %s6221_s22  ;;  %v4362_v55 = vsel %vm1670_vm2, %v4331_v50, %v4140_v7  ;;  %v3701_v7 = vshll.u32 %v10776_v60, 16  ;;  %v4063_v50 = vrot.slane %v8808_v62, 1  ;;  %v3826_v60 = vsel %vm8127_vm11, %v8673_v56, 0 }
 0x397   : > { %2237 = vrot.lane.b32.xlu1 %v10773_v35, %s6221_s22  ;;  %v2198_v19 = vpop.permute.xlu1 %2197  ;;  %v4395_v63 = vsel %vm4391_vm13, %v4362_v55, %v4172_v6  ;;  %v3922_v55 = vshll.u32 %v8881_v46, 16 }
 0x398   : > { %v2322_v59 = vsel %vm1701_vm3, %v2277_v41, %v2198_v19  ;;  %v4064_v19 = vrot.slane %v8820_v18, 1  ;;  %v3703_v38 = vor.u32 %v3701_v7, %v3700_v33 }
 0x399   : > { %v4204_v45 = vpop.permute.xlu0 %4203 }
 0x39a   : > { %3762 = vrot.lane.b32.xlu0 %v3693_v53, %s6223_s8  ;;  %v10777_v53 = vld [vmem:[#allocation75_spill] sm:$0xff]  ;;  %v4427_v30 = vsel %vm1701_vm3, %v4395_v63, %v4204_v45  ;;  %v8893_v28 = vsel %vm1017_vm7, %v4063_v50, %v4064_v19  ;;  %v3924_v63 = vrot.slane %v3922_v55, 1 }
 0x39b   : > { %4305 = vrot.lane.b32.xlu1 %v8852_v40, %s6222_s29  ;;  %v2230_v0 = vpop.permute.xlu1 %2229 }
 0x39c   : > { %v2356_v61 = vsel %vm1732_vm4, %v2322_v59, %v2230_v0 }
 0x39d   : > { %v4236_v42 = vpop.permute.xlu0 %4235  ;;  %3215 = vmatmul.mubr.bf16.gmra.mrb[96].mxu1 %v2356_v61  ;;  %v3927_v61 = vshll.u32 %v3826_v60, 16 }
 0x39e   : > { %4119 = vrot.lane.b32.xlu0 %v8778_v4, %s6224_s15  ;;  %3222 = vmatprep.mubr.bf16.mxu1 %v10777_v53  ;;  %v4460_v22 = vsel %vm4456_vm14, %v4427_v30, %v4236_v42  ;;  %v10778_v42 = vld [vmem:[#allocation103_spill] sm:$0xff] }
 0x39f   : > { %4149 = vrot.lane.b32.xlu1 %v8829_v10, %s6220_s21  ;;  %v4298_v3 = vpop.permute.xlu1 %4297 }
 0x3a1   : > { %v4268_v35 = vpop.permute.xlu0 %4267 }
 0x3a2   : > { %v4492_v4 = vsel %vm1732_vm4, %v4460_v22, %v4268_v35  ;;  %4181 = vrot.lane.b32.xlu0 %v8808_v62, %s6225_s23  ;;  %v5639_v6 = vpop.f32.mrb[36].mxu1  ;;  %v3929_v22 = vrot.slane %v3927_v61, 1 }
 0x3a3   : > { %4213 = vrot.lane.b32.xlu1 %v8852_v40, %s6219_s20  ;;  %v4525_v52 = vsel %vm4520_vm15, %v4492_v4, %v4298_v3  ;;  %v5640_v45 = vpop.f32.mrb[37].mxu1  ;;  %v3920_v4 = vshrl.u32 %v8881_v46, 16 }
 0x3a4   : > { %4731 = vmatmul.mubr.bf16.gmra.mrb[108].mxu0 %v4525_v52  ;;  %v5641_v41 = vadd.f32 %v5640_v45, %v5639_v6  ;;  %v5642_v18 = vpop.f32.mrb[38].mxu1  ;;  %v10779_v52 = vld [vmem:[#allocation96_spill] sm:$0xff] }
 0x3a5   : > { %5531 = vmatprep.mubr.msk.bf16.mxu0 %vm4327_vm12, %v8600_v12  ;;  %v8886_v59 = vpop.permute.xlu0 %3746  ;;  %v5643_v0 = vpop.f32.mrb[39].mxu1 }
 0x3a6   : > { %3764 = vrot.lane.b32.xlu0 %v3703_v38, %s6223_s8  ;;  %v5644_v39 = vadd.f32 %v5643_v0, %v5642_v18  ;;  %v3925_v0 = vor.u32 %v3924_v63, %v3920_v4 }
 0x3a7   : > { %4245 = vrot.lane.b32.xlu1 %v8893_v28, %s6223_s8 }
 0x3a9   : > { %v8898_v12 = vpop.permute.xlu0 %4111 }
 0x3aa   : > { %2207 = vrot.lane.b32.xlu0 %v10778_v42, %s6219_s20  ;;  %v5645_v53 = vpop.f32.mrb[40].mxu1 }
 0x3ab   : > { %4277 = vrot.lane.b32.xlu1 %v8881_v46, %s6221_s22  ;;  %v5646_v56 = vpop.f32.mrb[41].mxu1  ;;  %v5745_v3 = vpop.f32.mrb[64].mxu0 }
 0x3ac   : > { %v8904_v30 = vadd.f32 %v5646_v56, %v5645_v53  ;;  %v5648_v7 = vpop.f32.mrb[42].mxu1  ;;  %v5746_v19 = vpop.f32.mrb[65].mxu0  ;;  %v3930_v53 = vsel %vm840_vm8, %v3925_v0, %v3929_v22  ;;  %v4067_v22 = vrot.slane %v3826_v60, 1  ;;  %v4066_v60 = vrot.slane %v8881_v46, 1 }
 0x3ad   : > { %v8906_v35 = vpop.permute.xlu0 %4173  ;;  %v5747_v6 = vadd.f32 %v5746_v19, %v5745_v3  ;;  %v5649_v45 = vpop.f32.mrb[43].mxu1 }
 0x3ae   : > { %2239 = vrot.lane.b32.xlu0 %v10779_v52, %s6221_s22  ;;  %v5748_v18 = vpop.f32.mrb[66].mxu0  ;;  %v8911_v38 = vadd.f32 %v5649_v45, %v5648_v7  ;;  %v10783_v52 = vld [vmem:[#allocation84_spill] sm:$0xff] }
 0x3af   : > { %3766 = vrot.lane.b32.xlu1 %v3700_v33, %s6223_s8  ;;  %v5749_v50 = vpop.f32.mrb[67].mxu0  ;;  %v8915_v55 = vadd.f32 %v5747_v6, %v8756_v37  ;;  %v4142_v33 = vpop.permute.xlu1 %4141  ;;  %v8929_v37 = vsel %vm8127_vm11, 0, %v8661_v51  ;;  %v2280_v45 = vsel %vm1670_vm2, %v10783_v52, %v8532_v25 }
 0x3b0   : > { %v5750_v61 = vadd.f32 %v5749_v50, %v5748_v18  ;;  %v3934_v18 = vshll.u32 %v8929_v37, 16 }
 0x3b1   : > { %10780 = vst [vmem:[#allocation43_spill] sm:$0xff] %v8915_v55  ;;  %v8917_v42 = vpop.permute.xlu0 %3748 }
 0x3b2   : > { %v8921_v56 = vadd.f32 %v5750_v61, %v8764_v27  ;;  %4307 = vrot.lane.b32.xlu0 %v3930_v53, %s6222_s29  ;;  %v8953_v61 = vsel %vm1017_vm7, %v4066_v60, %v4067_v22 }
 0x3b3   : > { %4121 = vrot.lane.b32.xlu1 %v8852_v40, %s6224_s15  ;;  %v5751_v3 = vpop.f32.mrb[68].mxu0  ;;  %v8936_v40 = vsel %vm8127_vm11, %v8745_v48, 0 }
 0x3b4   : > { %10781 = vst [vmem:[#allocation79_spill] sm:$0xff] %v8921_v56  ;;  %v5752_v7 = vpop.f32.mrb[69].mxu0 }
 0x3b5   : > { %v2200_v63 = vpop.permute.xlu0 %2199  ;;  %v5753_v19 = vadd.f32 %v5752_v7, %v5751_v3  ;;  %v5754_v4 = vpop.f32.mrb[70].mxu0 }
 0x3b6   : > { %4151 = vrot.lane.b32.xlu0 %v8893_v28, %s6220_s21  ;;  %v5755_v27 = vpop.f32.mrb[71].mxu0  ;;  %v2324_v50 = vsel %vm1701_vm3, %v2280_v45, %v2200_v63  ;;  %v4206_v7 = vpop.permute.xlu1 %4205  ;;  %v10785_v63 = vld [vmem:[#allocation117_spill] sm:$0xff]  ;;  %v10786_v45 = vld [vmem:[#allocation38_spill] sm:$0xff] }
 0x3b7   : > { %v8938_v6 = vadd.f32 %v5753_v19, %v5641_v41  ;;  %4183 = vrot.lane.b32.xlu1 %v8881_v46, %s6225_s23  ;;  %v5756_v51 = vadd.f32 %v5755_v27, %v5754_v4  ;;  %v3939_v41 = vshll.u32 %v8936_v40, 16  ;;  %v3936_v19 = vrot.slane %v3934_v18, 1  ;;  %v10787_v18 = vld [vmem:[#allocation98_spill] sm:$0xff] }
 0x3b8   : > { %v4333_v60 = vsel %vm4327_vm12, %v10786_v45, %v8898_v12 }
 0x3b9   : > { %10782 = vst [vmem:[#allocation85_spill] sm:$0xff] %v8938_v6  ;;  %v8948_v0 = vadd.f32 %v5756_v51, %v5644_v39  ;;  %v2232_v48 = vpop.permute.xlu0 %2231  ;;  %v3941_v27 = vrot.slane %v3939_v41, 1  ;;  %v3932_v51 = vshrl.u32 %v8929_v37, 16  ;;  %v4364_v41 = vsel %vm1670_vm2, %v4333_v60, %v4142_v33 }
 0x3ba   : > { %4215 = vrot.lane.b32.xlu0 %v3930_v53, %s6219_s20  ;;  %v2359_v3 = vsel %vm1732_vm4, %v2324_v50, %v2232_v48  ;;  %v4238_v50 = vpop.permute.xlu1 %4237  ;;  %v8997_v33 = vsel %vm8127_vm11, 0, %v8775_v58 }
 0x3bb   : > { %10784 = vst [vmem:[#allocation106_spill] sm:$0xff] %v8948_v0  ;;  %4247 = vrot.lane.b32.xlu1 %v8953_v61, %s6223_s8  ;;  %3223 = vmatmul.mubr.bf16.gmra.mrb[100].mxu1 %v2359_v3  ;;  %v8958_v25 = vpop.f32.mrb[72].mxu0  ;;  %v3937_v52 = vor.u32 %v3936_v19, %v3932_v51 }
 0x3bc   : > { %3230 = vmatprep.mubr.bf16.mxu1 %v10785_v63  ;;  %v8961_v39 = vpop.f32.mrb[73].mxu0  ;;  %v4397_v63 = vsel %vm4391_vm13, %v4364_v41, %v8906_v35  ;;  %v4070_v35 = vrot.slane %v8936_v40, 1  ;;  %v4069_v40 = vrot.slane %v8929_v37, 1  ;;  %v3946_v41 = vshll.u32 %v8997_v33, 16 }
 0x3bd   : > { %v8963_v4 = vpop.f32.mrb[74].mxu0  ;;  %v3942_v48 = vsel %vm840_vm8, %v3937_v52, %v3941_v27  ;;  %v4429_v27 = vsel %vm1701_vm3, %v4397_v63, %v4206_v7 }
 0x3be   : > { %2209 = vrot.lane.b32.xlu0 %v10740_v17, %s6219_s20  ;;  %v8967_v22 = vpop.f32.mrb[75].mxu0  ;;  %v4462_v45 = vsel %vm4456_vm14, %v4429_v27, %v4238_v50 }
 0x3bf   : > { %4279 = vrot.lane.b32.xlu1 %v8929_v37, %s6221_s22 }
 0x3c2   : > { %2241 = vrot.lane.b32.xlu0 %v10787_v18, %s6221_s22 }
 0x3c3   : > { %4309 = vrot.lane.b32.xlu1 %v3942_v48, %s6222_s29  ;;  %v8979_v17 = vpop.f32.mrb[76].mxu0 }
 0x3c4   : > { %v8982_v3 = vpop.f32.mrb[77].mxu0 }
 0x3c5   : > { %v4270_v19 = vpop.permute.xlu1 %4269  ;;  %v8986_v51 = vpop.f32.mrb[78].mxu0 }
 0x3c6   : > { %4123 = vrot.lane.b32.xlu0 %v3930_v53, %s6224_s15  ;;  %v8989_v12 = vpop.f32.mrb[79].mxu0  ;;  %v9007_v53 = vsel %vm8127_vm11, %v8787_v44, 0  ;;  %v4494_v58 = vsel %vm1732_vm4, %v4462_v45, %v4270_v19  ;;  %v9025_v19 = vsel %vm1017_vm7, %v4069_v40, %v4070_v35 }
 0x3c7   : > { %4153 = vrot.lane.b32.xlu1 %v8953_v61, %s6220_s21  ;;  %v3951_v50 = vshll.u32 %v9007_v53, 16 }
 0x3c9   : > { %v8999_v52 = vpop.permute.xlu1 %3750  ;;  %v3953_v6 = vrot.slane %v3951_v50, 1 }
 0x3ca   : > { %4185 = vrot.lane.b32.xlu0 %v8929_v37, %s6225_s23 }
 0x3cb   : > { %4217 = vrot.lane.b32.xlu1 %v3942_v48, %s6219_s20  ;;  %v9011_v7 = vpop.f32.mrb[80].mxu0 }
 0x3cc   : > { %10788 = vst [vmem:[#allocation78_spill] sm:$0xff] %v9011_v7  ;;  %v4300_v60 = vpop.permute.xlu0 %4299  ;;  %v9014_v18 = vpop.f32.mrb[81].mxu0 }
 0x3cd   : > { %10789 = vst [vmem:[#allocation121_spill] sm:$0xff] %v9014_v18  ;;  %v4114_v63 = vpop.permute.xlu1 %4113  ;;  %v4528_v0 = vsel %vm4520_vm15, %v4494_v58, %v4300_v60  ;;  %v9019_v44 = vpop.f32.mrb[82].mxu0  ;;  %v3948_v58 = vrot.slane %v3946_v41, 1  ;;  %v10795_v41 = vld [vmem:[#allocation108_spill] sm:$0xff] }
 0x3ce   : > { %10790 = vst [vmem:[#allocation99_spill] sm:$0xff] %v9019_v44  ;;  %2179 = vrot.lane.b32.xlu0 %v10736_v26, %s6220_s21  ;;  %4739 = vmatmul.mubr.bf16.gmra.mrb[112].mxu0 %v4528_v0  ;;  %v9027_v27 = vpop.f32.mrb[83].mxu0  ;;  %v3944_v26 = vshrl.u32 %v8997_v33, 16 }
 0x3cf   : > { %10791 = vst [vmem:[#allocation107_spill] sm:$0xff] %v9027_v27  ;;  %4249 = vrot.lane.b32.xlu1 %v9025_v19, %s6223_s8  ;;  %5532 = vmatprep.mubr.msk.bf16.mxu0 %vm4327_vm12, %v8731_v36 }
 0x3d0   : > { %v4144_v45 = vpop.permute.xlu0 %4143  ;;  %v3949_v56 = vor.u32 %v3948_v58, %v3944_v26  ;;  %v10797_v58 = vld [vmem:[#allocation57_spill] sm:$0xff] }
 0x3d1   : > { %v4176_v60 = vpop.permute.xlu1 %4175  ;;  %v4335_v26 = vsel %vm4327_vm12, %v10797_v58, %v4114_v63 }
 0x3d2   : > { %2211 = vrot.lane.b32.xlu0 %v10746_v47, %s6219_s20  ;;  %v9049_v47 = vsel %vm840_vm8, %v3949_v56, %v3953_v6  ;;  %v4366_v56 = vsel %vm1670_vm2, %v4335_v26, %v4144_v45  ;;  %v4073_v26 = vrot.slane %v9007_v53, 1 }
 0x3d3   : > { %4281 = vrot.lane.b32.xlu1 %v8997_v33, %s6221_s22  ;;  %v9038_v0 = vpop.f32.mrb[84].mxu0 }
 0x3d4   : > { %10792 = vst [vmem:[#allocation50_spill] sm:$0xff] %v9038_v0  ;;  %v4208_v35 = vpop.permute.xlu0 %4207  ;;  %v9040_v40 = vpop.f32.mrb[85].mxu0 }
 0x3d5   : > { %10793 = vst [vmem:[#allocation115_spill] sm:$0xff] %v9040_v40  ;;  %v9042_v55 = vpop.permute.xlu1 %3752  ;;  %v9044_v36 = vpop.f32.mrb[86].mxu0 }
 0x3d6   : > { %10794 = vst [vmem:[#allocation112_spill] sm:$0xff] %v9044_v36  ;;  %2243 = vrot.lane.b32.xlu0 %v10795_v41, %s6221_s22  ;;  %v9051_v50 = vpop.f32.mrb[87].mxu0 }
 0x3d7   : > { %10796 = vst [vmem:[#allocation114_spill] sm:$0xff] %v9051_v50  ;;  %4311 = vrot.lane.b32.xlu1 %v9049_v47, %s6222_s29  ;;  %v10799_v50 = vld [vmem:[#allocation83_spill] sm:$0xff] }
 0x3d8   : > { %v5651_v54 = vpop.f32.mrb[44].mxu1  ;;  %v4240_v0 = vpop.permute.xlu0 %4239  ;;  %v2283_v7 = vsel %vm1670_vm2, %v10799_v50, %v8597_v32 }
 0x3d9   : > { %v5652_v2 = vpop.f32.mrb[45].mxu1  ;;  %v2202_v40 = vpop.permute.xlu1 %2201 }
 0x3da   : > { %v9057_v44 = vadd.f32 %v5652_v2, %v5651_v54  ;;  %v5654_v36 = vpop.f32.mrb[46].mxu1  ;;  %4125 = vrot.lane.b32.xlu0 %v3942_v48, %s6224_s15  ;;  %v9075_v54 = vsel %vm8127_vm11, 0, %v8838_v5  ;;  %v2326_v48 = vsel %vm1701_vm3, %v2283_v7, %v2202_v40  ;;  %v9090_v5 = vsel %vm8127_vm11, %v8886_v59, 0  ;;  %v10803_v40 = vld [vmem:[#allocation87_spill] sm:$0xff] }
 0x3db   : > { %v5655_v6 = vpop.f32.mrb[47].mxu1  ;;  %4155 = vrot.lane.b32.xlu1 %v9025_v19, %s6220_s21  ;;  %v9063_v41 = vpop.f32.mrb[88].mxu0 }
 0x3dc   : > { %10798 = vst [vmem:[#allocation76_spill] sm:$0xff] %v9063_v41  ;;  %v9068_v27 = vadd.f32 %v5655_v6, %v5654_v36  ;;  %v4272_v63 = vpop.permute.xlu0 %4271  ;;  %v9070_v2 = vpop.f32.mrb[89].mxu0  ;;  %v4399_v41 = vsel %vm4391_vm13, %v4366_v56, %v4176_v60  ;;  %v4072_v56 = vrot.slane %v8997_v33, 1  ;;  %v3958_v6 = vshll.u32 %v9075_v54, 16 }
 0x3dd   : > { %10800 = vst [vmem:[#allocation86_spill] sm:$0xff] %v9070_v2  ;;  %v2234_v45 = vpop.permute.xlu1 %2233  ;;  %v9078_v58 = vpop.f32.mrb[90].mxu0  ;;  %v4431_v7 = vsel %vm1701_vm3, %v4399_v41, %v4208_v35  ;;  %v3963_v35 = vshll.u32 %v9090_v5, 16 }
 0x3de   : > { %10801 = vst [vmem:[#allocation124_spill] sm:$0xff] %v9078_v58  ;;  %4187 = vrot.lane.b32.xlu0 %v8997_v33, %s6225_s23  ;;  %v2362_v32 = vsel %vm1732_vm4, %v2326_v48, %v2234_v45  ;;  %v9085_v36 = vpop.f32.mrb[91].mxu0  ;;  %v4464_v53 = vsel %vm4456_vm14, %v4431_v7, %v4240_v0  ;;  %v9108_v0 = vsel %vm1017_vm7, %v4072_v56, %v4073_v26 }
 0x3df   : > { %10802 = vst [vmem:[#allocation120_spill] sm:$0xff] %v9085_v36  ;;  %4219 = vrot.lane.b32.xlu1 %v9049_v47, %s6219_s20  ;;  %3231 = vmatmul.mubr.bf16.gmra.mrb[104].mxu1 %v2362_v32  ;;  %v4496_v59 = vsel %vm1732_vm4, %v4464_v53, %v4272_v63 }
 0x3e0   : > { %v5657_v60 = vpop.f32.mrb[48].mxu1  ;;  %3238 = vmatprep.mubr.bf16.mxu1 %v10803_v40  ;;  %v9097_v50 = vpop.permute.xlu0 %3754 }
 0x3e1   : > { %v5658_v48 = vpop.f32.mrb[49].mxu1  ;;  %v4302_v45 = vpop.permute.xlu1 %4301 }
 0x3e2   : > { %v9103_v41 = vadd.f32 %v5658_v48, %v5657_v60  ;;  %v5660_v32 = vpop.f32.mrb[50].mxu1  ;;  %2181 = vrot.lane.b32.xlu0 %v10741_v24, %s6220_s21  ;;  %v4531_v7 = vsel %vm4520_vm15, %v4496_v59, %v4302_v45  ;;  %v3960_v24 = vrot.slane %v3958_v6, 1  ;;  %v3965_v59 = vrot.slane %v3963_v35, 1 }
 0x3e3   : > { %v5661_v40 = vpop.f32.mrb[51].mxu1  ;;  %4251 = vrot.lane.b32.xlu1 %v9108_v0, %s6223_s8  ;;  %4747 = vmatmul.mubr.bf16.gmra.mrb[116].mxu0 %v4531_v7  ;;  %v9113_v63 = vpop.f32.mrb[92].mxu0  ;;  %v3956_v7 = vshrl.u32 %v9075_v54, 16 }
 0x3e4   : > { %10804 = vst [vmem:[#allocation123_spill] sm:$0xff] %v9113_v63  ;;  %v9115_v53 = vadd.f32 %v5661_v40, %v5660_v32  ;;  %5533 = vmatprep.mubr.msk.bf16.mxu0 %vm4327_vm12, %v8829_v10  ;;  %v4116_v60 = vpop.permute.xlu0 %4115  ;;  %v9119_v48 = vpop.f32.mrb[93].mxu0  ;;  %v10808_v63 = vld [vmem:[#allocation105_spill] sm:$0xff] }
 0x3e5   : > { %10805 = vst [vmem:[#allocation81_spill] sm:$0xff] %v9119_v48  ;;  %v4146_v26 = vpop.permute.xlu1 %4145  ;;  %v9121_v56 = vpop.f32.mrb[94].mxu0  ;;  %v3961_v10 = vor.u32 %v3960_v24, %v3956_v7  ;;  %v9153_v7 = vsel %vm8127_vm11, 0, %v8917_v42 }
 0x3e6   : > { %10806 = vst [vmem:[#allocation49_spill] sm:$0xff] %v9121_v56  ;;  %2213 = vrot.lane.b32.xlu0 %v10748_v20, %s6219_s20  ;;  %v9125_v45 = vpop.f32.mrb[95].mxu0 }
 0x3e7   : > { %10807 = vst [vmem:[#allocation72_spill] sm:$0xff] %v9125_v45  ;;  %4283 = vrot.lane.b32.xlu1 %v9075_v54, %s6221_s22  ;;  %v3966_v6 = vsel %vm840_vm8, %v3961_v10, %v3965_v59 }
 0x3e8   : > { %v4178_v32 = vpop.permute.xlu0 %4177 }
 0x3e9   : > { %v4210_v40 = vpop.permute.xlu1 %4209 }
 0x3ea   : > { %2245 = vrot.lane.b32.xlu0 %v10808_v63, %s6221_s22  ;;  %v4337_v63 = vsel %vm4327_vm12, %v8478_v11, %v4116_v60  ;;  %v9165_v60 = vsel %vm8127_vm11, %v8999_v52, 0 }
 0x3eb   : > { %4313 = vrot.lane.b32.xlu1 %v3966_v6, %s6222_s29  ;;  %v9134_v35 = vpop.f32.mrb[96].mxu0 }
 0x3ec   : > { %10809 = vst [vmem:[#allocation89_spill] sm:$0xff] %v9134_v35  ;;  %v9136_v20 = vpop.permute.xlu0 %3756  ;;  %v9138_v56 = vpop.f32.mrb[97].mxu0  ;;  %v4368_v35 = vsel %vm1670_vm2, %v4337_v63, %v4146_v26  ;;  %v4075_v63 = vrot.slane %v9075_v54, 1 }
 0x3ed   : > { %10810 = vst [vmem:[#allocation25_spill] sm:$0xff] %v9138_v56  ;;  %v4242_v45 = vpop.permute.xlu1 %4241  ;;  %v9140_v48 = vpop.f32.mrb[98].mxu0  ;;  %v4401_v42 = vsel %vm4391_vm13, %v4368_v35, %v4178_v32  ;;  %v3970_v56 = vshll.u32 %v9153_v7, 16  ;;  %v3975_v32 = vshll.u32 %v9165_v60, 16 }
 0x3ee   : > { %10811 = vst [vmem:[#allocation94_spill] sm:$0xff] %v9140_v48  ;;  %4127 = vrot.lane.b32.xlu0 %v9049_v47, %s6224_s15  ;;  %v9144_v24 = vpop.f32.mrb[99].mxu0  ;;  %v4076_v48 = vrot.slane %v9090_v5, 1  ;;  %v10813_v47 = vld [vmem:[#allocation93_spill] sm:$0xff]  ;;  %v4433_v35 = vsel %vm1701_vm3, %v4401_v42, %v4210_v40 }
 0x3ef   : > { %10812 = vst [vmem:[#allocation100_spill] sm:$0xff] %v9144_v24  ;;  %4157 = vrot.lane.b32.xlu1 %v9108_v0, %s6220_s21  ;;  %v2286_v11 = vsel %vm1670_vm2, %v10813_v47, %v8585_v16  ;;  %v3972_v40 = vrot.slane %v3970_v56, 1  ;;  %v10819_v56 = vld [vmem:[#allocation77_spill] sm:$0xff] }
 0x3f0   : > { %v2204_v59 = vpop.permute.xlu0 %2203 }
 0x3f1   : > { %v4274_v10 = vpop.permute.xlu1 %4273  ;;  %v2328_v5 = vsel %vm1701_vm3, %v2286_v11, %v2204_v59  ;;  %v9186_v59 = vsel %vm1017_vm7, %v4075_v63, %v4076_v48  ;;  %v3968_v48 = vshrl.u32 %v9153_v7, 16 }
 0x3f2   : > { %4189 = vrot.lane.b32.xlu0 %v9075_v54, %s6225_s23 }
 0x3f3   : > { %4221 = vrot.lane.b32.xlu1 %v3966_v6, %s6219_s20  ;;  %v9169_v24 = vpop.f32.mrb[100].mxu0 }
 0x3f4   : > { %10814 = vst [vmem:[#allocation90_spill] sm:$0xff] %v9169_v24  ;;  %v2236_v26 = vpop.permute.xlu0 %2235  ;;  %v9174_v58 = vpop.f32.mrb[101].mxu0  ;;  %v4466_v24 = vsel %vm4456_vm14, %v4433_v35, %v4242_v45 }
 0x3f5   : > { %10815 = vst [vmem:[#allocation60_spill] sm:$0xff] %v9174_v58  ;;  %v9176_v16 = vpop.permute.xlu1 %3758  ;;  %v2365_v52 = vsel %vm1732_vm4, %v2328_v5, %v2236_v26  ;;  %v9179_v47 = vpop.f32.mrb[102].mxu0  ;;  %v10818_v5 = vld [vmem:[#allocation95_spill] sm:$0xff]  ;;  %v4498_v26 = vsel %vm1732_vm4, %v4466_v24, %v4274_v10  ;;  %v3973_v24 = vor.u32 %v3972_v40, %v3968_v48 }
 0x3f6   : > { %10816 = vst [vmem:[#allocation56_spill] sm:$0xff] %v9179_v47  ;;  %2183 = vrot.lane.b32.xlu0 %v10745_v9, %s6220_s21  ;;  %3239 = vmatmul.mubr.bf16.gmra.mrb[108].mxu1 %v2365_v52  ;;  %v9188_v11 = vpop.f32.mrb[103].mxu0  ;;  %v3977_v52 = vrot.slane %v3975_v32, 1 }
 0x3f7   : > { %10817 = vst [vmem:[#allocation109_spill] sm:$0xff] %v9188_v11  ;;  %4253 = vrot.lane.b32.xlu1 %v9186_v59, %s6223_s8  ;;  %3246 = vmatprep.mubr.bf16.mxu1 %v10818_v5 }
 0x3f8   : > { %v4304_v47 = vpop.permute.xlu0 %4303  ;;  %v9206_v63 = vsel %vm840_vm8, %v3973_v24, %v3977_v52  ;;  %v10821_v24 = vld [vmem:[#allocation91_spill] sm:$0xff] }
 0x3f9   : > { %v4118_v42 = vpop.permute.xlu1 %4117  ;;  %v4534_v9 = vsel %vm4520_vm15, %v4498_v26, %v4304_v47 }
 0x3fa   : > { %2215 = vrot.lane.b32.xlu0 %v10751_v14, %s6219_s20  ;;  %4755 = vmatmul.mubr.bf16.gmra.mrb[120].mxu0 %v4534_v9  ;;  %v4339_v26 = vsel %vm4327_vm12, %v8569_v57, %v4118_v42 }
 0x3fb   : > { %4285 = vrot.lane.b32.xlu1 %v9153_v7, %s6221_s22  ;;  %5534 = vmatprep.mubr.msk.bf16.mxu0 %vm4327_vm12, %v8893_v28 }
 0x3fc   : > { %v4148_v45 = vpop.permute.xlu0 %4147 }
 0x3fd   : > { %v4180_v10 = vpop.permute.xlu1 %4179  ;;  %v4370_v52 = vsel %vm1670_vm2, %v4339_v26, %v4148_v45 }
 0x3fe   : > { %2247 = vrot.lane.b32.xlu0 %v10819_v56, %s6221_s22  ;;  %v2289_v56 = vsel %vm1670_vm2, %v10821_v24, %v8647_v15  ;;  %v9241_v15 = vsel %vm8127_vm11, 0, %v9042_v55 }
 0x3ff   : > { %4315 = vrot.lane.b32.xlu1 %v9206_v63, %s6222_s29 }
 0x400   : > { %v4212_v14 = vpop.permute.xlu0 %4211 }
 0x401   : > { %v9210_v47 = vpop.permute.xlu1 %3760 }
 0x402   : > { %4129 = vrot.lane.b32.xlu0 %v3966_v6, %s6224_s15  ;;  %v10820_v6 = vld [vmem:[#allocation128_spill] sm:$0xff] }
 0x403   : > { %4159 = vrot.lane.b32.xlu1 %v9186_v59, %s6220_s21 }
 0x404   : > { %v5663_v28 = vpop.f32.mrb[52].mxu1  ;;  %v4244_v32 = vpop.permute.xlu0 %4243 }
 0x405   : > { %v5664_v35 = vpop.f32.mrb[53].mxu1  ;;  %v2206_v5 = vpop.permute.xlu1 %2205 }
 0x406   : > { %v9217_v40 = vadd.f32 %v5664_v35, %v5663_v28  ;;  %v5666_v9 = vpop.f32.mrb[54].mxu1  ;;  %4191 = vrot.lane.b32.xlu0 %v9153_v7, %s6225_s23  ;;  %v2330_v57 = vsel %vm1701_vm3, %v2289_v56, %v2206_v5  ;;  %v4079_v28 = vrot.slane %v9165_v60, 1  ;;  %v4403_v35 = vsel %vm4391_vm13, %v4370_v52, %v4180_v10  ;;  %v10822_v10 = vld [vmem:[#allocation71_spill] sm:$0xff] }
 0x407   : > { %v5667_v48 = vpop.f32.mrb[55].mxu1  ;;  %2257 = vrot.lane.b32.xlu1 %v10820_v6, %s6220_s21  ;;  %v4435_v26 = vsel %vm1701_vm3, %v4403_v35, %v4212_v14  ;;  %v4078_v52 = vrot.slane %v9153_v7, 1 }
 0x408   : > { %v9227_v11 = vadd.f32 %v5667_v48, %v5666_v9  ;;  %v4276_v58 = vpop.permute.xlu0 %4275  ;;  %v4468_v60 = vsel %vm4456_vm14, %v4435_v26, %v4244_v32 }
 0x409   : > { %v2238_v42 = vpop.permute.xlu1 %2237  ;;  %v4500_v14 = vsel %vm1732_vm4, %v4468_v60, %v4276_v58  ;;  %v9259_v32 = vsel %vm1017_vm7, %v4078_v52, %v4079_v28  ;;  %v3982_v58 = vshll.u32 %v9241_v15, 16  ;;  %v3980_v52 = vshrl.u32 %v9241_v15, 16 }
 0x40a   : > { %4223 = vrot.lane.b32.xlu0 %v9206_v63, %s6219_s20  ;;  %v2368_v45 = vsel %vm1732_vm4, %v2330_v57, %v2238_v42 }
 0x40b   : > { %2185 = vrot.lane.b32.xlu1 %v10747_v29, %s6220_s21  ;;  %3247 = vmatmul.mubr.bf16.gmra.mrb[112].mxu1 %v2368_v45  ;;  %v9252_v29 = vsel %vm8127_vm11, %v9097_v50, 0  ;;  %v3984_v28 = vrot.slane %v3982_v58, 1 }
 0x40c   : > { %v5669_v5 = vpop.f32.mrb[56].mxu1  ;;  %3254 = vmatprep.mubr.bf16.mxu1 %v10822_v10  ;;  %v9245_v9 = vpop.permute.xlu0 %3762  ;;  %v3987_v45 = vshll.u32 %v9252_v29, 16 }
 0x40d   : > { %v5670_v48 = vpop.f32.mrb[57].mxu1  ;;  %v4306_v24 = vpop.permute.xlu1 %4305 }
 0x40e   : > { %v9254_v55 = vadd.f32 %v5670_v48, %v5669_v5  ;;  %v5672_v56 = vpop.f32.mrb[58].mxu1  ;;  %2261 = vrot.lane.b32.xlu0 %v10750_v31, %s6219_s20  ;;  %v4537_v57 = vsel %vm4520_vm15, %v4500_v14, %v4306_v24  ;;  %v3989_v5 = vrot.slane %v3987_v45, 1  ;;  %v3985_v14 = vor.u32 %v3984_v28, %v3980_v52  ;;  %v10824_v45 = vld [vmem:[#allocation102_spill] sm:$0xff] }
 0x40f   : > { %v5673_v42 = vpop.f32.mrb[59].mxu1  ;;  %4255 = vrot.lane.b32.xlu1 %v9259_v32, %s6223_s8  ;;  %4763 = vmatmul.mubr.bf16.gmra.mrb[124].mxu0 %v4537_v57  ;;  %v2292_v28 = vsel %vm1670_vm2, %v10824_v45, %v8636_v23 }
 0x410   : > { %v9265_v50 = vadd.f32 %v5673_v42, %v5672_v56  ;;  %5535 = vmatprep.mubr.msk.bf16.mxu0 %vm4327_vm12, %v8953_v61  ;;  %v4120_v35 = vpop.permute.xlu0 %4119  ;;  %v10823_v61 = vld [vmem:[#allocation113_spill] sm:$0xff] }
 0x411   : > { %v4150_v26 = vpop.permute.xlu1 %4149  ;;  %v4341_v56 = vsel %vm4327_vm12, %v8714_v21, %v4120_v35 }
 0x412   : > { %2217 = vrot.lane.b32.xlu0 %v10756_v13, %s6219_s20  ;;  %v9282_v13 = vsel %vm840_vm8, %v3985_v14, %v3989_v5  ;;  %v4372_v58 = vsel %vm1670_vm2, %v4341_v56, %v4150_v26 }
 0x413   : > { %2265 = vrot.lane.b32.xlu1 %v10758_v1, %s6221_s22 }
 0x414   : > { %v4182_v60 = vpop.permute.xlu0 %4181 }
 0x415   : > { %v4214_v10 = vpop.permute.xlu1 %4213  ;;  %v4405_v5 = vsel %vm4391_vm13, %v4372_v58, %v4182_v60  ;;  %v10826_v60 = vld [vmem:[#allocation31_spill] sm:$0xff]  ;;  %v4082_v58 = vrot.slane %v9252_v29, 1  ;;  %v9325_v29 = vsel %vm8127_vm11, %v9176_v16, 0 }
 0x416   : > { %4287 = vrot.lane.b32.xlu0 %v9241_v15, %s6221_s22  ;;  %v4437_v26 = vsel %vm1701_vm3, %v4405_v5, %v4214_v10  ;;  %v9315_v10 = vsel %vm8127_vm11, 0, %v9136_v20  ;;  %v4081_v20 = vrot.slane %v9241_v15, 1  ;;  %v3999_v16 = vshll.u32 %v9325_v29, 16 }
 0x417   : > { %2249 = vrot.lane.b32.xlu1 %v10823_v61, %s6221_s22  ;;  %v10825_v61 = vld [vmem:[#allocation129_spill] sm:$0xff]  ;;  %v3992_v36 = vshrl.u32 %v9315_v10, 16 }
 0x418   : > { %v9279_v48 = vpop.permute.xlu0 %3764 }
 0x419   : > { %v4246_v24 = vpop.permute.xlu1 %4245 }
 0x41a   : > { %4317 = vrot.lane.b32.xlu0 %v9282_v13, %s6222_s29  ;;  %v4470_v23 = vsel %vm4456_vm14, %v4437_v26, %v4246_v24 }
 0x41b   : > { %4131 = vrot.lane.b32.xlu1 %v9206_v63, %s6224_s15 }
 0x41c   : > { %v2208_v57 = vpop.permute.xlu0 %2207 }
 0x41d   : > { %v4278_v42 = vpop.permute.xlu1 %4277  ;;  %v2332_v21 = vsel %vm1701_vm3, %v2292_v28, %v2208_v57 }
 0x41e   : > { %4161 = vrot.lane.b32.xlu0 %v9259_v32, %s6220_s21  ;;  %v4502_v14 = vsel %vm1732_vm4, %v4470_v23, %v4278_v42  ;;  %v9336_v23 = vsel %vm1017_vm7, %v4081_v20, %v4082_v58  ;;  %v4001_v58 = vrot.slane %v3999_v16, 1  ;;  %v10827_v20 = vld [vmem:[#allocation20_spill] sm:$0xff] }
 0x41f   : > { %4193 = vrot.lane.b32.xlu1 %v9241_v15, %s6225_s23 }
 0x420   : > { %v2240_v35 = vpop.permute.xlu0 %2239 }
 0x421   : > { %v9300_v63 = vpop.permute.xlu1 %3766  ;;  %v2371_v52 = vsel %vm1732_vm4, %v2332_v21, %v2240_v35 }
 0x422   : > { %2259 = vrot.lane.b32.xlu0 %v10825_v61, %s6220_s21  ;;  %3255 = vmatmul.mubr.bf16.gmra.mrb[116].mxu1 %v2371_v52 }
 0x423   : > { %4225 = vrot.lane.b32.xlu1 %v9282_v13, %s6219_s20  ;;  %3262 = vmatprep.mubr.bf16.mxu1 %v10826_v60 }
 0x424   : > { %v5675_v56 = vpop.f32.mrb[60].mxu1  ;;  %v4308_v57 = vpop.permute.xlu0 %4307 }
 0x425   : > { %v5676_v45 = vpop.f32.mrb[61].mxu1  ;;  %v4122_v28 = vpop.permute.xlu1 %4121  ;;  %v4540_v24 = vsel %vm4520_vm15, %v4502_v14, %v4308_v57 }
 0x426   : > { %v9318_v5 = vadd.f32 %v5676_v45, %v5675_v56  ;;  %v5678_v21 = vpop.f32.mrb[62].mxu1  ;;  %2187 = vrot.lane.b32.xlu0 %v10750_v31, %s6220_s21  ;;  %4771 = vmatmul.mubr.bf16.gmra.mrb[128].mxu0 %v4540_v24  ;;  %v3994_v31 = vshll.u32 %v9315_v10, 16 }
 0x427   : > { %v5679_v42 = vpop.f32.mrb[63].mxu1  ;;  %2263 = vrot.lane.b32.xlu1 %v8678_v49, %s6219_s20  ;;  %5536 = vmatprep.mubr.msk.bf16.mxu0 %vm4327_vm12, %v9025_v19  ;;  %v4343_v19 = vsel %vm4327_vm12, %v8808_v62, %v4122_v28 }
 0x428   : > { %v9332_v35 = vadd.f32 %v5679_v42, %v5678_v21  ;;  %v4152_v52 = vpop.permute.xlu0 %4151  ;;  %v3996_v56 = vrot.slane %v3994_v31, 1 }
 0x429   : > { %v4184_v26 = vpop.permute.xlu1 %4183  ;;  %v4374_v57 = vsel %vm1670_vm2, %v4343_v19, %v4152_v52 }
 0x42a   : > { %4257 = vrot.lane.b32.xlu0 %v9336_v23, %s6223_s8  ;;  %v3997_v31 = vor.u32 %v3996_v56, %v3992_v36 }
 0x42b   : > { %2219 = vrot.lane.b32.xlu1 %v10758_v1, %s6219_s20  ;;  %v4407_v1 = vsel %vm4391_vm13, %v4374_v57, %v4184_v26  ;;  %v10829_v26 = vld [vmem:[#allocation97_spill] sm:$0xff] }
 0x42c   : > { %v5757_v60 = vpop.f32.mrb[64].mxu1  ;;  %v4216_v14 = vpop.permute.xlu0 %4215  ;;  %v9362_v18 = vsel %vm840_vm8, %v3997_v31, %v4001_v58 }
 0x42d   : > { %v5758_v45 = vpop.f32.mrb[65].mxu1  ;;  %v4248_v24 = vpop.permute.xlu1 %4247  ;;  %v4439_v16 = vsel %vm1701_vm3, %v4407_v1, %v4216_v14 }
 0x42e   : > { %v5759_v21 = vadd.f32 %v5758_v45, %v5757_v60  ;;  %v5760_v42 = vpop.f32.mrb[66].mxu1  ;;  %2267 = vrot.lane.b32.xlu0 %v10827_v20, %s6221_s22  ;;  %v10828_v45 = vld [vmem:[#allocation126_spill] sm:$0xff] }
 0x42f   : > { %v5761_v2 = vpop.f32.mrb[67].mxu1  ;;  %4289 = vrot.lane.b32.xlu1 %v9315_v10, %s6221_s22 }
 0x430   : > { %v9353_v62 = vadd.f32 %v5759_v21, %v8904_v30  ;;  %v5762_v28 = vadd.f32 %v5761_v2, %v5760_v42  ;;  %v2210_v52 = vpop.permute.xlu0 %2209  ;;  %v2295_v30 = vsel %vm1670_vm2, %v10829_v26, %v8695_v34  ;;  %v4472_v2 = vsel %vm4456_vm14, %v4439_v16, %v4248_v24  ;;  %v10830_v24 = vld [vmem:[#allocation62_spill] sm:$0xff] }
 0x431   : > { %v4280_v19 = vpop.permute.xlu1 %4279  ;;  %v2334_v36 = vsel %vm1701_vm3, %v2295_v30, %v2210_v52 }
 0x432   : > { %v9357_v60 = vadd.f32 %v5762_v28, %v8911_v38  ;;  %2251 = vrot.lane.b32.xlu0 %v10828_v45, %s6221_s22  ;;  %v4504_v56 = vsel %vm1732_vm4, %v4472_v2, %v4280_v19  ;;  %v9385_v19 = vsel %vm8127_vm11, 0, %v9210_v47  ;;  %v4085_v45 = vrot.slane %v9325_v29, 1 }
 0x433   : > { %4319 = vrot.lane.b32.xlu1 %v9362_v18, %s6222_s29  ;;  %v4006_v29 = vshll.u32 %v9385_v19, 16 }
 0x434   : > { %v5763_v14 = vpop.f32.mrb[68].mxu1  ;;  %v2242_v38 = vpop.permute.xlu0 %2241 }
 0x435   : > { %v5764_v57 = vpop.f32.mrb[69].mxu1  ;;  %v4310_v21 = vpop.permute.xlu1 %4309  ;;  %v2374_v58 = vsel %vm1732_vm4, %v2334_v36, %v2242_v38 }
 0x436   : > { %v5765_v42 = vadd.f32 %v5764_v57, %v5763_v14  ;;  %v5766_v1 = vpop.f32.mrb[70].mxu1  ;;  %4133 = vrot.lane.b32.xlu0 %v9282_v13, %s6224_s15  ;;  %3263 = vmatmul.mubr.bf16.gmra.mrb[120].mxu1 %v2374_v58  ;;  %v4543_v34 = vsel %vm4520_vm15, %v4504_v56, %v4310_v21 }
 0x437   : > { %v5767_v28 = vpop.f32.mrb[71].mxu1  ;;  %4163 = vrot.lane.b32.xlu1 %v9336_v23, %s6220_s21  ;;  %3270 = vmatprep.mubr.bf16.mxu1 %v10830_v24  ;;  %v4004_v24 = vshrl.u32 %v9385_v19, 16 }
 0x438   : > { %v9380_v52 = vadd.f32 %v5765_v42, %v9057_v44  ;;  %v5768_v31 = vadd.f32 %v5767_v28, %v5766_v1  ;;  %4779 = vmatmul.mubr.bf16.gmra.mrb[132].mxu0 %v4543_v34  ;;  %v4124_v16 = vpop.permute.xlu0 %4123  ;;  %v9398_v44 = vsel %vm8127_vm11, %v9245_v9, 0  ;;  %v4008_v1 = vrot.slane %v4006_v29, 1 }
 0x439   : > { %5537 = vmatprep.mubr.msk.bf16.mxu0 %vm4327_vm12, %v9108_v0  ;;  %v4154_v13 = vpop.permute.xlu1 %4153  ;;  %v4084_v0 = vrot.slane %v9315_v10, 1  ;;  %v4011_v36 = vshll.u32 %v9398_v44, 16  ;;  %v4345_v57 = vsel %vm4327_vm12, %v8881_v46, %v4124_v16 }
 0x43a   : > { %v9391_v26 = vadd.f32 %v5768_v31, %v9068_v27  ;;  %4195 = vrot.lane.b32.xlu0 %v9315_v10, %s6225_s23  ;;  %v4376_v31 = vsel %vm1670_vm2, %v4345_v57, %v4154_v13 }
 0x43b   : > { %4227 = vrot.lane.b32.xlu1 %v9362_v18, %s6219_s20  ;;  %v9408_v9 = vsel %vm1017_vm7, %v4084_v0, %v4085_v45  ;;  %v4013_v28 = vrot.slane %v4011_v36, 1  ;;  %v4009_v45 = vor.u32 %v4008_v1, %v4004_v24  ;;  %v10832_v36 = vld [vmem:[#allocation111_spill] sm:$0xff] }
 0x43c   : > { %v5769_v47 = vpop.f32.mrb[72].mxu1  ;;  %v4186_v30 = vpop.permute.xlu0 %4185 }
 0x43d   : > { %v5770_v2 = vpop.f32.mrb[73].mxu1  ;;  %v4218_v27 = vpop.permute.xlu1 %4217  ;;  %v4409_v46 = vsel %vm4391_vm13, %v4376_v31, %v4186_v30  ;;  %v9456_v31 = vsel %vm8127_vm11, 0, %v9279_v48 }
 0x43e   : > { %v5771_v14 = vadd.f32 %v5770_v2, %v5769_v47  ;;  %v5772_v38 = vpop.f32.mrb[74].mxu1  ;;  %2189 = vrot.lane.b32.xlu0 %v8678_v49, %s6220_s21  ;;  %v10831_v2 = vld [vmem:[#allocation127_spill] sm:$0xff]  ;;  %v4441_v13 = vsel %vm1701_vm3, %v4409_v46, %v4218_v27  ;;  %v4093_v48 = vshll.u32 %v9456_v31, 16 }
 0x43f   : > { %v5773_v56 = vpop.f32.mrb[75].mxu1  ;;  %4259 = vrot.lane.b32.xlu1 %v9408_v9, %s6223_s8 }
 0x440   : > { %v9415_v21 = vadd.f32 %v5771_v14, %v9103_v41  ;;  %v5774_v58 = vadd.f32 %v5773_v56, %v5772_v38  ;;  %v2180_v42 = vpop.permute.xlu0 %2179 }
 0x441   : > { %v4250_v34 = vpop.permute.xlu1 %4249  ;;  %v2298_v14 = vsel %vm1670_vm2, %v10832_v36, %v2180_v42 }
 0x442   : > { %v9418_v49 = vadd.f32 %v5774_v58, %v9115_v53  ;;  %2221 = vrot.lane.b32.xlu0 %v10827_v20, %s6219_s20  ;;  %v9430_v20 = vsel %vm840_vm8, %v4009_v45, %v4013_v28  ;;  %v4474_v30 = vsel %vm4456_vm14, %v4441_v13, %v4250_v34  ;;  %v9464_v45 = vsel %vm8127_vm11, %v9300_v63, 0 }
 0x443   : > { %4291 = vrot.lane.b32.xlu1 %v9385_v19, %s6221_s22  ;;  %v4098_v63 = vshll.u32 %v9464_v45, 16 }
 0x444   : > { %v5775_v41 = vpop.f32.mrb[76].mxu1  ;;  %v2212_v16 = vpop.permute.xlu0 %2211 }
 0x445   : > { %v5776_v47 = vpop.f32.mrb[77].mxu1  ;;  %v4282_v0 = vpop.permute.xlu1 %4281  ;;  %v2336_v56 = vsel %vm1701_vm3, %v2298_v14, %v2212_v16  ;;  %v4095_v14 = vrot.slane %v4093_v48, 1 }
 0x446   : > { %v5777_v29 = vadd.f32 %v5776_v47, %v5775_v41  ;;  %v5778_v53 = vpop.f32.mrb[78].mxu1  ;;  %2253 = vrot.lane.b32.xlu0 %v10831_v2, %s6221_s22  ;;  %v4506_v28 = vsel %vm1732_vm4, %v4474_v30, %v4282_v0  ;;  %v4088_v41 = vrot.slane %v9398_v44, 1 }
 0x447   : > { %v5779_v38 = vpop.f32.mrb[79].mxu1  ;;  %4321 = vrot.lane.b32.xlu1 %v9430_v20, %s6222_s29 }
 0x448   : > { %v9440_v57 = vadd.f32 %v5777_v29, %v9217_v40  ;;  %v5780_v58 = vadd.f32 %v5779_v38, %v5778_v53  ;;  %v2244_v1 = vpop.permute.xlu0 %2243  ;;  %v10833_v40 = vld [vmem:[#allocation37_spill] sm:$0xff]  ;;  %v10834_v38 = vld [vmem:[#allocation7_spill] sm:$0xff] }
 0x449   : > { %v4312_v24 = vpop.permute.xlu1 %4311  ;;  %v2377_v27 = vsel %vm1732_vm4, %v2336_v56, %v2244_v1  ;;  %v4100_v1 = vrot.slane %v4098_v63, 1 }
 0x44a   : > { %v9445_v42 = vadd.f32 %v5780_v58, %v9227_v11  ;;  %4135 = vrot.lane.b32.xlu0 %v9362_v18, %s6224_s15  ;;  %3271 = vmatmul.mubr.bf16.gmra.mrb[124].mxu1 %v2377_v27  ;;  %v4546_v34 = vsel %vm4520_vm15, %v4506_v28, %v4312_v24  ;;  %v4091_v58 = vshrl.u32 %v9456_v31, 16 }
 0x44b   : > { %4165 = vrot.lane.b32.xlu1 %v9408_v9, %s6220_s21  ;;  %3278 = vmatprep.mubr.bf16.mxu1 %v10833_v40 }
 0x44c   : > { %4787 = vmatmul.mubr.bf16.gmra.mrb[136].mxu0 %v4546_v34  ;;  %v5781_v46 = vpop.f32.mrb[80].mxu1  ;;  %v4126_v11 = vpop.permute.xlu0 %4125 }
 0x44d   : > { %5538 = vmatprep.mubr.msk.bf16.mxu0 %vm4327_vm12, %v9186_v59  ;;  %v5782_v18 = vpop.f32.mrb[81].mxu1  ;;  %v4156_v16 = vpop.permute.xlu1 %4155  ;;  %v4087_v59 = vrot.slane %v9385_v19, 1 }
 0x44e   : > { %v5783_v47 = vadd.f32 %v5782_v18, %v5781_v46  ;;  %v5784_v0 = vpop.f32.mrb[82].mxu1  ;;  %4197 = vrot.lane.b32.xlu0 %v9385_v19, %s6225_s23  ;;  %v10835_v46 = vld [vmem:[#allocation6_spill] sm:$0xff] }
 0x44f   : > { %v5785_v29 = vpop.f32.mrb[83].mxu1  ;;  %4229 = vrot.lane.b32.xlu1 %v9430_v20, %s6219_s20  ;;  %v9477_v13 = vsel %vm1017_vm7, %v4087_v59, %v4088_v41  ;;  %v4096_v41 = vor.u32 %v4095_v14, %v4091_v58  ;;  %v10836_v59 = vld [vmem:[#allocation80_spill] sm:$0xff] }
 0x450   : > { %v9473_v44 = vadd.f32 %v5783_v47, %v9254_v55  ;;  %v5786_v53 = vadd.f32 %v5785_v29, %v5784_v0  ;;  %v4188_v43 = vpop.permute.xlu0 %4187  ;;  %v4347_v55 = vsel %vm4327_vm12, %v8929_v37, %v4126_v11 }
 0x451   : > { %v4220_v2 = vpop.permute.xlu1 %4219  ;;  %v4378_v34 = vsel %vm1670_vm2, %v4347_v55, %v4156_v16  ;;  %v4101_v48 = vsel %vm840_vm8, %v4096_v41, %v4100_v1 }
 0x452   : > { %v9480_v36 = vadd.f32 %v5786_v53, %v9265_v50  ;;  %4261 = vrot.lane.b32.xlu0 %v9477_v13, %s6223_s8  ;;  %v4411_v37 = vsel %vm4391_vm13, %v4378_v34, %v4188_v43 }
 0x453   : > { %2223 = vrot.lane.b32.xlu1 %v10834_v38, %s6219_s20  ;;  %v4443_v16 = vsel %vm1701_vm3, %v4411_v37, %v4220_v2  ;;  %v4105_v2 = vrot.slane %v9464_v45, 1  ;;  %v4104_v45 = vrot.slane %v9456_v31, 1  ;;  %v10839_v37 = vld [vmem:[#allocation64_spill] sm:$0xff] }
 0x454   : > { %v5787_v30 = vpop.f32.mrb[84].mxu1  ;;  %v2182_v56 = vpop.permute.xlu0 %2181 }
 0x455   : > { %v5788_v28 = vpop.f32.mrb[85].mxu1  ;;  %v4252_v24 = vpop.permute.xlu1 %4251  ;;  %v2301_v53 = vsel %vm1670_vm2, %v10836_v59, %v2182_v56 }
 0x456   : > { %v5789_v27 = vadd.f32 %v5788_v28, %v5787_v30  ;;  %v5790_v50 = vpop.f32.mrb[86].mxu1  ;;  %4293 = vrot.lane.b32.xlu0 %v9456_v31, %s6221_s22  ;;  %v10837_v28 = vld [vmem:[#allocation67_spill] sm:$0xff] }
 0x457   : > { %v5791_v40 = vpop.f32.mrb[87].mxu1  ;;  %2255 = vrot.lane.b32.xlu1 %v10835_v46, %s6221_s22  ;;  %s6158_s22 = sshll.u32 %s6226_s18, 4  ;;  %s6159_s22 = int_to_ptr.vmem [resolvable:$false] %s6158_s22 }
 0x458   : > { %v9496_v11 = vadd.f32 %v5789_v27, %v9318_v5  ;;  %v5792_v18 = vadd.f32 %v5791_v40, %v5790_v50  ;;  %v2214_v47 = vpop.permute.xlu0 %2213  ;;  %v4476_v5 = vsel %vm4456_vm14, %v4443_v16, %v4252_v24  ;;  %v10838_v24 = vld [vmem:[#allocation28_spill] sm:$0xff]  ;;  %v4569_v40 = vld [vmem:[%s10292_s6] sm:$0x3]  ;;  %s6160_s19 = scalar_lea.vmem %s6159_s22, 8192 }
 0x459   : > { %v4284_v0 = vpop.permute.xlu1 %4283  ;;  %v2338_v43 = vsel %vm1701_vm3, %v2301_v53, %v2214_v47  ;;  %v9532_v47 = vsel %vm1017_vm7, %v4104_v45, %v4105_v2  ;;  %v10843_v2 = vld [vmem:[#allocation58_spill] sm:$0xff] }
 0x45a   : > { %v9500_v29 = vadd.f32 %v5792_v18, %v9332_v35  ;;  %4323 = vrot.lane.b32.xlu0 %v4101_v48, %s6222_s29  ;;  %v4508_v38 = vsel %vm1732_vm4, %v4476_v5, %v4284_v0  ;;  %v10841_v5 = vld [vmem:[#allocation11_spill] sm:$0xff] }
 0x45b   : > { %4137 = vrot.lane.b32.xlu1 %v9430_v20, %s6224_s15 }
 0x45c   : > { %v5809_v63 = vpop.f32.mrb[88].mxu1  ;;  %v2246_v14 = vpop.permute.xlu0 %2245 }
 0x45d   : > { %v5810_v35 = vpop.f32.mrb[89].mxu1  ;;  %v4314_v55 = vpop.permute.xlu1 %4313  ;;  %v2380_v30 = vsel %vm1732_vm4, %v2338_v43, %v2246_v14  ;;  %v9543_v43 = vrot.slane %v4569_v40, %v10841_v5 }
 0x45e   : > { %v5811_v58 = vadd.f32 %v5810_v35, %v5809_v63  ;;  %v5812_v1 = vpop.f32.mrb[90].mxu1  ;;  %4167 = vrot.lane.b32.xlu0 %v9477_v13, %s6220_s21  ;;  %3279 = vmatmul.mubr.bf16.gmra.mrb[128].mxu1 %v2380_v30  ;;  %v4549_v20 = vsel %vm4520_vm15, %v4508_v38, %v4314_v55  ;;  %v10842_v38 = vld [vmem:[#allocation5_spill] sm:$0xff] }
 0x45f   : > { %v5813_v56 = vpop.f32.mrb[91].mxu1  ;;  %4199 = vrot.lane.b32.xlu1 %v9456_v31, %s6225_s23  ;;  %3286 = vmatprep.mubr.bf16.mxu1 %v10837_v28  ;;  %v10840_v31 = vld [vmem:[#allocation9_spill] sm:$0xff] }
 0x460   : > { %v3201_v27 = vadd.f32 %v5811_v58, %v10838_v24  ;;  %v5814_v50 = vadd.f32 %v5813_v56, %v5812_v1  ;;  %4795 = vmatmul.mubr.bf16.gmra.mrb[140].mxu0 %v4549_v20  ;;  %v4128_v34 = vpop.permute.xlu0 %4127  ;;  %v9537_v0 = vrot.slane %v4569_v40, %v10840_v31  ;;  %v10844_v40 = vld [vmem:[#allocation32_spill] sm:$0xff] }
 0x461   : > { %5539 = vmatprep.mubr.msk.bf16.mxu0 %vm4327_vm12, %v9259_v32  ;;  %v4158_v46 = vpop.permute.xlu1 %4157 }
 0x462   : > { %v9527_v41 = vadd.f32 %v8961_v39, %v3201_v27  ;;  %v3204_v18 = vadd.f32 %v5814_v50, %v10839_v37  ;;  %4231 = vrot.lane.b32.xlu0 %v4101_v48, %s6219_s20 }
 0x463   : > { %4263 = vrot.lane.b32.xlu1 %v9532_v47, %s6223_s8 }
 0x464   : > { %v9540_v16 = vadd.f32 %v8967_v22, %v3204_v18  ;;  %v5815_v32 = vpop.f32.mrb[92].mxu1  ;;  %v4190_v59 = vpop.permute.xlu0 %4189  ;;  %v4349_v22 = vsel %vm4327_vm12, %v8997_v33, %v4128_v34 }
 0x465   : > { %v5816_v39 = vpop.f32.mrb[93].mxu1  ;;  %v4222_v53 = vpop.permute.xlu1 %4221  ;;  %v4380_v18 = vsel %vm1670_vm2, %v4349_v22, %v4158_v46 }
 0x466   : > { %v5817_v48 = vadd.f32 %v5816_v39, %v5815_v32  ;;  %v5818_v63 = vpop.f32.mrb[94].mxu1  ;;  %v4724_v14 = vpop.f32.mrb[104].mxu0  ;;  %4325 = vrot.lane.b32.xlu0 %v10842_v38, %s6222_s29  ;;  %v4413_v34 = vsel %vm4391_vm13, %v4380_v18, %v4190_v59  ;;  %s269_s29 = sand.u32 1, %s6208_s25  }
 0x467   : > { %v4855_v35 = vmul.f32 %v9537_v0, %v4724_v14  ;;  %v5819_v55 = vpop.f32.mrb[95].mxu1  ;;  %v4726_v30 = vpop.f32.mrb[105].mxu0  ;;  %s5419_s8 = sshll.u32 %s269_s29, 8  ;;  %s10245_s16 = scalar_lea.sflag [#allocation3], %s269_s29 }
 0x468   : > { %v3209_v58 = vadd.f32 %v5817_v48, %v10843_v2  ;;  %v5820_v1 = vadd.f32 %v5819_v55, %v5818_v63  ;;  %v4727_v20 = vpop.f32.mrb[106].mxu0  ;;  %v2184_v56 = vpop.permute.xlu0 %2183  ;;  %s9853_s9 = scalar_lea.vmem [#allocation2], %s5419_s8 }
 0x469   : > { %v4891_v28 = vadd.f32 %v9543_v43, %v4855_v35  ;;  %v4856_v24 = vmul.f32 %v9537_v0, %v4727_v20  ;;  %v4729_v27 = vpop.f32.mrb[107].mxu0  ;;  %v4254_v50 = vpop.permute.xlu1 %4253  ;;  %v10845_v35 = vld [vmem:[#allocation118_spill] sm:$0xff] }
 0x46a   : > { %v9554_v45 = vadd.f32 %v8958_v25, %v3209_v58  ;;  %v3212_v37 = vadd.f32 %v5820_v1, %v10844_v40  ;;  %v4445_v25 = vsel %vm1701_vm3, %v4413_v34, %v4222_v53  ;;  %v2304_v55 = vsel %vm1670_vm2, %v10845_v35, %v2184_v56 }
 0x46b   : > { %v4923_v32 = vmax.f32 %v4891_v28, 0.0  ;;  %v4892_v33 = vadd.f32 %v9543_v43, %v4856_v24  ;;  %v4478_v46 = vsel %vm4456_vm14, %v4445_v25, %v4254_v50  ;;  %v10846_v24 = vld [vmem:[#allocation63_spill] sm:$0xff] }
 0x46c   : > { %v9561_v39 = vadd.f32 %v8963_v4, %v3212_v37  ;;  %v2216_v48 = vpop.permute.xlu0 %2215 }
 0x46d   : > { %v4924_v63 = vmax.f32 %v4892_v33, 0.0  ;;  %v4286_v14 = vpop.permute.xlu1 %4285  ;;  %5115 = vrot.lane.b32.xlu1 %v4923_v32, %s6225_s23  ;;  %v2340_v30 = vsel %vm1701_vm3, %v2304_v55, %v2216_v48  ;;  %v10847_v32 = vld [vmem:[#allocation125_spill] sm:$0xff] }
 0x46e   : > { %v4510_v4 = vsel %vm1732_vm4, %v4478_v46, %v4286_v14 }
 0x46f   : > { %5117 = vrot.lane.b32.xlu0 %v4924_v63, %s6225_s23 }
 0x470   : > { %v2248_v59 = vpop.permute.xlu0 %2247  ;;  %v5821_v22 = vpop.f32.mrb[96].mxu1 }
 0x471   : > { %v4316_v2 = vpop.permute.xlu1 %4315  ;;  %v2383_v58 = vsel %vm1732_vm4, %v2340_v30, %v2248_v59  ;;  %v5822_v1 = vpop.f32.mrb[97].mxu1 }
 0x472   : > { %3287 = vmatmul.mubr.bf16.gmra.mrb[132].mxu1 %v2383_v58  ;;  %v5823_v20 = vadd.f32 %v5822_v1, %v5821_v22  ;;  %v4552_v53 = vsel %vm4520_vm15, %v4510_v4, %v4316_v2  ;;  %v5824_v28 = vpop.f32.mrb[98].mxu1  ;;  %v10848_v1 = vld [vmem:[#allocation82_spill] sm:$0xff] }
 0x473   : > { %4803 = vmatmul.mubr.bf16.gmra.mrb[144].mxu0 %v4552_v53  ;;  %v5825_v56 = vpop.f32.mrb[99].mxu1 }
 0x474   : > { %v3217_v27 = vadd.f32 %v5823_v20, %v10846_v24  ;;  %5540 = vmatprep.mubr.msk.bf16.mxu0 %vm4327_vm12, %v9336_v23  ;;  %v4130_v50 = vpop.permute.xlu0 %4129  ;;  %v5826_v40 = vadd.f32 %v5825_v56, %v5824_v28 }
 0x475   : > { %v4160_v37 = vpop.permute.xlu1 %4159  ;;  %v4351_v28 = vsel %vm4327_vm12, %v9075_v54, %v4130_v50 }
 0x476   : > { %v9577_v18 = vadd.f32 %v8982_v3, %v3217_v27  ;;  %v3220_v33 = vadd.f32 %v5826_v40, %v10847_v32  ;;  %v4382_v40 = vsel %vm1670_vm2, %v4351_v28, %v4160_v37  ;;  %v10849_v32 = vld [vmem:[#allocation116_spill] sm:$0xff]  ;;  %v10851_v28 = vld [vmem:[#allocation122_spill] sm:$0xff] }
 0x477   : > { %v4732_v34 = vpop.f32.mrb[108].mxu0 }
 0x478   : > { %v9581_v48 = vadd.f32 %v8989_v12, %v3220_v33  ;;  %v4857_v63 = vmul.f32 %v9537_v0, %v4732_v34  ;;  %v4734_v14 = vpop.f32.mrb[109].mxu0  ;;  %v4192_v25 = vpop.permute.xlu0 %4191 }
 0x479   : > { %v4735_v35 = vpop.f32.mrb[110].mxu0  ;;  %v2258_v55 = vpop.permute.xlu1 %2257 }
 0x47a   : > { %v4893_v23 = vadd.f32 %v9543_v43, %v4857_v63  ;;  %v4858_v46 = vmul.f32 %v9537_v0, %v4735_v35  ;;  %v4737_v30 = vpop.f32.mrb[111].mxu0  ;;  %v2398_v20 = vsel %vm1670_vm2, %v10848_v1, %v2258_v55  ;;  %v4415_v63 = vsel %vm4391_vm13, %v4382_v40, %v4192_v25  ;;  %v10850_v1 = vld [vmem:[#allocation119_spill] sm:$0xff] }
 0x47c   : > { %v4925_v59 = vmax.f32 %v4893_v23, 0.0  ;;  %v4894_v3 = vadd.f32 %v9543_v43, %v4858_v46  ;;  %v4224_v22 = vpop.permute.xlu0 %4223 }
 0x47d   : > { %v2186_v4 = vpop.permute.xlu1 %2185  ;;  %v4447_v55 = vsel %vm1701_vm3, %v4415_v63, %v4224_v22 }
 0x47e   : > { %v4926_v2 = vmax.f32 %v4894_v3, 0.0  ;;  %5119 = vrot.lane.b32.xlu1 %v4925_v59, %s6225_s23  ;;  %v2307_v33 = vsel %vm1670_vm2, %v10849_v32, %v2186_v4 }
 0x480   : > { %5121 = vrot.lane.b32.xlu0 %v4926_v2, %s6225_s23  ;;  %v2262_v12 = vpop.permute.xlu0 %2261 }
 0x481   : > { %v4256_v58 = vpop.permute.xlu1 %4255  ;;  %v2402_v56 = vsel %vm1701_vm3, %v2398_v20, %v2262_v12 }
 0x482   : > { %v4480_v50 = vsel %vm4456_vm14, %v4447_v55, %v4256_v58 }
 0x484   : > { %v2218_v53 = vpop.permute.xlu0 %2217 }
 0x485   : > { %v2266_v24 = vpop.permute.xlu1 %2265  ;;  %v2342_v14 = vsel %vm1701_vm3, %v2307_v33, %v2218_v53 }
 0x486   : > { %v2406_v27 = vsel %vm1732_vm4, %v2402_v56, %v2266_v24 }
 0x487   : > { %3294 = vmatprep.mubr.bf16.mxu1 %v2406_v27 }
 0x488   : > { %v4288_v34 = vpop.permute.xlu0 %4287 }
 0x489   : > { %v2250_v35 = vpop.permute.xlu1 %2249  ;;  %v4512_v23 = vsel %vm1732_vm4, %v4480_v50, %v4288_v34 }
 0x48a   : > { %v2386_v54 = vsel %vm1732_vm4, %v2342_v14, %v2250_v35 }
 0x48b   : > { %3295 = vmatmul.mubr.bf16.gmra.mrb[136].mxu1 %v2386_v54 }
 0x48c   : > { %v4318_v46 = vpop.permute.xlu0 %4317 }
 0x48d   : > { %v4132_v37 = vpop.permute.xlu1 %4131  ;;  %v4555_v30 = vsel %vm4520_vm15, %v4512_v23, %v4318_v46 }
 0x48e   : > { %v5827_v59 = vpop.f32.mrb[100].mxu1  ;;  %4811 = vmatmul.mubr.bf16.gmra.mrb[148].mxu0 %v4555_v30  ;;  %v4353_v63 = vsel %vm4327_vm12, %v9153_v7, %v4132_v37 }
 0x48f   : > { %v5828_v3 = vpop.f32.mrb[101].mxu1  ;;  %5541 = vmatprep.mubr.msk.bf16.mxu0 %vm4327_vm12, %v9408_v9 }
 0x490   : > { %v5829_v25 = vadd.f32 %v5828_v3, %v5827_v59  ;;  %v5830_v4 = vpop.f32.mrb[102].mxu1  ;;  %v4162_v22 = vpop.permute.xlu0 %4161 }
 0x491   : > { %v4194_v2 = vpop.permute.xlu1 %4193  ;;  %v5831_v12 = vpop.f32.mrb[103].mxu1  ;;  %v4384_v14 = vsel %vm1670_vm2, %v4353_v63, %v4162_v22 }
 0x492   : > { %v3225_v58 = vadd.f32 %v5829_v25, %v10850_v1  ;;  %v5832_v20 = vadd.f32 %v5831_v12, %v5830_v4  ;;  %v4417_v23 = vsel %vm4391_vm13, %v4384_v14, %v4194_v2 }
 0x494   : > { %v9609_v53 = vadd.f32 %v8979_v17, %v3225_v58  ;;  %v3228_v56 = vadd.f32 %v5832_v20, %v10851_v28  ;;  %v2260_v24 = vpop.permute.xlu0 %2259 }
 0x495   : > { %v4226_v27 = vpop.permute.xlu1 %4225  ;;  %v2400_v17 = vsel %vm1670_vm2, %v10753_v8, %v2260_v24 }
 0x496   : > { %v9613_v40 = vadd.f32 %v8986_v51, %v3228_v56  ;;  %v4449_v7 = vsel %vm1701_vm3, %v4417_v23, %v4226_v27  ;;  %v10852_v56 = vld [vmem:[#allocation10_spill] sm:$0xff] }
 0x498   : > { %v2188_v32 = vpop.permute.xlu0 %2187 }
 0x499   : > { %v2264_v9 = vpop.permute.xlu1 %2263  ;;  %v2310_v37 = vsel %vm1670_vm2, %v10820_v6, %v2188_v32 }
 0x49a   : > { %v2404_v35 = vsel %vm1701_vm3, %v2400_v17, %v2264_v9 }
 0x49c   : > { %v4258_v33 = vpop.permute.xlu0 %4257 }
 0x49d   : > { %v2220_v34 = vpop.permute.xlu1 %2219  ;;  %v4482_v8 = vsel %vm4456_vm14, %v4449_v7, %v4258_v33 }
 0x49e   : > { %v2344_v3 = vsel %vm1701_vm3, %v2310_v37, %v2220_v34  ;;  %v2411_v34 = vld [vmem:[%s10291_s5] sm:$0x3] }
 0x4a0   : > { %v2268_v55 = vpop.permute.xlu0 %2267 }
 0x4a1   : > { %v4740_v54 = vpop.f32.mrb[112].mxu0  ;;  %v4290_v50 = vpop.permute.xlu1 %4289  ;;  %v2409_v51 = vsel %vm1732_vm4, %v2404_v35, %v2268_v55  ;;  %v9646_v35 = vrot.slane %v2411_v34, %v10840_v31  ;;  %v9654_v31 = vrot.slane %v2411_v34, %v10841_v5  ;;  %v10855_v5 = vld [vmem:[#allocation61_spill] sm:$0xff]  ;;  %v10856_v34 = vld [vmem:[#allocation107_spill] sm:$0xff] }
 0x4a2   : > { %v4859_v46 = vmul.f32 %v9537_v0, %v4740_v54  ;;  %3302 = vmatprep.mubr.bf16.mxu1 %v2409_v51  ;;  %v4742_v30 = vpop.f32.mrb[113].mxu0  ;;  %v4514_v12 = vsel %vm1732_vm4, %v4482_v8, %v4290_v50 }
 0x4a3   : > { %v4743_v59 = vpop.f32.mrb[114].mxu0  ;;  %v3492_v37 = vmul.f32 %v9646_v35, %v9527_v41 }
 0x4a4   : > { %v4895_v25 = vadd.f32 %v9543_v43, %v4859_v46  ;;  %v4860_v4 = vmul.f32 %v9537_v0, %v4743_v59  ;;  %v4745_v22 = vpop.f32.mrb[115].mxu0  ;;  %v2252_v2 = vpop.permute.xlu0 %2251 }
 0x4a5   : > { %v4320_v1 = vpop.permute.xlu1 %4319  ;;  %v2389_v58 = vsel %vm1732_vm4, %v2344_v3, %v2252_v2 }
 0x4a6   : > { %v4927_v20 = vmax.f32 %v4895_v25, 0.0  ;;  %v4896_v28 = vadd.f32 %v9543_v43, %v4860_v4  ;;  %3303 = vmatmul.mubr.bf16.gmra.mrb[140].mxu1 %v2389_v58  ;;  %v4558_v6 = vsel %vm4520_vm15, %v4514_v12, %v4320_v1  ;;  %v3493_v25 = vmul.f32 %v9646_v35, %v9540_v16  ;;  %v10854_v1 = vld [vmem:[#allocation121_spill] sm:$0xff] }
 0x4a7   : > { %3310 = vmatprep.mubr.bf16.mxu1 %v10852_v56  ;;  %4819 = vmatmul.mubr.bf16.gmra.mrb[152].mxu0 %v4558_v6 }
 0x4a8   : > { %v4928_v24 = vmax.f32 %v4896_v28, 0.0  ;;  %5123 = vrot.lane.b32.xlu1 %v4927_v20, %s6225_s23  ;;  %5542 = vmatprep.mubr.msk.bf16.mxu0 %vm4327_vm12, %v9477_v13  ;;  %v4134_v27 = vpop.permute.xlu0 %4133 }
 0x4a9   : > { %v4164_v32 = vpop.permute.xlu1 %4163  ;;  %v4355_v63 = vsel %vm4327_vm12, %v9241_v15, %v4134_v27  ;;  %v10853_v15 = vld [vmem:[#allocation104_spill] sm:$0xff] }
 0x4aa   : > { %5125 = vrot.lane.b32.xlu0 %v4928_v24, %s6225_s23  ;;  %v4386_v13 = vsel %vm1670_vm2, %v4355_v63, %v4164_v32 }
 0x4ac   : > { %v4196_v9 = vpop.permute.xlu0 %4195 }
 0x4ad   : > { %v4228_v33 = vpop.permute.xlu1 %4227  ;;  %v4419_v50 = vsel %vm4391_vm13, %v4386_v13, %v4196_v9  ;;  %v3528_v13 = vadd.f32 %v9654_v31, %v3492_v37 }
 0x4ae   : > { %v4451_v4 = vsel %vm1701_vm3, %v4419_v50, %v4228_v33 }
 0x4b0   : > { %v2190_v14 = vpop.permute.xlu0 %2189 }
 0x4b1   : > { %v4260_v17 = vpop.permute.xlu1 %4259  ;;  %v2313_v22 = vsel %vm1670_vm2, %v10825_v61, %v2190_v14 }
 0x4b2   : > { %v5833_v55 = vpop.f32.mrb[104].mxu1  ;;  %v4484_v41 = vsel %vm4456_vm14, %v4451_v4, %v4260_v17 }
 0x4b3   : > { %v5834_v54 = vpop.f32.mrb[105].mxu1 }
 0x4b4   : > { %v5835_v51 = vadd.f32 %v5834_v54, %v5833_v55  ;;  %v5836_v23 = vpop.f32.mrb[106].mxu1  ;;  %v2222_v46 = vpop.permute.xlu0 %2221 }
 0x4b5   : > { %v5837_v30 = vpop.f32.mrb[107].mxu1  ;;  %v4292_v7 = vpop.permute.xlu1 %4291  ;;  %v2346_v20 = vsel %vm1701_vm3, %v2313_v22, %v2222_v46  ;;  %v3560_v46 = vmax.f32 %v3528_v13, 0.0 }
 0x4b6   : > { %v3233_v59 = vadd.f32 %v5835_v51, %v10853_v15  ;;  %v5838_v8 = vadd.f32 %v5837_v30, %v5836_v23  ;;  %v4748_v3 = vpop.f32.mrb[116].mxu0  ;;  %v4516_v16 = vsel %vm1732_vm4, %v4484_v41, %v4292_v7  ;;  %v3529_v23 = vadd.f32 %v9654_v31, %v3493_v25 }
 0x4b7   : > { %v4861_v2 = vmul.f32 %v9537_v0, %v4748_v3  ;;  %v4750_v12 = vpop.f32.mrb[117].mxu0  ;;  %v10857_v3 = vld [vmem:[#allocation59_spill] sm:$0xff] }
 0x4b8   : > { %v9664_v58 = vadd.f32 %v10854_v1, %v3233_v59  ;;  %v3236_v28 = vadd.f32 %v5838_v8, %v10855_v5  ;;  %v4751_v6 = vpop.f32.mrb[118].mxu0  ;;  %v2254_v24 = vpop.permute.xlu0 %2253  ;;  %v10858_v25 = vunpack.i.h.bf16 %v10857_v3 }
 0x4b9   : > { %v4897_v27 = vadd.f32 %v9543_v43, %v4861_v2  ;;  %v4862_v61 = vmul.f32 %v9537_v0, %v4751_v6  ;;  %v4753_v32 = vpop.f32.mrb[119].mxu0  ;;  %v4322_v9 = vpop.permute.xlu1 %4321  ;;  %v2392_v33 = vsel %vm1732_vm4, %v2346_v20, %v2254_v24 }
 0x4ba   : > { %v9673_v63 = vadd.f32 %v10856_v34, %v3236_v28  ;;  %3311 = vmatmul.mubr.bf16.gmra.mrb[144].mxu1 %v2392_v33  ;;  %v4561_v14 = vsel %vm4520_vm15, %v4516_v16, %v4322_v9  ;;  %v2316_v4 = vsel %vm1670_vm2, %v10842_v38, %v10858_v25 }
 0x4bb   : > { %v4929_v17 = vmax.f32 %v4897_v27, 0.0  ;;  %v4898_v55 = vadd.f32 %v9543_v43, %v4862_v61  ;;  %3318 = vmatprep.mubr.bf16.mxu1 %v10852_v56  ;;  %4827 = vmatmul.mubr.bf16.gmra.mrb[156].mxu0 %v4561_v14  ;;  %v3561_v56 = vmax.f32 %v3529_v23, 0.0  ;;  %v10859_v61 = vld [vmem:[#allocation69_spill] sm:$0xff] }
 0x4bc   : > { %5543 = vmatprep.mubr.msk.bf16.mxu0 %vm4327_vm12, %v9532_v47  ;;  %v4136_v54 = vpop.permute.xlu0 %4135 }
 0x4bd   : > { %v4930_v50 = vmax.f32 %v4898_v55, 0.0  ;;  %v4166_v51 = vpop.permute.xlu1 %4165  ;;  %5127 = vrot.lane.b32.xlu1 %v4929_v17, %s6225_s23  ;;  %v4357_v37 = vsel %vm4327_vm12, %v9315_v10, %v4136_v54  ;;  %v3494_v17 = vmul.f32 %v9646_v35, %v9554_v45  ;;  %v10860_v54 = vld [vmem:[#allocation78_spill] sm:$0xff] }
 0x4be   : > { %v4388_v59 = vsel %vm1670_vm2, %v4357_v37, %v4166_v51  ;;  %v10861_v51 = vld [vmem:[#allocation44_spill] sm:$0xff] }
 0x4bf   : > { %5129 = vrot.lane.b32.xlu0 %v4930_v50, %s6225_s23 }
 0x4c0   : > { %v4198_v30 = vpop.permute.xlu0 %4197 }
 0x4c1   : > { %v4230_v7 = vpop.permute.xlu1 %4229  ;;  %4987 = vrot.lane.b32.xlu1 %v3560_v46, %s6224_s15  ;;  %v4421_v8 = vsel %vm4391_vm13, %v4388_v59, %v4198_v30  ;;  %v3495_v30 = vmul.f32 %v9646_v35, %v9561_v39  ;;  %v3530_v39 = vadd.f32 %v9654_v31, %v3494_v17 }
 0x4c2   : > { %v4453_v10 = vsel %vm1701_vm3, %v4421_v8, %v4230_v7 }
 0x4c3   : > { %4989 = vrot.lane.b32.xlu0 %v3561_v56, %s6224_s15 }
 0x4c4   : > { %v4262_v47 = vpop.permute.xlu0 %4261 }
 0x4c5   : > { %v2224_v15 = vpop.permute.xlu1 %2223  ;;  %v4486_v5 = vsel %vm4456_vm14, %v4453_v10, %v4262_v47 }
 0x4c6   : > { %v2348_v2 = vsel %vm1701_vm3, %v2316_v4, %v2224_v15  ;;  %v10862_v15 = vld [vmem:[#allocation99_spill] sm:$0xff] }
 0x4c8   : > { %v4294_v22 = vpop.permute.xlu0 %4293 }
 0x4c9   : > { %v5839_v12 = vpop.f32.mrb[108].mxu1  ;;  %v2256_v41 = vpop.permute.xlu1 %2255  ;;  %v4518_v24 = vsel %vm1732_vm4, %v4486_v5, %v4294_v22 }
 0x4ca   : > { %v5840_v1 = vpop.f32.mrb[109].mxu1  ;;  %v2395_v20 = vsel %vm1732_vm4, %v2348_v2, %v2256_v41  ;;  %v3531_v2 = vadd.f32 %v9654_v31, %v3495_v30  ;;  %v10867_v30 = vld [vmem:[#allocation73_spill] sm:$0xff] }
 0x4cb   : > { %v5841_v28 = vadd.f32 %v5840_v1, %v5839_v12  ;;  %v5842_v6 = vpop.f32.mrb[110].mxu1  ;;  %3319 = vmatmul.mubr.bf16.gmra.mrb[148].mxu1 %v2395_v20  ;;  %v3562_v1 = vmax.f32 %v3530_v39, 0.0  ;;  %v10863_v20 = vld [vmem:[#allocation8_spill] sm:$0xff] }
 0x4cc   : > { %v5843_v16 = vpop.f32.mrb[111].mxu1  ;;  %v4324_v27 = vpop.permute.xlu0 %4323  ;;  %v10864_v5 = vunpack.i.h.bf16 %v10863_v20 }
 0x4cd   : > { %v3241_v32 = vadd.f32 %v5841_v28, %v10859_v61  ;;  %v5844_v9 = vadd.f32 %v5843_v16, %v5842_v6  ;;  %v4756_v33 = vpop.f32.mrb[120].mxu0  ;;  %v4138_v34 = vpop.permute.xlu1 %4137  ;;  %v4564_v14 = vsel %vm4520_vm15, %v4518_v24, %v4324_v27  ;;  %v3563_v24 = vmax.f32 %v3531_v2, 0.0 }
 0x4ce   : > { %v4863_v55 = vmul.f32 %v9537_v0, %v4756_v33  ;;  %v4758_v13 = vpop.f32.mrb[121].mxu0  ;;  %4835 = vmatmul.mubr.bf16.gmra.mrb[160].mxu0 %v4564_v14  ;;  %v4359_v45 = vsel %vm4327_vm12, %v9385_v19, %v4138_v34  ;;  %v10865_v34 = vld [vmem:[#allocation74_spill] sm:$0xff] }
 0x4cf   : > { %v9705_v50 = vadd.f32 %v10860_v54, %v3241_v32  ;;  %v3244_v23 = vadd.f32 %v5844_v9, %v10861_v51  ;;  %v4759_v46 = vpop.f32.mrb[122].mxu0  ;;  %5544 = vmatprep.mubr.msk.bf16.mxu0 %vm4327_vm12, %v10842_v38  ;;  %v3496_v13 = vmul.f32 %v9646_v35, %v9577_v18 }
 0x4d0   : > { %v4899_v7 = vadd.f32 %v9543_v43, %v4863_v55  ;;  %v4864_v56 = vmul.f32 %v9537_v0, %v4759_v46  ;;  %v4761_v37 = vpop.f32.mrb[123].mxu0  ;;  %v4168_v47 = vpop.permute.xlu0 %4167 }
 0x4d1   : > { %v9717_v59 = vadd.f32 %v10862_v15, %v3244_v23  ;;  %v4390_v8 = vsel %vm1670_vm2, %v4359_v45, %v4168_v47  ;;  %v4200_v3 = vpop.permute.xlu1 %4199  ;;  %v10866_v23 = vld [vmem:[#allocation115_spill] sm:$0xff] }
 0x4d2   : > { %v4931_v25 = vmax.f32 %v4899_v7, 0.0  ;;  %v4900_v38 = vadd.f32 %v9543_v43, %v4864_v56  ;;  %v4423_v22 = vsel %vm4391_vm13, %v4390_v8, %v4200_v3  ;;  %v3497_v56 = vmul.f32 %v9646_v35, %v9581_v48  ;;  %v10868_v8 = vld [vmem:[#allocation114_spill] sm:$0xff] }
 0x4d4   : > { %v4932_v4 = vmax.f32 %v4900_v38, 0.0  ;;  %5131 = vrot.lane.b32.xlu1 %v4931_v25, %s6225_s23  ;;  %v4232_v19 = vpop.permute.xlu0 %4231  ;;  %v3532_v38 = vadd.f32 %v9654_v31, %v3496_v13  ;;  %v10872_v13 = vld [vmem:[#allocation112_spill] sm:$0xff] }
 0x4d5   : > { %v4455_v12 = vsel %vm1701_vm3, %v4423_v22, %v4232_v19  ;;  %v4264_v41 = vpop.permute.xlu1 %4263 }
 0x4d6   : > { %v4488_v10 = vsel %vm4456_vm14, %v4455_v12, %v4264_v41  ;;  %5133 = vrot.lane.b32.xlu0 %v4932_v4, %s6225_s23  ;;  %v3533_v4 = vadd.f32 %v9654_v31, %v3497_v56  ;;  %v3564_v48 = vmax.f32 %v3532_v38, 0.0 }
 0x4d7   : > { %v4519_v28 = vsel %vm1732_vm4, %v4488_v10, %v10864_v5 }
 0x4d8   : > { %4991 = vrot.lane.b32.xlu1 %v3562_v1, %s6224_s15  ;;  %v4326_v6 = vpop.permute.xlu0 %4325  ;;  %v3565_v22 = vmax.f32 %v3533_v4, 0.0  ;;  %v10869_v1 = vld [vmem:[#allocation70_spill] sm:$0xff]  ;;  %v10873_v4 = vld [vmem:[#allocation43_spill] sm:$0xff] }
 0x4d9   : > { %v4567_v16 = vsel %vm4520_vm15, %v4519_v28, %v4326_v6  ;;  %v3498_v6 = vmul.f32 %v9646_v35, %v9609_v53 }
 0x4da   : > { %4993 = vrot.lane.b32.xlu0 %v3563_v24, %s6224_s15  ;;  %4843 = vmatmul.mubr.bf16.gmra.mrb[164].mxu0 %v4567_v16 }
 0x4de   : > { %v5845_v27 = vpop.f32.mrb[112].mxu1 }
 0x4df   : > { %v5846_v61 = vpop.f32.mrb[113].mxu1 }
 0x4e0   : > { %v5847_v32 = vadd.f32 %v5846_v61, %v5845_v27  ;;  %v5848_v9 = vpop.f32.mrb[114].mxu1  ;;  %v10870_v27 = vld [vmem:[#allocation50_spill] sm:$0xff] }
 0x4e1   : > { %v5849_v33 = vpop.f32.mrb[115].mxu1 }
 0x4e2   : > { %v3249_v14 = vadd.f32 %v5847_v32, %v10865_v34  ;;  %v5850_v17 = vadd.f32 %v5849_v33, %v5848_v9  ;;  %v4764_v55 = vpop.f32.mrb[124].mxu0  ;;  %v10871_v32 = vld [vmem:[#allocation101_spill] sm:$0xff]  ;;  %v3499_v34 = vmul.f32 %v9646_v35, %v9613_v40 }
 0x4e3   : > { %v4865_v54 = vmul.f32 %v9537_v0, %v4764_v55  ;;  %v4766_v51 = vpop.f32.mrb[125].mxu0 }
 0x4e4   : > { %v9739_v46 = vadd.f32 %v10866_v23, %v3249_v14  ;;  %v3252_v7 = vadd.f32 %v5850_v17, %v10867_v30  ;;  %v4767_v45 = vpop.f32.mrb[126].mxu0  ;;  %v3534_v23 = vadd.f32 %v9654_v31, %v3498_v6 }
 0x4e5   : > { %v4901_v37 = vadd.f32 %v9543_v43, %v4865_v54  ;;  %v4866_v47 = vmul.f32 %v9537_v0, %v4767_v45  ;;  %v4769_v15 = vpop.f32.mrb[127].mxu0 }
 0x4e6   : > { %v9747_v3 = vadd.f32 %v10868_v8, %v3252_v7  ;;  %v3535_v7 = vadd.f32 %v9654_v31, %v3499_v34  ;;  %v3566_v40 = vmax.f32 %v3534_v23, 0.0 }
 0x4e7   : > { %v4933_v18 = vmax.f32 %v4901_v37, 0.0  ;;  %v4902_v25 = vadd.f32 %v9543_v43, %v4866_v47 }
 0x4e8   : > { %v3567_v45 = vmax.f32 %v3535_v7, 0.0  ;;  %v10877_v7 = vld [vmem:[#allocation85_spill] sm:$0xff] }
 0x4e9   : > { %v4934_v39 = vmax.f32 %v4902_v25, 0.0  ;;  %5135 = vrot.lane.b32.xlu1 %v4933_v18, %s6225_s23  ;;  %v3500_v18 = vmul.f32 %v9646_v35, %v9664_v58  ;;  %v10875_v58 = vld [vmem:[#allocation79_spill] sm:$0xff] }
 0x4eb   : > { %5137 = vrot.lane.b32.xlu0 %v4934_v39, %s6225_s23 }
 0x4ed   : > { %4995 = vrot.lane.b32.xlu1 %v3564_v48, %s6224_s15 }
 0x4ef   : > { %4997 = vrot.lane.b32.xlu0 %v3565_v22, %s6224_s15 }
 0x4f5   : > { %v5851_v19 = vpop.f32.mrb[116].mxu1 }
 0x4f6   : > { %v5852_v2 = vpop.f32.mrb[117].mxu1 }
 0x4f7   : > { %v5853_v12 = vadd.f32 %v5852_v2, %v5851_v19  ;;  %v5854_v41 = vpop.f32.mrb[118].mxu1  ;;  %v3501_v2 = vmul.f32 %v9646_v35, %v9673_v63 }
 0x4f8   : > { %v5855_v10 = vpop.f32.mrb[119].mxu1 }
 0x4f9   : > { %v3257_v20 = vadd.f32 %v5853_v12, %v10869_v1  ;;  %v5856_v5 = vadd.f32 %v5855_v10, %v5854_v41  ;;  %v4772_v28 = vpop.f32.mrb[128].mxu0  ;;  %v10874_v1 = vld [vmem:[#allocation86_spill] sm:$0xff]  ;;  %v3537_v63 = vadd.f32 %v9654_v31, %v3501_v2  ;;  %v10880_v2 = vld [vmem:[#allocation124_spill] sm:$0xff] }
 0x4fa   : > { %v4867_v24 = vmul.f32 %v9537_v0, %v4772_v28  ;;  %v4774_v16 = vpop.f32.mrb[129].mxu0 }
 0x4fb   : > { %v9761_v61 = vadd.f32 %v10870_v27, %v3257_v20  ;;  %v3260_v9 = vadd.f32 %v5856_v5, %v10871_v32  ;;  %v4775_v33 = vpop.f32.mrb[130].mxu0  ;;  %v10876_v16 = vld [vmem:[#allocation120_spill] sm:$0xff] }
 0x4fc   : > { %v4903_v14 = vadd.f32 %v9543_v43, %v4867_v24  ;;  %v4868_v17 = vmul.f32 %v9537_v0, %v4775_v33  ;;  %v4777_v55 = vpop.f32.mrb[131].mxu0  ;;  %v3536_v24 = vadd.f32 %v9654_v31, %v3500_v18  ;;  %v3569_v33 = vmax.f32 %v3537_v63, 0.0  ;;  %v5116_v18 = vpop.permute.xlu1 %5115 }
 0x4fd   : > { %v9769_v54 = vadd.f32 %v10872_v13, %v3260_v9 }
 0x4fe   : > { %v4935_v53 = vmax.f32 %v4903_v14, 0.0  ;;  %v4904_v51 = vadd.f32 %v9543_v43, %v4868_v17  ;;  %v3568_v9 = vmax.f32 %v3536_v24, 0.0 }
 0x500   : > { %v4936_v30 = vmax.f32 %v4904_v51, 0.0  ;;  %5139 = vrot.lane.b32.xlu1 %v4935_v53, %s6225_s23  ;;  %v3502_v53 = vmul.f32 %v9646_v35, %v9705_v50  ;;  %v10879_v50 = vld [vmem:[#allocation106_spill] sm:$0xff] }
 0x502   : > { %5141 = vrot.lane.b32.xlu0 %v4936_v30, %s6225_s23 }
 0x504   : > { %4999 = vrot.lane.b32.xlu1 %v3566_v40, %s6224_s15 }
 0x506   : > { %5001 = vrot.lane.b32.xlu0 %v3567_v45, %s6224_s15 }
 0x509   : > { %v5857_v56 = vpop.f32.mrb[120].mxu1 }
 0x50a   : > { %v5858_v37 = vpop.f32.mrb[121].mxu1 }
 0x50b   : > { %v5859_v47 = vadd.f32 %v5858_v37, %v5857_v56  ;;  %v4780_v15 = vpop.f32.mrb[132].mxu0  ;;  %v5860_v8 = vpop.f32.mrb[122].mxu1  ;;  %v3503_v37 = vmul.f32 %v9646_v35, %v9717_v59 }
 0x50c   : > { %v4869_v25 = vmul.f32 %v9537_v0, %v4780_v15  ;;  %v4782_v38 = vpop.f32.mrb[133].mxu0  ;;  %v5861_v39 = vpop.f32.mrb[123].mxu1 }
 0x50d   : > { %v3265_v48 = vadd.f32 %v5859_v47, %v10873_v4  ;;  %v5862_v22 = vadd.f32 %v5861_v39, %v5860_v8  ;;  %v4783_v19 = vpop.f32.mrb[134].mxu0 }
 0x50e   : > { %v4905_v12 = vadd.f32 %v9543_v43, %v4869_v25  ;;  %v4870_v41 = vmul.f32 %v9537_v0, %v4783_v19  ;;  %v4785_v10 = vpop.f32.mrb[135].mxu0  ;;  %v10878_v25 = vld [vmem:[#allocation76_spill] sm:$0xff]  ;;  %v5118_v19 = vpop.permute.xlu0 %5117 }
 0x50f   : > { %v9787_v20 = vadd.f32 %v10874_v1, %v3265_v48  ;;  %v3268_v5 = vadd.f32 %v5862_v22, %v10875_v58  ;;  %v3538_v22 = vadd.f32 %v9654_v31, %v3502_v53  ;;  %v9819_v10 = vpop.permute.xlu1 %5119 }
 0x510   : > { %v4937_v28 = vmax.f32 %v4905_v12, 0.0  ;;  %v4906_v6 = vadd.f32 %v9543_v43, %v4870_v41  ;;  %v3539_v41 = vadd.f32 %v9654_v31, %v3503_v37 }
 0x511   : > { %v9793_v27 = vadd.f32 %v10876_v16, %v3268_v5  ;;  %v3570_v1 = vmax.f32 %v3538_v22, 0.0 }
 0x512   : > { %v4938_v32 = vmax.f32 %v4906_v6, 0.0  ;;  %5143 = vrot.lane.b32.xlu1 %v4937_v28, %s6225_s23  ;;  %v9822_v58 = vpop.permute.xlu0 %5121  ;;  %v3571_v5 = vmax.f32 %v3539_v41, 0.0 }
 0x514   : > { %5145 = vrot.lane.b32.xlu0 %v4938_v32, %s6225_s23 }
 0x516   : > { %5003 = vrot.lane.b32.xlu1 %v3568_v9, %s6224_s15  ;;  %v3504_v9 = vmul.f32 %v9646_v35, %v9739_v46 }
 0x518   : > { %5005 = vrot.lane.b32.xlu0 %v3569_v33, %s6224_s15 }
 0x51a   : > { %v9825_v28 = vpop.permute.xlu1 %5123 }
 0x51c   : > { %v9828_v6 = vpop.permute.xlu0 %5125 }
 0x51d   : > { %v5863_v34 = vpop.f32.mrb[124].mxu1 }
 0x51e   : > { %v5864_v14 = vpop.f32.mrb[125].mxu1 }
 0x51f   : > { %v5865_v17 = vadd.f32 %v5864_v14, %v5863_v34  ;;  %v4788_v55 = vpop.f32.mrb[136].mxu0  ;;  %v5866_v13 = vpop.f32.mrb[126].mxu1 }
 0x520   : > { %v4871_v51 = vmul.f32 %v9537_v0, %v4788_v55  ;;  %v4790_v23 = vpop.f32.mrb[137].mxu0  ;;  %v5867_v30 = vpop.f32.mrb[127].mxu1  ;;  %v10881_v55 = vld [vmem:[#allocation13_spill] sm:$0xff] }
 0x521   : > { %v3273_v40 = vadd.f32 %v5865_v17, %v10877_v7  ;;  %v5868_v45 = vadd.f32 %v5867_v30, %v5866_v13  ;;  %v4791_v56 = vpop.f32.mrb[138].mxu0  ;;  %v10882_v13 = vmax.f32 %v10881_v55, 0.0  ;;  %v3505_v30 = vmul.f32 %v9646_v35, %v9747_v3 }
 0x522   : > { %v4907_v47 = vadd.f32 %v9543_v43, %v4871_v51  ;;  %v4872_v15 = vmul.f32 %v9537_v0, %v4791_v56  ;;  %v4793_v8 = vpop.f32.mrb[139].mxu0 }
 0x523   : > { %v9809_v38 = vadd.f32 %v10878_v25, %v3273_v40  ;;  %v3276_v39 = vadd.f32 %v5868_v45, %v10879_v50  ;;  %v10883_v50 = vld [vmem:[#allocation81_spill] sm:$0xff] }
 0x524   : > { %v4939_v4 = vmax.f32 %v4907_v47, 0.0  ;;  %v4908_v48 = vadd.f32 %v9543_v43, %v4872_v15 }
 0x525   : > { %v9815_v59 = vadd.f32 %v10880_v2, %v3276_v39 }
 0x526   : > { %v4940_v12 = vmax.f32 %v4908_v48, 0.0  ;;  %5147 = vrot.lane.b32.xlu1 %v4939_v4, %s6225_s23  ;;  %v3540_v4 = vadd.f32 %v9654_v31, %v3504_v9 }
 0x528   : > { %5149 = vrot.lane.b32.xlu0 %v4940_v12, %s6225_s23  ;;  %v3572_v9 = vmax.f32 %v3540_v4, 0.0 }
 0x52a   : > { %5007 = vrot.lane.b32.xlu1 %v3570_v1, %s6224_s15  ;;  %v10886_v1 = vld [vmem:[#allocation72_spill] sm:$0xff] }
 0x52c   : > { %5009 = vrot.lane.b32.xlu0 %v3571_v5, %s6224_s15 }
 0x52f   : > { %v9831_v24 = vpop.permute.xlu1 %5127 }
 0x531   : > { %v5869_v16 = vpop.f32.mrb[128].mxu1  ;;  %v9833_v32 = vpop.permute.xlu0 %5129 }
 0x532   : > { %v5870_v63 = vpop.f32.mrb[129].mxu1 }
 0x533   : > { %v5871_v33 = vadd.f32 %v5870_v63, %v5869_v16  ;;  %v4796_v34 = vpop.f32.mrb[140].mxu0  ;;  %v4988_v14 = vpop.permute.xlu1 %4987  ;;  %v3541_v63 = vadd.f32 %v9654_v31, %v3505_v30 }
 0x534   : > { %v4873_v17 = vmul.f32 %v9537_v0, %v4796_v34  ;;  %v5211_v53 = vsel %vm4327_vm12, %v10882_v13, %v4988_v14  ;;  %v5872_v51 = vpop.f32.mrb[130].mxu1  ;;  %v4798_v23 = vpop.f32.mrb[141].mxu0  ;;  %v3506_v13 = vmul.f32 %v9646_v35, %v9761_v61 }
 0x535   : > { %v3281_v7 = vadd.f32 %v5871_v33, %v9353_v62  ;;  %v5243_v40 = vsel %vm4391_vm13, %v5211_v53, %v5116_v18  ;;  %v5873_v45 = vpop.f32.mrb[131].mxu1  ;;  %v4799_v46 = vpop.f32.mrb[142].mxu0  ;;  %v10884_v62 = vld [vmem:[#allocation15_spill] sm:$0xff] }
 0x536   : > { %v4909_v56 = vadd.f32 %v9543_v43, %v4873_v17  ;;  %v5275_v37 = vsel %vm1701_vm3, %v5243_v40, 0.0  ;;  %v5874_v47 = vadd.f32 %v5873_v45, %v5872_v51  ;;  %v4874_v15 = vmul.f32 %v9537_v0, %v4799_v46  ;;  %v4801_v8 = vpop.f32.mrb[143].mxu0  ;;  %v4990_v25 = vpop.permute.xlu0 %4989 }
 0x537   : > { %v9851_v39 = vadd.f32 %v10883_v50, %v3281_v7  ;;  %5307 = vst [vmem:[%s9853_s9] sm:$0xff] %v5275_v37  ;;  %v10885_v3 = vmax.f32 %v10884_v62, 0.0  ;;  %v3507_v46 = vmul.f32 %v9646_v35, %v9769_v54  ;;  %v3542_v4 = vadd.f32 %v9654_v31, %v3506_v13 }
 0x538   : > { %v4941_v48 = vmax.f32 %v4909_v56, 0.0  ;;  %v3284_v22 = vadd.f32 %v5874_v47, %v9357_v60  ;;  %v4910_v2 = vadd.f32 %v9543_v43, %v4874_v15  ;;  %v3573_v60 = vmax.f32 %v3541_v63, 0.0  ;;  %v10887_v15 = vld [vmem:[#allocation123_spill] sm:$0xff] }
 0x539   : > { %v5212_v18 = vsel %vm4327_vm12, %v10885_v3, %v4990_v25  ;;  %v3543_v63 = vadd.f32 %v9654_v31, %v3507_v46 }
 0x53a   : > { %v5244_v12 = vsel %vm4391_vm13, %v5212_v18, %v5118_v19  ;;  %v9865_v5 = vadd.f32 %v10886_v1, %v3284_v22  ;;  %v4942_v16 = vmax.f32 %v4910_v2, 0.0  ;;  %5151 = vrot.lane.b32.xlu1 %v4941_v48, %s6225_s23  ;;  %v10890_v48 = vld [vmem:[#allocation49_spill] sm:$0xff] }
 0x53b   : > { %v5276_v41 = vsel %vm1701_vm3, %v5244_v12, 0.0 }
 0x53c   : > { %5308 = vst [vmem:[%s9853_s9 + $0x8] sm:$0xff] %v5276_v41  ;;  %5153 = vrot.lane.b32.xlu0 %v4942_v16, %s6225_s23  ;;  %v10891_v41 = vld [vmem:[#allocation14_spill] sm:$0xff] }
 0x53d   : > { %v10892_v1 = vmax.f32 %v10891_v41, 0.0  ;;  %v10898_v41 = vld [vmem:[#allocation100_spill] sm:$0xff] }
 0x53e   : > { %5011 = vrot.lane.b32.xlu1 %v3572_v9, %s6224_s15 }
 0x540   : > { %5013 = vrot.lane.b32.xlu0 %v3573_v60, %s6224_s15  ;;  %v3574_v60 = vmax.f32 %v3542_v4, 0.0 }
 0x545   : > { %v5875_v19 = vpop.f32.mrb[132].mxu1 }
 0x546   : > { %v9873_v33 = vpop.permute.xlu1 %5131  ;;  %v5876_v34 = vpop.f32.mrb[133].mxu1 }
 0x547   : > { %v5877_v14 = vadd.f32 %v5876_v34, %v5875_v19  ;;  %v4804_v17 = vpop.f32.mrb[144].mxu0  ;;  %v5878_v55 = vpop.f32.mrb[134].mxu1  ;;  %v3575_v19 = vmax.f32 %v3543_v63, 0.0 }
 0x548   : > { %v4875_v53 = vmul.f32 %v9537_v0, %v4804_v17  ;;  %v4806_v51 = vpop.f32.mrb[145].mxu0  ;;  %v5879_v23 = vpop.f32.mrb[135].mxu1 }
 0x549   : > { %v3289_v30 = vadd.f32 %v5877_v14, %v9380_v52  ;;  %v5880_v7 = vadd.f32 %v5879_v23, %v5878_v55  ;;  %v4807_v40 = vpop.f32.mrb[146].mxu0  ;;  %v9879_v45 = vpop.permute.xlu0 %5133  ;;  %v10888_v52 = vld [vmem:[#allocation12_spill] sm:$0xff] }
 0x54a   : > { %v4911_v56 = vadd.f32 %v9543_v43, %v4875_v53  ;;  %v4876_v37 = vmul.f32 %v9537_v0, %v4807_v40  ;;  %v4809_v47 = vpop.f32.mrb[147].mxu0  ;;  %v4992_v61 = vpop.permute.xlu1 %4991  ;;  %v10889_v50 = vmax.f32 %v10888_v52, 0.0 }
 0x54b   : > { %v9886_v8 = vadd.f32 %v10887_v15, %v3289_v30  ;;  %v3292_v25 = vadd.f32 %v5880_v7, %v9391_v26  ;;  %v3508_v7 = vmul.f32 %v9646_v35, %v9787_v20 }
 0x54c   : > { %v5213_v62 = vsel %vm4327_vm12, %v10889_v50, %v4992_v61  ;;  %v4943_v3 = vmax.f32 %v4911_v56, 0.0  ;;  %v4912_v54 = vadd.f32 %v9543_v43, %v4876_v37  ;;  %v10895_v50 = vld [vmem:[#allocation19_spill] sm:$0xff] }
 0x54d   : > { %v5245_v18 = vsel %vm4391_vm13, %v5213_v62, %v9819_v10  ;;  %v9897_v22 = vadd.f32 %v10890_v48, %v3292_v25  ;;  %v4994_v12 = vpop.permute.xlu0 %4993  ;;  %v10896_v62 = vmax.f32 %v10895_v50, 0.0 }
 0x54e   : > { %v5277_v2 = vsel %vm1701_vm3, %v5245_v18, 0.0  ;;  %v4944_v26 = vmax.f32 %v4912_v54, 0.0  ;;  %v5214_v16 = vsel %vm4327_vm12, %v10892_v1, %v4994_v12  ;;  %5155 = vrot.lane.b32.xlu1 %v4943_v3, %s6225_s23  ;;  %v10897_v54 = vld [vmem:[#allocation25_spill] sm:$0xff] }
 0x54f   : > { %5309 = vst [vmem:[%s9853_s9 + $0x10] sm:$0xff] %v5277_v2  ;;  %v5246_v10 = vsel %vm4391_vm13, %v5214_v16, %v9822_v58  ;;  %v10893_v58 = vld [vmem:[#allocation17_spill] sm:$0xff]  ;;  %v3509_v2 = vmul.f32 %v9646_v35, %v9793_v27 }
 0x550   : > { %v5278_v9 = vsel %vm1701_vm3, %v5246_v10, 0.0  ;;  %5157 = vrot.lane.b32.xlu0 %v4944_v26, %s6225_s23  ;;  %v10894_v53 = vmax.f32 %v10893_v58, 0.0 }
 0x551   : > { %5310 = vst [vmem:[%s9853_s9 + $0x18] sm:$0xff] %v5278_v9  ;;  %v3545_v10 = vadd.f32 %v9654_v31, %v3509_v2 }
 0x552   : > { %5015 = vrot.lane.b32.xlu1 %v3574_v60, %s6224_s15 }
 0x553   : > { %v3577_v9 = vmax.f32 %v3545_v10, 0.0 }
 0x554   : > { %5017 = vrot.lane.b32.xlu0 %v3575_v19, %s6224_s15 }
 0x55b   : > { %v9913_v34 = vpop.permute.xlu1 %5135 }
 0x55d   : > { %v9915_v14 = vpop.permute.xlu0 %5137 }
 0x55e   : > { %v5881_v17 = vpop.f32.mrb[136].mxu1 }
 0x55f   : > { %v4996_v55 = vpop.permute.xlu1 %4995  ;;  %v5882_v13 = vpop.f32.mrb[137].mxu1 }
 0x560   : > { %v5215_v51 = vsel %vm4327_vm12, %v10894_v53, %v4996_v55  ;;  %v5883_v23 = vadd.f32 %v5882_v13, %v5881_v17  ;;  %v5884_v30 = vpop.f32.mrb[138].mxu1  ;;  %v10899_v55 = vld [vmem:[#allocation16_spill] sm:$0xff] }
 0x561   : > { %v5247_v40 = vsel %vm4391_vm13, %v5215_v51, %v9825_v28  ;;  %v5885_v46 = vpop.f32.mrb[139].mxu1  ;;  %v4812_v56 = vpop.f32.mrb[148].mxu0  ;;  %v10900_v13 = vmax.f32 %v10899_v55, 0.0 }
 0x562   : > { %v5279_v37 = vsel %vm1701_vm3, %v5247_v40, 0.0  ;;  %v3297_v47 = vadd.f32 %v5883_v23, %v9415_v21  ;;  %v5886_v61 = vadd.f32 %v5885_v46, %v5884_v30  ;;  %v4877_v15 = vmul.f32 %v9537_v0, %v4812_v56  ;;  %v4998_v25 = vpop.permute.xlu0 %4997  ;;  %v4814_v52 = vpop.f32.mrb[149].mxu0  ;;  %v10901_v30 = vld [vmem:[#allocation18_spill] sm:$0xff] }
 0x563   : > { %5311 = vst [vmem:[%s9853_s9 + $0x20] sm:$0xff] %v5279_v37  ;;  %v5216_v20 = vsel %vm4327_vm12, %v10896_v62, %v4998_v25  ;;  %v4815_v3 = vpop.f32.mrb[150].mxu0  ;;  %v3510_v56 = vmul.f32 %v9646_v35, %v9809_v38  ;;  %v3511_v62 = vmul.f32 %v9646_v35, %v9815_v59 }
 0x564   : > { %v9932_v28 = vadd.f32 %v10897_v54, %v3297_v47  ;;  %v3300_v18 = vadd.f32 %v5886_v61, %v9418_v49  ;;  %v4913_v4 = vadd.f32 %v9543_v43, %v4877_v15  ;;  %v5248_v21 = vsel %vm4391_vm13, %v5216_v20, %v9828_v6  ;;  %v4817_v48 = vpop.f32.mrb[151].mxu0 }
 0x565   : > { %v5280_v12 = vsel %vm1701_vm3, %v5248_v21, 0.0  ;;  %v4878_v26 = vmul.f32 %v9537_v0, %v4815_v3  ;;  %v3544_v49 = vadd.f32 %v9654_v31, %v3508_v7  ;;  %v10902_v7 = vmax.f32 %v10901_v30, 0.0  ;;  %v10903_v48 = vld [vmem:[#allocation89_spill] sm:$0xff] }
 0x566   : > { %v9943_v1 = vadd.f32 %v10898_v41, %v3300_v18  ;;  %v4945_v16 = vmax.f32 %v4913_v4, 0.0  ;;  %5312 = vst [vmem:[%s9853_s9 + $0x28] sm:$0xff] %v5280_v12  ;;  %v3546_v21 = vadd.f32 %v9654_v31, %v3510_v56  ;;  %v10904_v41 = vld [vmem:[#allocation94_spill] sm:$0xff]  ;;  %v3512_v56 = vmul.f32 %v9646_v35, %v9851_v39 }
 0x567   : > { %v4914_v63 = vadd.f32 %v9543_v43, %v4878_v26  ;;  %v3576_v27 = vmax.f32 %v3544_v49, 0.0  ;;  %v3547_v49 = vadd.f32 %v9654_v31, %v3511_v62 }
 0x568   : > { %5159 = vrot.lane.b32.xlu1 %v4945_v16, %s6225_s23 }
 0x569   : > { %v4946_v6 = vmax.f32 %v4914_v63, 0.0  ;;  %v3578_v63 = vmax.f32 %v3546_v21, 0.0 }
 0x56b   : > { %5161 = vrot.lane.b32.xlu0 %v4946_v6, %s6225_s23 }
 0x56c   : > { %5019 = vrot.lane.b32.xlu1 %v3576_v27, %s6224_s15 }
 0x56f   : > { %5021 = vrot.lane.b32.xlu0 %v3577_v9, %s6224_s15  ;;  %v10905_v9 = vld [vmem:[#allocation21_spill] sm:$0xff] }
 0x572   : > { %v9953_v60 = vpop.permute.xlu1 %5139 }
 0x574   : > { %v9955_v19 = vpop.permute.xlu0 %5141 }
 0x576   : > { %v5000_v17 = vpop.permute.xlu1 %4999 }
 0x577   : > { %v5217_v58 = vsel %vm4327_vm12, %v10900_v13, %v5000_v17  ;;  %v10906_v17 = vmax.f32 %v10905_v9, 0.0 }
 0x578   : > { %v5249_v53 = vsel %vm4391_vm13, %v5217_v58, %v9831_v24  ;;  %v5002_v51 = vpop.permute.xlu0 %5001 }
 0x579   : > { %v5281_v23 = vsel %vm1701_vm3, %v5249_v53, 0.0  ;;  %v5218_v40 = vsel %vm4327_vm12, %v10902_v7, %v5002_v51  ;;  %v5887_v46 = vpop.f32.mrb[140].mxu1  ;;  %v10907_v51 = vld [vmem:[#allocation24_spill] sm:$0xff] }
 0x57a   : > { %5313 = vst [vmem:[%s9853_s9 + $0x30] sm:$0xff] %v5281_v23  ;;  %v5250_v37 = vsel %vm4391_vm13, %v5218_v40, %v9833_v32  ;;  %v5888_v47 = vpop.f32.mrb[141].mxu1  ;;  %v4820_v61 = vpop.f32.mrb[152].mxu0  ;;  %v10908_v23 = vmax.f32 %v10907_v51, 0.0 }
 0x57b   : > { %v5282_v24 = vsel %vm1701_vm3, %v5250_v37, 0.0  ;;  %v5889_v15 = vadd.f32 %v5888_v47, %v5887_v46  ;;  %v4879_v25 = vmul.f32 %v9537_v0, %v4820_v61  ;;  %v5890_v52 = vpop.f32.mrb[142].mxu1  ;;  %v4822_v50 = vpop.f32.mrb[153].mxu0 }
 0x57c   : > { %5314 = vst [vmem:[%s9853_s9 + $0x38] sm:$0xff] %v5282_v24  ;;  %v5891_v20 = vpop.f32.mrb[143].mxu1  ;;  %v4823_v3 = vpop.f32.mrb[154].mxu0 }
 0x57d   : > { %v3305_v38 = vadd.f32 %v5889_v15, %v9440_v57  ;;  %v4915_v54 = vadd.f32 %v9543_v43, %v4879_v25  ;;  %v5892_v32 = vadd.f32 %v5891_v20, %v5890_v52  ;;  %v4880_v18 = vmul.f32 %v9537_v0, %v4823_v3  ;;  %v4825_v4 = vpop.f32.mrb[155].mxu0 }
 0x57e   : > { %v3513_v25 = vmul.f32 %v9646_v35, %v9865_v5  ;;  %v10910_v5 = vld [vmem:[#allocation109_spill] sm:$0xff] }
 0x57f   : > { %v9981_v2 = vadd.f32 %v10903_v48, %v3305_v38  ;;  %v4947_v12 = vmax.f32 %v4915_v54, 0.0  ;;  %v3308_v26 = vadd.f32 %v5892_v32, %v9445_v42  ;;  %v4916_v59 = vadd.f32 %v9543_v43, %v4880_v18  ;;  %v10909_v54 = vld [vmem:[#allocation60_spill] sm:$0xff] }
 0x580   : > { %v3579_v42 = vmax.f32 %v3547_v49, 0.0  ;;  %v3548_v38 = vadd.f32 %v9654_v31, %v3512_v56  ;;  %v10911_v49 = vld [vmem:[#allocation22_spill] sm:$0xff] }
 0x581   : > { %v9986_v16 = vadd.f32 %v10904_v41, %v3308_v26  ;;  %v4948_v57 = vmax.f32 %v4916_v59, 0.0  ;;  %5163 = vrot.lane.b32.xlu1 %v4947_v12, %s6225_s23 }
 0x582   : > { %v3580_v26 = vmax.f32 %v3548_v38, 0.0  ;;  %v3517_v38 = vmul.f32 %v9646_v35, %v9943_v1 }
 0x583   : > { %5165 = vrot.lane.b32.xlu0 %v4948_v57, %s6225_s23 }
 0x584   : > { %v9991_v6 = vpop.permute.xlu1 %5143 }
 0x585   : > { %5023 = vrot.lane.b32.xlu1 %v3578_v63, %s6224_s15  ;;  %v10912_v63 = vmax.f32 %v10911_v49, 0.0 }
 0x586   : > { %v9994_v10 = vpop.permute.xlu0 %5145 }
 0x587   : > { %5025 = vrot.lane.b32.xlu0 %v3579_v42, %s6224_s15 }
 0x588   : > { %v5004_v27 = vpop.permute.xlu1 %5003 }
 0x589   : > { %v5219_v55 = vsel %vm4327_vm12, %v10906_v17, %v5004_v27 }
 0x58a   : > { %v5251_v13 = vsel %vm4391_vm13, %v5219_v55, %v9873_v33  ;;  %v5006_v58 = vpop.permute.xlu0 %5005 }
 0x58b   : > { %v5283_v53 = vsel %vm1701_vm3, %v5251_v13, 0.0  ;;  %v5220_v30 = vsel %vm4327_vm12, %v10908_v23, %v5006_v58  ;;  %v10913_v13 = vld [vmem:[#allocation23_spill] sm:$0xff] }
 0x58c   : > { %5315 = vst [vmem:[%s9853_s9 + $0x40] sm:$0xff] %v5283_v53  ;;  %v5252_v7 = vsel %vm4391_vm13, %v5220_v30, %v9879_v45  ;;  %v10914_v58 = vmax.f32 %v10913_v13, 0.0 }
 0x58d   : > { %v5284_v40 = vsel %vm1701_vm3, %v5252_v7, 0.0  ;;  %v5893_v46 = vpop.f32.mrb[144].mxu1 }
 0x58e   : > { %5316 = vst [vmem:[%s9853_s9 + $0x48] sm:$0xff] %v5284_v40  ;;  %v5894_v37 = vpop.f32.mrb[145].mxu1  ;;  %v4828_v33 = vpop.f32.mrb[156].mxu0  ;;  %v3514_v40 = vmul.f32 %v9646_v35, %v9886_v8 }
 0x58f   : > { %v5895_v47 = vadd.f32 %v5894_v37, %v5893_v46  ;;  %v4881_v61 = vmul.f32 %v9537_v0, %v4828_v33  ;;  %v5896_v24 = vpop.f32.mrb[146].mxu1  ;;  %v4830_v15 = vpop.f32.mrb[157].mxu0 }
 0x590   : > { %v5897_v52 = vpop.f32.mrb[147].mxu1  ;;  %v4831_v50 = vpop.f32.mrb[158].mxu0  ;;  %v10915_v15 = vld [vmem:[#allocation90_spill] sm:$0xff] }
 0x591   : > { %v3313_v45 = vadd.f32 %v5895_v47, %v9473_v44  ;;  %v4917_v62 = vadd.f32 %v9543_v43, %v4881_v61  ;;  %v5898_v20 = vadd.f32 %v5897_v52, %v5896_v24  ;;  %v4882_v39 = vmul.f32 %v9537_v0, %v4831_v50  ;;  %v4833_v3 = vpop.f32.mrb[159].mxu0 }
 0x592   : > { %v3549_v44 = vadd.f32 %v9654_v31, %v3513_v25  ;;  %v3515_v24 = vmul.f32 %v9646_v35, %v9897_v22 }
 0x593   : > { %v3474_v32 = vadd.f32 %v10909_v54, %v3313_v45  ;;  %v4949_v18 = vmax.f32 %v4917_v62, 0.0  ;;  %v3316_v4 = vadd.f32 %v5898_v20, %v9480_v36  ;;  %v4918_v21 = vadd.f32 %v9543_v43, %v4882_v39  ;;  %v10916_v20 = vld [vmem:[#allocation56_spill] sm:$0xff] }
 0x594   : > { %v3581_v41 = vmax.f32 %v3549_v44, 0.0  ;;  %v3550_v62 = vadd.f32 %v9654_v31, %v3514_v40 }
 0x595   : > { %v10024_v48 = vadd.f32 %v10910_v5, %v3316_v4  ;;  %v4950_v12 = vmax.f32 %v4918_v21, 0.0  ;;  %5167 = vrot.lane.b32.xlu1 %v4949_v18, %s6225_s23  ;;  %v3518_v18 = vmul.f32 %v9646_v35, %v9981_v2  ;;  %v3519_v21 = vmul.f32 %v9646_v35, %v9986_v16 }
 0x596   : > { %v3582_v4 = vmax.f32 %v3550_v62, 0.0 }
 0x597   : > { %5169 = vrot.lane.b32.xlu0 %v4950_v12, %s6225_s23  ;;  %v3553_v12 = vadd.f32 %v9654_v31, %v3517_v38  ;;  %v3554_v49 = vadd.f32 %v9654_v31, %v3518_v18  ;;  %v3521_v16 = vmul.f32 %v9646_v35, %v10024_v48  ;;  %v10923_v38 = vld [vmem:[#allocation29_spill] sm:$0xff] }
 0x598   : > { %v10029_v59 = vpop.permute.xlu1 %5147 }
 0x599   : > { %5027 = vrot.lane.b32.xlu1 %v3580_v26, %s6224_s15  ;;  %v3520_v26 = vmul.f32 %v9646_v35, %v3474_v32  ;;  %v3555_v32 = vadd.f32 %v9654_v31, %v3519_v21  ;;  %v3586_v48 = vmax.f32 %v3554_v49, 0.0  ;;  %v10927_v49 = vld [vmem:[#allocation36_spill] sm:$0xff] }
 0x59a   : > { %v10032_v36 = vpop.permute.xlu0 %5149 }
 0x59b   : > { %5029 = vrot.lane.b32.xlu0 %v3581_v41, %s6224_s15 }
 0x59c   : > { %v5008_v57 = vpop.permute.xlu1 %5007 }
 0x59d   : > { %v5221_v42 = vsel %vm4327_vm12, %v10912_v63, %v5008_v57 }
 0x59e   : > { %v5253_v27 = vsel %vm4391_vm13, %v5221_v42, %v9913_v34  ;;  %v5010_v9 = vpop.permute.xlu0 %5009  ;;  %v5899_v17 = vpop.f32.mrb[148].mxu1 }
 0x59f   : > { %v5285_v55 = vsel %vm1701_vm3, %v5253_v27, 0.0  ;;  %v5222_v53 = vsel %vm4327_vm12, %v10914_v58, %v5010_v9  ;;  %v5900_v51 = vpop.f32.mrb[149].mxu1  ;;  %v3585_v9 = vmax.f32 %v3553_v12, 0.0  ;;  %v10925_v12 = vld [vmem:[#allocation34_spill] sm:$0xff] }
 0x5a0   : > { %5317 = vst [vmem:[%s9853_s9 + $0x50] sm:$0xff] %v5285_v55  ;;  %v5254_v23 = vsel %vm4391_vm13, %v5222_v53, %v9915_v14  ;;  %v5901_v30 = vadd.f32 %v5900_v51, %v5899_v17  ;;  %v5902_v7 = vpop.f32.mrb[150].mxu1  ;;  %v10917_v17 = vld [vmem:[#allocation27_spill] sm:$0xff] }
 0x5a1   : > { %v5286_v34 = vsel %vm1701_vm3, %v5254_v23, 0.0  ;;  %v5903_v46 = vpop.f32.mrb[151].mxu1  ;;  %v4836_v56 = vpop.f32.mrb[160].mxu0  ;;  %v10918_v55 = vmax.f32 %v10917_v17, 0.0  ;;  %v3556_v23 = vadd.f32 %v9654_v31, %v3520_v26 }
 0x5a2   : > { %5318 = vst [vmem:[%s9853_s9 + $0x58] sm:$0xff] %v5286_v34  ;;  %v3321_v37 = vadd.f32 %v5901_v30, %v9496_v11  ;;  %v5904_v33 = vadd.f32 %v5903_v46, %v5902_v7  ;;  %v4883_v47 = vmul.f32 %v9537_v0, %v4836_v56  ;;  %v4838_v61 = vpop.f32.mrb[161].mxu0  ;;  %v3516_v11 = vmul.f32 %v9646_v35, %v9932_v28  ;;  %v10919_v7 = vld [vmem:[#allocation30_spill] sm:$0xff] }
 0x5a3   : > { %v4839_v14 = vpop.f32.mrb[162].mxu0  ;;  %v10920_v40 = vmax.f32 %v10919_v7, 0.0  ;;  %v3588_v61 = vmax.f32 %v3556_v23, 0.0 }
 0x5a4   : > { %v3482_v25 = vadd.f32 %v10915_v15, %v3321_v37  ;;  %v3324_v52 = vadd.f32 %v5904_v33, %v9500_v29  ;;  %v4919_v8 = vadd.f32 %v9543_v43, %v4883_v47  ;;  %v4884_v50 = vmul.f32 %v9537_v0, %v4839_v14  ;;  %v4841_v45 = vpop.f32.mrb[163].mxu0 }
 0x5a5   : > { %v3551_v29 = vadd.f32 %v9654_v31, %v3515_v24  ;;  %v3552_v28 = vadd.f32 %v9654_v31, %v3516_v11  ;;  %v3557_v37 = vadd.f32 %v9654_v31, %v3521_v16  ;;  %v10921_v11 = vld [vmem:[#allocation26_spill] sm:$0xff] }
 0x5a6   : > { %v3485_v39 = vadd.f32 %v10916_v20, %v3324_v52  ;;  %v4951_v3 = vmax.f32 %v4919_v8, 0.0  ;;  %v4920_v22 = vadd.f32 %v9543_v43, %v4884_v50  ;;  %v3522_v58 = vmul.f32 %v9646_v35, %v3482_v25 }
 0x5a7   : > { %v3583_v1 = vmax.f32 %v3551_v29, 0.0  ;;  %v3584_v57 = vmax.f32 %v3552_v28, 0.0  ;;  %v10922_v20 = vmax.f32 %v10921_v11, 0.0 }
 0x5a8   : > { %v4952_v54 = vmax.f32 %v4920_v22, 0.0  ;;  %5171 = vrot.lane.b32.xlu1 %v4951_v3, %s6225_s23  ;;  %v3523_v46 = vmul.f32 %v9646_v35, %v3485_v39  ;;  %v3558_v24 = vadd.f32 %v9654_v31, %v3522_v58 }
 0x5aa   : > { %5173 = vrot.lane.b32.xlu0 %v4952_v54, %s6225_s23  ;;  %v3559_v14 = vadd.f32 %v9654_v31, %v3523_v46  ;;  %v3590_v25 = vmax.f32 %v3558_v24, 0.0  ;;  %v10924_v54 = vmax.f32 %v10923_v38, 0.0 }
 0x5ac   : > { %v10074_v5 = vpop.permute.xlu1 %5151  ;;  %5031 = vrot.lane.b32.xlu1 %v3582_v4, %s6224_s15  ;;  %v3591_v8 = vmax.f32 %v3559_v14, 0.0 }
 0x5ad   : > { %v4844_v44 = vpop.f32.mrb[164].mxu0 }
 0x5ae   : > { %v10079_v41 = vpop.permute.xlu0 %5153  ;;  %5033 = vrot.lane.b32.xlu0 %v3583_v1, %s6224_s15  ;;  %v4846_v2 = vpop.f32.mrb[165].mxu0  ;;  %v4885_v47 = vmul.f32 %v9537_v0, %v4844_v44 }
 0x5af   : > { %v4847_v63 = vpop.f32.mrb[166].mxu0 }
 0x5b0   : > { %v5012_v42 = vpop.permute.xlu1 %5011  ;;  %5035 = vrot.lane.b32.xlu1 %v3584_v57, %s6224_s15  ;;  %v4849_v27 = vpop.f32.mrb[167].mxu0  ;;  %v4886_v35 = vmul.f32 %v9537_v0, %v4847_v63  ;;  %v4921_v15 = vadd.f32 %v9543_v43, %v4885_v47  ;;  %v10935_v47 = vld [vmem:[#allocation42_spill] sm:$0xff] }
 0x5b1   : > { %v5223_v13 = vsel %vm4327_vm12, %v10918_v55, %v5012_v42 }
 0x5b2   : > { %v5255_v53 = vsel %vm4391_vm13, %v5223_v13, %v9953_v60  ;;  %v5014_v51 = vpop.permute.xlu0 %5013  ;;  %5037 = vrot.lane.b32.xlu0 %v3585_v9, %s6224_s15  ;;  %v3587_v60 = vmax.f32 %v3555_v32, 0.0  ;;  %v4922_v52 = vadd.f32 %v9543_v43, %v4886_v35  ;;  %v4953_v50 = vmax.f32 %v4921_v15, 0.0 }
 0x5b3   : > { %v5287_v30 = vsel %vm1701_vm3, %v5255_v53, 0.0  ;;  %v5224_v34 = vsel %vm4327_vm12, %v10920_v40, %v5014_v51  ;;  %v10931_v51 = vld [vmem:[#allocation35_spill] sm:$0xff] }
 0x5b4   : > { %5319 = vst [vmem:[%s9853_s9 + $0x60] sm:$0xff] %v5287_v30  ;;  %v5256_v56 = vsel %vm4391_vm13, %v5224_v34, %v9955_v19  ;;  %5039 = vrot.lane.b32.xlu1 %v3586_v48, %s6224_s15  ;;  %v3589_v19 = vmax.f32 %v3557_v37, 0.0  ;;  %v4954_v0 = vmax.f32 %v4922_v52, 0.0  ;;  %v10932_v48 = vmax.f32 %v10931_v51, 0.0  ;;  %v10951_v51 = vld [vmem:[#allocation54_spill] sm:$0xff] }
 0x5b5   : > { %v5288_v33 = vsel %vm1701_vm3, %v5256_v56, 0.0 }
 0x5b6   : > { %5320 = vst [vmem:[%s9853_s9 + $0x68] sm:$0xff] %v5288_v33  ;;  %5041 = vrot.lane.b32.xlu0 %v3587_v60, %s6224_s15 }
 0x5b8   : > { %5043 = vrot.lane.b32.xlu1 %v3588_v61, %s6224_s15  ;;  %v10936_v61 = vmax.f32 %v10935_v47, 0.0 }
 0x5ba   : > { %5045 = vrot.lane.b32.xlu0 %v3589_v19, %s6224_s15 }
 0x5bc   : > { %5047 = vrot.lane.b32.xlu1 %v3590_v25, %s6224_s15  ;;  %v10937_v25 = vld [vmem:[#allocation39_spill] sm:$0xff] }
 0x5bd   : > { %v10938_v52 = vmax.f32 %v10937_v25, 0.0 }
 0x5be   : > { %5049 = vrot.lane.b32.xlu0 %v3591_v8, %s6224_s15  ;;  %s5551_s15 = sshll.u32 %s6290_s28, 12 }
 0x5bf   : > { %s10235_s28 = scalar_lea.hbm %s10293_s7, %s5551_s15 }
 0x5c0   : > { %v5156_v45 = vpop.permute.xlu1 %5155  ;;  %5175 = vrot.lane.b32.xlu1 %v4953_v50, %s6225_s23 }
 0x5c2   : > { %v5158_v31 = vpop.permute.xlu0 %5157  ;;  %5177 = vrot.lane.b32.xlu0 %v4954_v0, %s6225_s23  ;;  %s5353_s23 = sshll.u32 %s9853_s9, 4  ;;  %s10237_s23 = int_to_ptr.vmem [resolvable:$true] %s5353_s23 }
 0x5c3   : > { %s6154_s17 = scalar_lea.vmem %s10237_s23, 4096  ;;  %p6161_p0 = scmp.lt.s32.totalorder %s10237_s23, %s6159_s22 }
 0x5c4   : > { %v5016_v62 = vpop.permute.xlu1 %5015  ;;  %p6155_p11 = scmp.ne.s32.totalorder %s10237_s23, %s6154_s17  ;;  %p6162_p1 = scmp.lt.s32.totalorder %s6160_s19, %s6154_s17 }
 0x5c5   : > { %v5225_v43 = vsel %vm4327_vm12, %v10922_v20, %v5016_v62  ;;  %v10939_v62 = vld [vmem:[#allocation41_spill] sm:$0xff] }
 0x5c6   : > { %v5257_v39 = vsel %vm4391_vm13, %v5225_v43, %v9991_v6  ;;  %v5018_v3 = vpop.permute.xlu0 %5017  ;;  %v10926_v6 = vmax.f32 %v10925_v12, 0.0  ;;  %v10940_v11 = vmax.f32 %v10939_v62, 0.0  ;;  %p6156_p12 = pnand %p6155_p11, %p6307_p5  ;;  %p6163_p2 = por %p6162_p1, %p6161_p0 }
 0x5c7   : > { %v5289_v22 = vsel %vm1701_vm3, %v5257_v39, 0.0  ;;  %v5226_v29 = vsel %vm4327_vm12, %v10924_v54, %v5018_v3  ;;  %v10941_v3 = vld [vmem:[#allocation46_spill] sm:$0xff] }
 0x5c8   : > { %5321 = vst [vmem:[%s9853_s9 + $0x70] sm:$0xff] %v5289_v22  ;;  %v5258_v18 = vsel %vm4391_vm13, %v5226_v29, %v9994_v10  ;;  %v10928_v10 = vmax.f32 %v10927_v49, 0.0  ;;  %v10942_v22 = vmax.f32 %v10941_v3, 0.0  ;;  %p6157_p13 = pneg %p6156_p12 }
 0x5c9   : > { %v5290_v4 = vsel %vm1701_vm3, %v5258_v18, 0.0 }
 0x5ca   : > { %5322 = vst [vmem:[%s9853_s9 + $0x78] sm:$0xff] %v5290_v4  ;;  %v10943_v4 = vld [vmem:[#allocation48_spill] sm:$0xff]  ;;  %p6164_p3 = pnand %p6163_p2, %p6157_p13 }
 0x5da   : > { %v5160_v28 = vpop.permute.xlu1 %5159 }
 0x5dd   : > { %v5162_v21 = vpop.permute.xlu0 %5161 }
 0x5de   : > { %v5020_v1 = vpop.permute.xlu1 %5019 }
 0x5df   : > { %v5227_v44 = vsel %vm4327_vm12, %v10926_v6, %v5020_v1 }
 0x5e0   : > { %v5259_v26 = vsel %vm4391_vm13, %v5227_v44, %v10029_v59  ;;  %v10929_v59 = vld [vmem:[#allocation33_spill] sm:$0xff] }
 0x5e1   : > { %v5291_v2 = vsel %vm1701_vm3, %v5259_v26, 0.0  ;;  %v5022_v57 = vpop.permute.xlu0 %5021  ;;  %v10930_v17 = vmax.f32 %v10929_v59, 0.0  ;;  %v10945_v44 = vld [vmem:[#allocation45_spill] sm:$0xff]  ;;  %v10949_v59 = vld [vmem:[#allocation52_spill] sm:$0xff] }
 0x5e2   : > { %5323 = vst [vmem:[%s9853_s9 + $0x80] sm:$0xff] %v5291_v2  ;;  %v5228_v63 = vsel %vm4327_vm12, %v10928_v10, %v5022_v57  ;;  %v10946_v26 = vmax.f32 %v10945_v44, 0.0 }
 0x5e3   : > { %v5260_v16 = vsel %vm4391_vm13, %v5228_v63, %v10032_v36  ;;  %v10947_v63 = vld [vmem:[#allocation47_spill] sm:$0xff] }
 0x5e4   : > { %v5292_v42 = vsel %vm1701_vm3, %v5260_v16, 0.0  ;;  %v10948_v16 = vmax.f32 %v10947_v63, 0.0 }
 0x5e5   : > { %5324 = vst [vmem:[%s9853_s9 + $0x88] sm:$0xff] %v5292_v42 }
 0x5f3   : > { %v5164_v27 = vpop.permute.xlu1 %5163 }
 0x5f5   : > { %v5166_v9 = vpop.permute.xlu0 %5165 }
 0x5f7   : > { %v5024_v32 = vpop.permute.xlu1 %5023 }
 0x5f8   : > { %v5229_v55 = vsel %vm4327_vm12, %v10930_v17, %v5024_v32  ;;  %v10950_v17 = vmax.f32 %v10949_v59, 0.0 }
 0x5f9   : > { %v5261_v13 = vsel %vm4391_vm13, %v5229_v55, %v10074_v5  ;;  %v5026_v58 = vpop.permute.xlu0 %5025  ;;  %v10933_v5 = vld [vmem:[#allocation40_spill] sm:$0xff] }
 0x5fa   : > { %v5293_v53 = vsel %vm1701_vm3, %v5261_v13, 0.0  ;;  %v5230_v36 = vsel %vm4327_vm12, %v10932_v48, %v5026_v58  ;;  %v10934_v46 = vmax.f32 %v10933_v5, 0.0  ;;  %v10952_v48 = vmax.f32 %v10951_v51, 0.0 }
 0x5fb   : > { %5325 = vst [vmem:[%s9853_s9 + $0x90] sm:$0xff] %v5293_v53  ;;  %v5262_v23 = vsel %vm4391_vm13, %v5230_v36, %v10079_v41 }
 0x5fc   : > { %v5294_v30 = vsel %vm1701_vm3, %v5262_v23, 0.0 }
 0x5fd   : > { %5326 = vst [vmem:[%s9853_s9 + $0x98] sm:$0xff] %v5294_v30 }
 0x607   : > { %v5168_v7 = vpop.permute.xlu1 %5167 }
 0x609   : > { %v5170_v40 = vpop.permute.xlu0 %5169 }
 0x60b   : > { %v5028_v34 = vpop.permute.xlu1 %5027 }
 0x60c   : > { %v5231_v56 = vsel %vm4327_vm12, %v10934_v46, %v5028_v34  ;;  %v10953_v34 = vld [vmem:[#allocation51_spill] sm:$0xff] }
 0x60d   : > { %v5263_v60 = vsel %vm4391_vm13, %v5231_v56, %v5156_v45  ;;  %v5030_v37 = vpop.permute.xlu0 %5029  ;;  %v10954_v5 = vmax.f32 %v10953_v34, 0.0 }
 0x60e   : > { %v5295_v33 = vsel %vm1701_vm3, %v5263_v60, 0.0  ;;  %v5232_v41 = vsel %vm4327_vm12, %v10936_v61, %v5030_v37  ;;  %v10955_v37 = vld [vmem:[#allocation53_spill] sm:$0xff] }
 0x60f   : > { %5327 = vst [vmem:[%s9853_s9 + $0xa0] sm:$0xff] %v5295_v33  ;;  %v5264_v24 = vsel %vm4391_vm13, %v5232_v41, %v5158_v31  ;;  %v10956_v33 = vmax.f32 %v10955_v37, 0.0 }
 0x610   : > { %v5296_v35 = vsel %vm1701_vm3, %v5264_v24, 0.0 }
 0x611   : > { %5328 = vst [vmem:[%s9853_s9 + $0xa8] sm:$0xff] %v5296_v35 }
 0x61a   : > { %v5172_v19 = vpop.permute.xlu1 %5171 }
 0x61c   : > { %v5174_v14 = vpop.permute.xlu0 %5173 }
 0x61e   : > { %v5032_v15 = vpop.permute.xlu1 %5031 }
 0x61f   : > { %v5233_v8 = vsel %vm4327_vm12, %v10938_v52, %v5032_v15 }
 0x620   : > { %v5265_v50 = vsel %vm4391_vm13, %v5233_v8, %v5160_v28  ;;  %v5034_v0 = vpop.permute.xlu0 %5033  ;;  %v10944_v28 = vmax.f32 %v10943_v4, 0.0 }
 0x621   : > { %v5297_v45 = vsel %vm1701_vm3, %v5265_v50, 0.0  ;;  %v5234_v31 = vsel %vm4327_vm12, %v10940_v11, %v5034_v0 }
 0x622   : > { %5329 = vst [vmem:[%s9853_s9 + $0xb0] sm:$0xff] %v5297_v45  ;;  %v5266_v20 = vsel %vm4391_vm13, %v5234_v31, %v5162_v21  ;;  %v5036_v43 = vpop.permute.xlu1 %5035 }
 0x623   : > { %v5298_v39 = vsel %vm1701_vm3, %v5266_v20, 0.0  ;;  %v5235_v38 = vsel %vm4327_vm12, %v10942_v22, %v5036_v43 }
 0x624   : > { %5330 = vst [vmem:[%s9853_s9 + $0xb8] sm:$0xff] %v5298_v39  ;;  %v5267_v54 = vsel %vm4391_vm13, %v5235_v38, %v5164_v27  ;;  %v5038_v29 = vpop.permute.xlu0 %5037 }
 0x625   : > { %v5299_v18 = vsel %vm1701_vm3, %v5267_v54, 0.0  ;;  %v5236_v1 = vsel %vm4327_vm12, %v10944_v28, %v5038_v29 }
 0x626   : > { %5331 = vst [vmem:[%s9853_s9 + $0xc0] sm:$0xff] %v5299_v18  ;;  %v5268_v21 = vsel %vm4391_vm13, %v5236_v1, %v5166_v9  ;;  %v5040_v12 = vpop.permute.xlu1 %5039 }
 0x627   : > { %v5300_v6 = vsel %vm1701_vm3, %v5268_v21, 0.0  ;;  %v5237_v2 = vsel %vm4327_vm12, %v10946_v26, %v5040_v12 }
 0x628   : > { %5332 = vst [vmem:[%s9853_s9 + $0xc8] sm:$0xff] %v5300_v6  ;;  %v5269_v57 = vsel %vm4391_vm13, %v5237_v2, %v5168_v7  ;;  %v5042_v49 = vpop.permute.xlu0 %5041 }
 0x629   : > { %v5301_v10 = vsel %vm1701_vm3, %v5269_v57, 0.0  ;;  %v5238_v42 = vsel %vm4327_vm12, %v10948_v16, %v5042_v49 }
 0x62a   : > { %5333 = vst [vmem:[%s9853_s9 + $0xd0] sm:$0xff] %v5301_v10  ;;  %v5270_v27 = vsel %vm4391_vm13, %v5238_v42, %v5170_v40  ;;  %v5044_v9 = vpop.permute.xlu1 %5043 }
 0x62b   : > { %v5302_v32 = vsel %vm1701_vm3, %v5270_v27, 0.0  ;;  %v5239_v55 = vsel %vm4327_vm12, %v10950_v17, %v5044_v9 }
 0x62c   : > { %5334 = vst [vmem:[%s9853_s9 + $0xd8] sm:$0xff] %v5302_v32  ;;  %v5271_v13 = vsel %vm4391_vm13, %v5239_v55, %v5172_v19  ;;  %v5046_v58 = vpop.permute.xlu0 %5045 }
 0x62d   : > { %v5303_v53 = vsel %vm1701_vm3, %v5271_v13, 0.0  ;;  %v5240_v36 = vsel %vm4327_vm12, %v10952_v48, %v5046_v58 }
 0x62e   : > { %5335 = vst [vmem:[%s9853_s9 + $0xe0] sm:$0xff] %v5303_v53  ;;  %v5272_v23 = vsel %vm4391_vm13, %v5240_v36, %v5174_v14  ;;  %v5048_v30 = vpop.permute.xlu1 %5047 }
 0x62f   : > { %v5304_v7 = vsel %vm1701_vm3, %v5272_v23, 0.0  ;;  %v5241_v46 = vsel %vm4327_vm12, %v10954_v5, %v5048_v30 }
 0x630   : > { %5336 = vst [vmem:[%s9853_s9 + $0xe8] sm:$0xff] %v5304_v7  ;;  %v5050_v40 = vpop.permute.xlu0 %5049 }
 0x631   : > { %v5242_v47 = vsel %vm4327_vm12, %v10956_v33, %v5050_v40 }
 0x632   : > { %v5176_v56 = vpop.permute.xlu1 %5175 }
 0x633   : > { %v5273_v60 = vsel %vm4391_vm13, %v5241_v46, %v5176_v56 }
 0x634   : > { %v5305_v61 = vsel %vm1701_vm3, %v5273_v60, 0.0  ;;  %v5178_v41 = vpop.permute.xlu0 %5177 }
 0x635   : > { %5337 = vst [vmem:[%s9853_s9 + $0xf0] sm:$0xff] %v5305_v61  ;;  %v5274_v24 = vsel %vm4391_vm13, %v5242_v47, %v5178_v41 }
 0x636   : > { %v5306_v35 = vsel %vm1701_vm3, %v5274_v24, 0.0 }
 0x637   : > { %5338 = vst [vmem:[%s9853_s9 + $0xf8] sm:$0xff] %v5306_v35 }
 0x638   : > { %6167 = shalt.err (!%p6164_p3)
}
 0x639   : > { %s6168_s20 = scalar_lea.hbm %s10235_s28, 4096  ;;  %s6172_s8 = scalar_lea.hbm %s10293_s7, 8192 }
 0x63a   : > { %p6169_p4 = scmp.ne.s32.totalorder %s10235_s28, %s6168_s20  ;;  %p6173_p9 = scmp.lt.u32.totalorder %s10235_s28, %s10293_s7 }
 0x63b   : > { %p6174_p10 = scmp.lt.u32.totalorder %s6172_s8, %s6168_s20  ;;  %p6176_p12 = scmp.lt.u32.totalorder %s6168_s20, %s10235_s28 }
 0x63c   : > { %p6170_p7 = pnand %p6169_p4, %p6307_p5 }
 0x63d   : > { %p6175_p11 = por %p6174_p10, %p6173_p9 }
 0x63e   : > { %p6171_p8 = pneg %p6170_p7 }
 0x63f   : > { %p6177_p13 = por %p6176_p12, %p6175_p11 }
 0x641   : > { %p6178_p0 = pnand %p6177_p13, %p6171_p8 }
 0x643   : > { %6181 = shalt.err (!%p6178_p0)
}
 0x644   : > { %s6227_s13 = smov 128   ;;  %s6228_s14 = smov 8  }
 0x645   : > { %6010 = dma.vmem_to_hbm [thread:$0]  (%p6307_p5), %s10237_s23, 4096, %s10235_s28, %s10245_s16, %s6227_s13, %s6227_s13, %s6228_s14  }
 0x646 PF: > { %p6016_p1 = scmp.ge.s32.totalorder %s6216_s27, 2  ;;  %s5368_s17 = sand.u32 1, %s6204_s24  }
 0x647   : > { %s5369_s18 = scalar_lea.sflag [#allocation3], %s5368_s17 }
 0x648   : > { %p6013_p2 = pnand %p6016_p1, %p6311_p6 }
 0x64a   : > { %6199 = dma.done.wait (!%p6013_p2), %s5369_s18, 4096  }
 0x64b   : > { %6201 = vsyncadd (!%p6013_p2), %s5369_s18, 4294963200  ;;  %p17_p3 = scmp.ge.s32.totalorder %s6294_s30, 4   ;;  %s10957_s24 = smov %s6208_s25 }
 0x64c   : > { %s10958_s25 = smov %s6212_s26  ;;  %s10959_s26 = smov %s6305_s10 }
 0x64d   : > { %s10960_s27 = smov %s6294_s30  ;;  %19 = sbr.rel (!%p17_p3) target bundleno = 3 (0x3), region = 83 }
 0x654   :  { %5374 = vsyncpa [#allocation3], 1 }
 0x655   :  { %5376 = vsyncpa [#allocation3 + $0x1], 1 }

</bundles_post_ra>
